<compile_context>
chip_gen: v5e
topology: v5e:2x2
jax: 0.10.0
libtpu: 0.0.40
codegen_flags: <defaults>
</compile_context>

<pallas_src>
import functools

import jax
import jax.numpy as jnp
import numpy as np
from jax.experimental import pallas as pl
from jax.experimental.pallas import tpu as pltpu

GATE_HIDDEN = 16


# ----------------------------------------------------------------------------
# Fused Pallas kernel: block1 + pool + block2 + pool + block3 + GAP + Linear
# ----------------------------------------------------------------------------
def _fused_forward_kernel(H, W, C, NB,
                          xcol_ref, xgap_ref, mask2_ref, mask3_ref,
                          sel1_ref, sel2_ref,
                          w1_ref, b1_ref, g1w1_ref, g1b1_ref, g1w2_ref, g1b2_ref,
                          w2_ref, b2_ref, g2w1_ref, g2b1_ref, g2w2_ref, g2b2_ref,
                          w3_ref, b3_ref, g3w1_ref, g3b1_ref, g3w2_ref, g3b2_ref,
                          hw_ref, hb_ref,
                          o_ref):
    f32 = jnp.float32
    bf16 = jnp.bfloat16

    def hard_gate(gap, gw1, gb1, gw2, gb2):
        # Eval-mode channel gate: GAP(block input) -> MLP(16) -> (logit > 0).
        h = jnp.maximum(
            jnp.dot(gap, gw1[...], preferred_element_type=f32) + gb1[...], 0.0)
        logit = jnp.dot(h, gw2[...], preferred_element_type=f32) + gb2[...]
        return (logit > 0.0).astype(f32)                      # (NB, C)

    def apply_gate(y, gates, n_per):
        # ReLU then per-sample binary gate (order-equivalent for binary gates).
        y = jnp.maximum(y, 0.0)
        y3 = y.reshape(NB, n_per, C)
        return (y3 * gates[:, None, :]).reshape(NB * n_per, C)

    def maxpool2x2(flat, Hc, Wc, sel_ref):
        # flat: (NB*Hc*Wc, C) row-major over (sample, h, w).
        M = NB * (Hc // 2) * Wc
        v = flat.reshape(NB * (Hc // 2), 2 * Wc, C)           # tiling-safe reshape
        rmax = jnp.maximum(v[:, :Wc, :], v[:, Wc:, :]).reshape(M, C)   # H-pool
        # W-pool: pair-max via XLU roll, then ONE even-row selection matmul
        # (one-hot matrix is a precomputed bf16 constant -> exact).
        wmax = jnp.maximum(rmax, pltpu.roll(rmax, M - 1, 0))
        return jnp.dot(sel_ref[...], wmax.astype(bf16),
                       preferred_element_type=f32)            # (M//2, C)

    def conv3x3(flat, Hc, Wc, w_ref, b_ref, mask_ref):
        # 3x3 conv, padding=1, channels-last flat activation (NB*Hc*Wc, C).
        # All 9 taps built with XLU rolls + precomputed boundary masks and
        # concatenated to a single (N, 9*C) bf16 patch -> ONE K=9*C matmul.
        N = NB * Hc * Wc
        taps = []
        t = 0
        for dy in (-1, 0, 1):
            for dx in (-1, 0, 1):
                if dy == 0 and dx == 0:
                    taps.append(flat.astype(bf16))
                else:
                    shift = (-(dy * Wc + dx)) % N
                    taps.append((pltpu.roll(flat, shift, 0)
                                 * mask_ref[t]).astype(bf16))
                t += 1
        patch = jnp.concatenate(taps, axis=1)                 # (N, 9*C) bf16
        return jnp.dot(patch, w_ref[...], preferred_element_type=f32) + b_ref[...]

    # ---- block 1 ('down'): im2col conv (K = 9*Cin) + gate + ReLU + maxpool --
    gates1 = hard_gate(xgap_ref[0], g1w1_ref, g1b1_ref, g1w2_ref, g1b2_ref)
    y1 = (jnp.dot(xcol_ref[...], w1_ref[...], preferred_element_type=f32)
          + b1_ref[...])
    y1 = apply_gate(y1, gates1, H * W)
    h1 = maxpool2x2(y1, H, W, sel1_ref)                       # (NB*H/2*W/2, C)

    # ---- block 2 ('down'): gated conv + ReLU + maxpool ----------------------
    H2, W2 = H // 2, W // 2
    gap2 = jnp.mean(h1.reshape(NB, H2 * W2, C), axis=1)       # per-sample GAP
    gates2 = hard_gate(gap2, g2w1_ref, g2b1_ref, g2w2_ref, g2b2_ref)
    y2 = conv3x3(h1, H2, W2, w2_ref, b2_ref, mask2_ref)
    y2 = apply_gate(y2, gates2, H2 * W2)
    h2 = maxpool2x2(y2, H2, W2, sel2_ref)                     # (NB*H/4*W/4, C)

    # ---- block 3 ('same'): gated conv + ReLU --------------------------------
    H3, W3 = H2 // 2, W2 // 2
    gap3 = jnp.mean(h2.reshape(NB, H3 * W3, C), axis=1)
    gates3 = hard_gate(gap3, g3w1_ref, g3b1_ref, g3w2_ref, g3b2_ref)
    y3 = conv3x3(h2, H3, W3, w3_ref, b3_ref, mask3_ref)
    h3 = apply_gate(y3, gates3, H3 * W3)

    # ---- head: GAP -> Linear(128, out_pad=128 lanes) -------------------------
    feat = jnp.mean(h3.reshape(NB, H3 * W3, C), axis=1)       # (NB, C)
    o_ref[0] = (jnp.dot(feat, hw_ref[...], preferred_element_type=f32)
                + hb_ref[...])


# ----------------------------------------------------------------------------
# Wrapper-side constants (numpy -> baked in at trace time)
# ----------------------------------------------------------------------------
def _conv_masks_np(Hc, Wc, nb):
    """(9, nb*Hc*Wc, 1) validity masks for the 9 roll-based conv taps."""
    n = nb * Hc * Wc
    p = np.arange(n)
    row = (p % (Hc * Wc)) // Wc
    col = p % Wc
    out = np.zeros((9, n, 1), np.float32)
    t = 0
    for dy in (-1, 0, 1):
        for dx in (-1, 0, 1):
            valid = ((row + dy >= 0) & (row + dy < Hc)
                     & (col + dx >= 0) & (col + dx < Wc))
            out[t, :, 0] = valid.astype(np.float32)
            t += 1
    return out


def _pool_select_np(m):
    """(m//2, m) one-hot even-row selector (exact in bf16)."""
    s = np.zeros((m // 2, m), np.float32)
    s[np.arange(m // 2), 2 * np.arange(m // 2)] = 1.0
    return s


def _grid_steps(batch):
    """1 step on single-TC chips (v5e/v6e); 2 steps on v7x (2 TensorCores)."""
    try:
        kind = jax.devices()[0].device_kind.lower()
    except Exception:
        kind = ""
    if "v7" in kind and batch >= 2 and batch % 2 == 0:
        return 2
    return 1


def _fused_forward(x_col, x_gap, head_w, head_b, params, H, W,
                   num_steps, b_tile):
    b1p, b2p, b3p = params["block1"], params["block2"], params["block3"]
    C = b1p["gw2"].shape[-1]
    hw = H * W
    out_pad = head_w.shape[-1]

    mask2 = jnp.asarray(_conv_masks_np(H // 2, W // 2, b_tile))
    mask3 = jnp.asarray(_conv_masks_np(H // 4, W // 4, b_tile))
    sel1 = jnp.asarray(_pool_select_np(b_tile * (H // 2) * W),
                       dtype=jnp.bfloat16)
    sel2 = jnp.asarray(_pool_select_np(b_tile * (H // 4) * (W // 2)),
                       dtype=jnp.bfloat16)

    const_args = (
        mask2, mask3, sel1, sel2,
        b1p["w"], b1p["b"], b1p["gw1"], b1p["gb1"], b1p["gw2"], b1p["gb2"],
        b2p["w"], b2p["b"], b2p["gw1"], b2p["gb1"], b2p["gw2"], b2p["gb2"],
        b3p["w"], b3p["b"], b3p["gw1"], b3p["gb1"], b3p["gw2"], b3p["gb2"],
        head_w, head_b,
    )

    def const_spec(a):
        nd = a.ndim
        return pl.BlockSpec(a.shape, lambda i: (0,) * nd)

    in_specs = ([pl.BlockSpec((b_tile * hw, x_col.shape[-1]), lambda i: (i, 0)),
                 pl.BlockSpec((1, b_tile, x_gap.shape[-1]),
                              lambda i: (i, 0, 0))]
                + [const_spec(a) for a in const_args])

    kernel = functools.partial(_fused_forward_kernel, H, W, C, b_tile)
    out = pl.pallas_call(
        kernel,
        out_shape=jax.ShapeDtypeStruct((num_steps, b_tile, out_pad),
                                       jnp.float32),
        grid=(num_steps,),
        in_specs=in_specs,
        out_specs=pl.BlockSpec((1, b_tile, out_pad), lambda i: (i, 0, 0)),
        compiler_params=pltpu.CompilerParams(
            dimension_semantics=("parallel",)),
    )(x_col, x_gap, *const_args)
    return out.reshape(num_steps * b_tile, out_pad)


# ----------------------------------------------------------------------------
# Glue (plain JAX on tiny tensors): im2col of the 4-channel input, param init
# ----------------------------------------------------------------------------
def _im2col_3x3(x):
    """x: (B, H, W, C) -> (B, H*W, 9*C), tap-major columns, padding=1."""
    B, H, W, C = x.shape
    xp = jnp.pad(x, ((0, 0), (1, 1), (1, 1), (0, 0)))
    taps = [xp[:, dy:dy + H, dx:dx + W, :] for dy in range(3) for dx in range(3)]
    return jnp.concatenate(taps, axis=-1).reshape(B, H * W, 9 * C)


def init_block_params(key, cin, cout):
    k = jax.random.split(key, 3)
    w = jax.random.normal(k[0], (3, 3, cin, cout), jnp.float32) * 0.1
    return dict(
        w=w.reshape(9 * cin, cout).astype(jnp.bfloat16),  # (tap,cin)-major rows
        b=jnp.zeros((1, cout), jnp.float32),
        gw1=jax.random.normal(k[1], (cin, GATE_HIDDEN), jnp.float32) * 0.3,
        gb1=jnp.zeros((1, GATE_HIDDEN), jnp.float32),
        gw2=jax.random.normal(k[2], (GATE_HIDDEN, cout), jnp.float32) * 0.3,
        gb2=jnp.full((1, cout), 0.5, jnp.float32),        # bias gates open
    )


def init_params(key, in_ch, conv_ch, out_dim):
    keys = jax.random.split(key, 5)
    return {
        "block1": init_block_params(keys[0], in_ch, conv_ch),
        "block2": init_block_params(keys[1], conv_ch, conv_ch),
        "block3": init_block_params(keys[2], conv_ch, conv_ch),
        "head_w": jax.random.normal(keys[3], (conv_ch, out_dim),
                                    jnp.float32) * 0.05,
        "head_b": jnp.zeros((1, out_dim), jnp.float32),
    }


@jax.jit
def channel_gated_cl_forward(params, x_nchw, head_idxs):
    """Forward pass of ChannelGatedCL (eval mode, single task path).

    x_nchw: (B, in_ch, H, W) float32 (PyTorch NCHW convention).
    head_idxs: (B,) int32 — with N_tasks == 1 the task-path selection
        x[arange(B), head_idxs] is the identity, so it is elided.
    Returns logits (B, out_dim).
    """
    x = jnp.transpose(x_nchw, (0, 2, 3, 1)).astype(jnp.float32)   # NCHW -> NHWC
    B, H, W, Cin = x.shape
    assert H % 4 == 0 and W % 4 == 0, "spatial dims must be divisible by 4"
    del head_idxs                          # identity selection (N_tasks == 1)

    num_steps = _grid_steps(B)             # 1 on v5e/v6e, 2 on v7x
    b_tile = B // num_steps

    # block1 input: bf16 im2col (halves DMA bytes, no in-kernel cast).
    x_col = _im2col_3x3(x).astype(jnp.bfloat16).reshape(B * H * W, 9 * Cin)
    # block1 gate input: per-sample GAP of the raw input (f32).
    x_gap = jnp.mean(x, axis=(1, 2)).reshape(num_steps, b_tile, Cin)

    # Pad the classifier head to 128 output lanes (lane-dense store).
    out_dim = params["head_b"].shape[-1]
    pad = (-out_dim) % 128
    head_w = jnp.pad(params["head_w"], ((0, 0), (0, pad)))
    head_b = jnp.pad(params["head_b"], ((0, 0), (0, pad)))

    out = _fused_forward(x_col, x_gap, head_w, head_b, params, H, W,
                         num_steps, b_tile)
    return out[:, :out_dim]


if __name__ == "__main__":
    B, IN_CH, H, W = 2, 4, 16, 16
    CONV_CH, OUT_DIM = 128, 10

    key = jax.random.PRNGKey(0)
    kx, kp = jax.random.split(key)
    x = jax.random.normal(kx, (B, IN_CH, H, W), jnp.float32)
    head_idxs = jnp.zeros((B,), jnp.int32)                    # single task path
    params = init_params(kp, IN_CH, CONV_CH, OUT_DIM)

    logits = channel_gated_cl_forward(params, x, head_idxs)
    jax.block_until_ready(logits)
    assert logits.shape == (B, OUT_DIM)
    assert bool(jnp.all(jnp.isfinite(logits)))
    print("KERNEL_OK")
</pallas_src>

<mosaic_0001>
module attributes {stable_mosaic.version = 11 : i64} {
  func.func @_fused_forward_kernel(%arg0: i32, %arg1: memref<512x36xbf16, #tpu.memory_space<vmem>>, %arg2: memref<1x2x4xf32, #tpu.memory_space<vmem>>, %arg3: memref<9x128x1xf32, #tpu.memory_space<vmem>>, %arg4: memref<9x32x1xf32, #tpu.memory_space<vmem>>, %arg5: memref<128x256xbf16, #tpu.memory_space<vmem>>, %arg6: memref<32x64xbf16, #tpu.memory_space<vmem>>, %arg7: memref<36x128xbf16, #tpu.memory_space<vmem>>, %arg8: memref<1x128xf32, #tpu.memory_space<vmem>>, %arg9: memref<4x16xf32, #tpu.memory_space<vmem>>, %arg10: memref<1x16xf32, #tpu.memory_space<vmem>>, %arg11: memref<16x128xf32, #tpu.memory_space<vmem>>, %arg12: memref<1x128xf32, #tpu.memory_space<vmem>>, %arg13: memref<1152x128xbf16, #tpu.memory_space<vmem>>, %arg14: memref<1x128xf32, #tpu.memory_space<vmem>>, %arg15: memref<128x16xf32, #tpu.memory_space<vmem>>, %arg16: memref<1x16xf32, #tpu.memory_space<vmem>>, %arg17: memref<16x128xf32, #tpu.memory_space<vmem>>, %arg18: memref<1x128xf32, #tpu.memory_space<vmem>>, %arg19: memref<1152x128xbf16, #tpu.memory_space<vmem>>, %arg20: memref<1x128xf32, #tpu.memory_space<vmem>>, %arg21: memref<128x16xf32, #tpu.memory_space<vmem>>, %arg22: memref<1x16xf32, #tpu.memory_space<vmem>>, %arg23: memref<16x128xf32, #tpu.memory_space<vmem>>, %arg24: memref<1x128xf32, #tpu.memory_space<vmem>>, %arg25: memref<128x128xf32, #tpu.memory_space<vmem>>, %arg26: memref<1x128xf32, #tpu.memory_space<vmem>>, %arg27: memref<1x2x128xf32, #tpu.memory_space<vmem>>) attributes {dimension_semantics = [#tpu.dimension_semantics<parallel>], iteration_bounds = array<i64: 1>, scalar_prefetch = 0 : i64, scratch_operands = 0 : i64, tpu.core_type = #tpu.core_type<tc>, window_params = [{transform_indices = @transform_0, window_bounds = array<i64: 512, 36>}, {transform_indices = @transform_1, window_bounds = array<i64: 1, 2, 4>}, {pipeline_mode = #tpu.pipeline_mode<synchronous>, transform_indices = @transform_2, window_bounds = array<i64: 9, 128, 1>}, {pipeline_mode = #tpu.pipeline_mode<synchronous>, transform_indices = @transform_3, window_bounds = array<i64: 9, 32, 1>}, {pipeline_mode = #tpu.pipeline_mode<synchronous>, transform_indices = @transform_4, window_bounds = array<i64: 128, 256>}, {pipeline_mode = #tpu.pipeline_mode<synchronous>, transform_indices = @transform_5, window_bounds = array<i64: 32, 64>}, {pipeline_mode = #tpu.pipeline_mode<synchronous>, transform_indices = @transform_6, window_bounds = array<i64: 36, 128>}, {pipeline_mode = #tpu.pipeline_mode<synchronous>, transform_indices = @transform_7, window_bounds = array<i64: 1, 128>}, {pipeline_mode = #tpu.pipeline_mode<synchronous>, transform_indices = @transform_8, window_bounds = array<i64: 4, 16>}, {pipeline_mode = #tpu.pipeline_mode<synchronous>, transform_indices = @transform_9, window_bounds = array<i64: 1, 16>}, {pipeline_mode = #tpu.pipeline_mode<synchronous>, transform_indices = @transform_10, window_bounds = array<i64: 16, 128>}, {pipeline_mode = #tpu.pipeline_mode<synchronous>, transform_indices = @transform_11, window_bounds = array<i64: 1, 128>}, {pipeline_mode = #tpu.pipeline_mode<synchronous>, transform_indices = @transform_12, window_bounds = array<i64: 1152, 128>}, {pipeline_mode = #tpu.pipeline_mode<synchronous>, transform_indices = @transform_13, window_bounds = array<i64: 1, 128>}, {pipeline_mode = #tpu.pipeline_mode<synchronous>, transform_indices = @transform_14, window_bounds = array<i64: 128, 16>}, {pipeline_mode = #tpu.pipeline_mode<synchronous>, transform_indices = @transform_15, window_bounds = array<i64: 1, 16>}, {pipeline_mode = #tpu.pipeline_mode<synchronous>, transform_indices = @transform_16, window_bounds = array<i64: 16, 128>}, {pipeline_mode = #tpu.pipeline_mode<synchronous>, transform_indices = @transform_17, window_bounds = array<i64: 1, 128>}, {pipeline_mode = #tpu.pipeline_mode<synchronous>, transform_indices = @transform_18, window_bounds = array<i64: 1152, 128>}, {pipeline_mode = #tpu.pipeline_mode<synchronous>, transform_indices = @transform_19, window_bounds = array<i64: 1, 128>}, {pipeline_mode = #tpu.pipeline_mode<synchronous>, transform_indices = @transform_20, window_bounds = array<i64: 128, 16>}, {pipeline_mode = #tpu.pipeline_mode<synchronous>, transform_indices = @transform_21, window_bounds = array<i64: 1, 16>}, {pipeline_mode = #tpu.pipeline_mode<synchronous>, transform_indices = @transform_22, window_bounds = array<i64: 16, 128>}, {pipeline_mode = #tpu.pipeline_mode<synchronous>, transform_indices = @transform_23, window_bounds = array<i64: 1, 128>}, {pipeline_mode = #tpu.pipeline_mode<synchronous>, transform_indices = @transform_24, window_bounds = array<i64: 128, 128>}, {pipeline_mode = #tpu.pipeline_mode<synchronous>, transform_indices = @transform_25, window_bounds = array<i64: 1, 128>}, {transform_indices = @transform_26, window_bounds = array<i64: 1, 2, 128>}]} {
    %c0 = arith.constant 0 : index
    %c0_0 = arith.constant 0 : index
    %c0_1 = arith.constant 0 : index
    %0 = vector.load %arg2[%c0, %c0_0, %c0_1] : memref<1x2x4xf32, #tpu.memory_space<vmem>>, vector<1x2x4xf32>
    %1 = vector.shape_cast %0 : vector<1x2x4xf32> to vector<2x4xf32>
    %c0_2 = arith.constant 0 : index
    %c0_3 = arith.constant 0 : index
    %2 = vector.load %arg9[%c0_2, %c0_3] : memref<4x16xf32, #tpu.memory_space<vmem>>, vector<4x16xf32>
    %cst = arith.constant dense<0.000000e+00> : vector<2x16xf32>
    %3 = tpu.matmul %1, %2, %cst {dimension_numbers = #tpu.dot_dimension_numbers<[1], [0], [0], [1], [0, 0, 1, 1], [], []>} : vector<2x4xf32>, vector<4x16xf32>, vector<2x16xf32> -> vector<2x16xf32>
    %c0_4 = arith.constant 0 : index
    %c0_5 = arith.constant 0 : index
    %4 = vector.load %arg10[%c0_4, %c0_5] : memref<1x16xf32, #tpu.memory_space<vmem>>, vector<1x16xf32>
    %5 = vector.broadcast %4 : vector<1x16xf32> to vector<2x16xf32>
    %6 = arith.addf %3, %5 : vector<2x16xf32>
    %cst_6 = arith.constant 0.000000e+00 : f32
    %7 = vector.broadcast %cst_6 : f32 to vector<2x16xf32>
    %8 = arith.maximumf %6, %7 : vector<2x16xf32>
    %c0_7 = arith.constant 0 : index
    %c0_8 = arith.constant 0 : index
    %9 = vector.load %arg11[%c0_7, %c0_8] : memref<16x128xf32, #tpu.memory_space<vmem>>, vector<16x128xf32>
    %cst_9 = arith.constant dense<0.000000e+00> : vector<2x128xf32>
    %10 = tpu.matmul %8, %9, %cst_9 {dimension_numbers = #tpu.dot_dimension_numbers<[1], [0], [0], [1], [0, 0, 1, 1], [], []>} : vector<2x16xf32>, vector<16x128xf32>, vector<2x128xf32> -> vector<2x128xf32>
    %c0_10 = arith.constant 0 : index
    %c0_11 = arith.constant 0 : index
    %11 = vector.load %arg12[%c0_10, %c0_11] : memref<1x128xf32, #tpu.memory_space<vmem>>, vector<1x128xf32>
    %12 = vector.broadcast %11 : vector<1x128xf32> to vector<2x128xf32>
    %13 = arith.addf %10, %12 : vector<2x128xf32>
    %cst_12 = arith.constant 0.000000e+00 : f32
    %14 = vector.broadcast %cst_12 : f32 to vector<2x128xf32>
    %15 = arith.cmpf ogt, %13, %14 : vector<2x128xf32>
    %16 = arith.extui %15 : vector<2x128xi1> to vector<2x128xi32>
    %17 = arith.sitofp %16 : vector<2x128xi32> to vector<2x128xf32>
    %c0_13 = arith.constant 0 : index
    %c0_14 = arith.constant 0 : index
    %18 = vector.load %arg1[%c0_13, %c0_14] : memref<512x36xbf16, #tpu.memory_space<vmem>>, vector<512x36xbf16>
    %c0_15 = arith.constant 0 : index
    %c0_16 = arith.constant 0 : index
    %19 = vector.load %arg7[%c0_15, %c0_16] : memref<36x128xbf16, #tpu.memory_space<vmem>>, vector<36x128xbf16>
    %cst_17 = arith.constant dense<0.000000e+00> : vector<512x128xf32>
    %20 = tpu.matmul %18, %19, %cst_17 {dimension_numbers = #tpu.dot_dimension_numbers<[1], [0], [0], [1], [0, 0, 1, 1], [], []>} : vector<512x36xbf16>, vector<36x128xbf16>, vector<512x128xf32> -> vector<512x128xf32>
    %c0_18 = arith.constant 0 : index
    %c0_19 = arith.constant 0 : index
    %21 = vector.load %arg8[%c0_18, %c0_19] : memref<1x128xf32, #tpu.memory_space<vmem>>, vector<1x128xf32>
    %22 = vector.broadcast %21 : vector<1x128xf32> to vector<512x128xf32>
    %23 = arith.addf %20, %22 : vector<512x128xf32>
    %cst_20 = arith.constant 0.000000e+00 : f32
    %24 = vector.broadcast %cst_20 : f32 to vector<512x128xf32>
    %25 = arith.maximumf %23, %24 : vector<512x128xf32>
    %26 = vector.shape_cast %25 : vector<512x128xf32> to vector<2x256x128xf32>
    %27 = vector.shape_cast %17 : vector<2x128xf32> to vector<2x1x128xf32>
    %28 = vector.broadcast %27 : vector<2x1x128xf32> to vector<2x256x128xf32>
    %29 = arith.mulf %26, %28 : vector<2x256x128xf32>
    %30 = vector.shape_cast %29 : vector<2x256x128xf32> to vector<512x128xf32>
    %31 = vector.shape_cast %30 : vector<512x128xf32> to vector<16x32x128xf32>
    %32 = vector.extract_strided_slice %31 {offsets = [0, 0, 0], sizes = [16, 16, 128], strides = [1, 1, 1]} : vector<16x32x128xf32> to vector<16x16x128xf32>
    %33 = vector.extract_strided_slice %31 {offsets = [0, 16, 0], sizes = [16, 16, 128], strides = [1, 1, 1]} : vector<16x32x128xf32> to vector<16x16x128xf32>
    %34 = arith.maximumf %32, %33 : vector<16x16x128xf32>
    %35 = vector.shape_cast %34 : vector<16x16x128xf32> to vector<256x128xf32>
    %c255_i32 = arith.constant 255 : i32
    %36 = tpu.dynamic_rotate %35 by %c255_i32 dim 0 : vector<256x128xf32>, i32 -> vector<256x128xf32>
    %37 = arith.maximumf %35, %36 : vector<256x128xf32>
    %c0_21 = arith.constant 0 : index
    %c0_22 = arith.constant 0 : index
    %38 = vector.load %arg5[%c0_21, %c0_22] : memref<128x256xbf16, #tpu.memory_space<vmem>>, vector<128x256xbf16>
    %39 = arith.truncf %37 : vector<256x128xf32> to vector<256x128xbf16>
    %cst_23 = arith.constant dense<0.000000e+00> : vector<128x128xf32>
    %40 = tpu.matmul %38, %39, %cst_23 {dimension_numbers = #tpu.dot_dimension_numbers<[1], [0], [0], [1], [0, 0, 1, 1], [], []>} : vector<128x256xbf16>, vector<256x128xbf16>, vector<128x128xf32> -> vector<128x128xf32>
    %41 = vector.shape_cast %40 : vector<128x128xf32> to vector<2x64x128xf32>
    %cst_24 = arith.constant dense<0.000000e+00> : vector<2x128xf32>
    %42 = vector.multi_reduction <add>, %41, %cst_24 [1] : vector<2x64x128xf32> to vector<2x128xf32>
    %cst_25 = arith.constant 6.400000e+01 : f32
    %43 = vector.broadcast %cst_25 : f32 to vector<2x128xf32>
    %44 = arith.divf %42, %43 : vector<2x128xf32>
    %c0_26 = arith.constant 0 : index
    %c0_27 = arith.constant 0 : index
    %45 = vector.load %arg15[%c0_26, %c0_27] : memref<128x16xf32, #tpu.memory_space<vmem>>, vector<128x16xf32>
    %cst_28 = arith.constant dense<0.000000e+00> : vector<2x16xf32>
    %46 = tpu.matmul %44, %45, %cst_28 {dimension_numbers = #tpu.dot_dimension_numbers<[1], [0], [0], [1], [0, 0, 1, 1], [], []>} : vector<2x128xf32>, vector<128x16xf32>, vector<2x16xf32> -> vector<2x16xf32>
    %c0_29 = arith.constant 0 : index
    %c0_30 = arith.constant 0 : index
    %47 = vector.load %arg16[%c0_29, %c0_30] : memref<1x16xf32, #tpu.memory_space<vmem>>, vector<1x16xf32>
    %48 = vector.broadcast %47 : vector<1x16xf32> to vector<2x16xf32>
    %49 = arith.addf %46, %48 : vector<2x16xf32>
    %cst_31 = arith.constant 0.000000e+00 : f32
    %50 = vector.broadcast %cst_31 : f32 to vector<2x16xf32>
    %51 = arith.maximumf %49, %50 : vector<2x16xf32>
    %c0_32 = arith.constant 0 : index
    %c0_33 = arith.constant 0 : index
    %52 = vector.load %arg17[%c0_32, %c0_33] : memref<16x128xf32, #tpu.memory_space<vmem>>, vector<16x128xf32>
    %cst_34 = arith.constant dense<0.000000e+00> : vector<2x128xf32>
    %53 = tpu.matmul %51, %52, %cst_34 {dimension_numbers = #tpu.dot_dimension_numbers<[1], [0], [0], [1], [0, 0, 1, 1], [], []>} : vector<2x16xf32>, vector<16x128xf32>, vector<2x128xf32> -> vector<2x128xf32>
    %c0_35 = arith.constant 0 : index
    %c0_36 = arith.constant 0 : index
    %54 = vector.load %arg18[%c0_35, %c0_36] : memref<1x128xf32, #tpu.memory_space<vmem>>, vector<1x128xf32>
    %55 = vector.broadcast %54 : vector<1x128xf32> to vector<2x128xf32>
    %56 = arith.addf %53, %55 : vector<2x128xf32>
    %cst_37 = arith.constant 0.000000e+00 : f32
    %57 = vector.broadcast %cst_37 : f32 to vector<2x128xf32>
    %58 = arith.cmpf ogt, %56, %57 : vector<2x128xf32>
    %59 = arith.extui %58 : vector<2x128xi1> to vector<2x128xi32>
    %60 = arith.sitofp %59 : vector<2x128xi32> to vector<2x128xf32>
    %c9_i32 = arith.constant 9 : i32
    %61 = tpu.dynamic_rotate %40 by %c9_i32 dim 0 : vector<128x128xf32>, i32 -> vector<128x128xf32>
    %c0_38 = arith.constant 0 : index
    %c0_39 = arith.constant 0 : index
    %c0_40 = arith.constant 0 : index
    %62 = vector.load %arg3[%c0_38, %c0_39, %c0_40] : memref<9x128x1xf32, #tpu.memory_space<vmem>>, vector<1x128x1xf32>
    %63 = vector.shape_cast %62 : vector<1x128x1xf32> to vector<128x1xf32>
    %64 = vector.broadcast %63 : vector<128x1xf32> to vector<128x128xf32>
    %65 = arith.mulf %61, %64 : vector<128x128xf32>
    %66 = arith.truncf %65 : vector<128x128xf32> to vector<128x128xbf16>
    %c8_i32 = arith.constant 8 : i32
    %67 = tpu.dynamic_rotate %40 by %c8_i32 dim 0 : vector<128x128xf32>, i32 -> vector<128x128xf32>
    %c1 = arith.constant 1 : index
    %c0_41 = arith.constant 0 : index
    %c0_42 = arith.constant 0 : index
    %68 = vector.load %arg3[%c1, %c0_41, %c0_42] : memref<9x128x1xf32, #tpu.memory_space<vmem>>, vector<1x128x1xf32>
    %69 = vector.shape_cast %68 : vector<1x128x1xf32> to vector<128x1xf32>
    %70 = vector.broadcast %69 : vector<128x1xf32> to vector<128x128xf32>
    %71 = arith.mulf %67, %70 : vector<128x128xf32>
    %72 = arith.truncf %71 : vector<128x128xf32> to vector<128x128xbf16>
    %c7_i32 = arith.constant 7 : i32
    %73 = tpu.dynamic_rotate %40 by %c7_i32 dim 0 : vector<128x128xf32>, i32 -> vector<128x128xf32>
    %c2 = arith.constant 2 : index
    %c0_43 = arith.constant 0 : index
    %c0_44 = arith.constant 0 : index
    %74 = vector.load %arg3[%c2, %c0_43, %c0_44] : memref<9x128x1xf32, #tpu.memory_space<vmem>>, vector<1x128x1xf32>
    %75 = vector.shape_cast %74 : vector<1x128x1xf32> to vector<128x1xf32>
    %76 = vector.broadcast %75 : vector<128x1xf32> to vector<128x128xf32>
    %77 = arith.mulf %73, %76 : vector<128x128xf32>
    %78 = arith.truncf %77 : vector<128x128xf32> to vector<128x128xbf16>
    %c1_i32 = arith.constant 1 : i32
    %79 = tpu.dynamic_rotate %40 by %c1_i32 dim 0 : vector<128x128xf32>, i32 -> vector<128x128xf32>
    %c3 = arith.constant 3 : index
    %c0_45 = arith.constant 0 : index
    %c0_46 = arith.constant 0 : index
    %80 = vector.load %arg3[%c3, %c0_45, %c0_46] : memref<9x128x1xf32, #tpu.memory_space<vmem>>, vector<1x128x1xf32>
    %81 = vector.shape_cast %80 : vector<1x128x1xf32> to vector<128x1xf32>
    %82 = vector.broadcast %81 : vector<128x1xf32> to vector<128x128xf32>
    %83 = arith.mulf %79, %82 : vector<128x128xf32>
    %84 = arith.truncf %83 : vector<128x128xf32> to vector<128x128xbf16>
    %85 = arith.truncf %40 : vector<128x128xf32> to vector<128x128xbf16>
    %c127_i32 = arith.constant 127 : i32
    %86 = tpu.dynamic_rotate %40 by %c127_i32 dim 0 : vector<128x128xf32>, i32 -> vector<128x128xf32>
    %c5 = arith.constant 5 : index
    %c0_47 = arith.constant 0 : index
    %c0_48 = arith.constant 0 : index
    %87 = vector.load %arg3[%c5, %c0_47, %c0_48] : memref<9x128x1xf32, #tpu.memory_space<vmem>>, vector<1x128x1xf32>
    %88 = vector.shape_cast %87 : vector<1x128x1xf32> to vector<128x1xf32>
    %89 = vector.broadcast %88 : vector<128x1xf32> to vector<128x128xf32>
    %90 = arith.mulf %86, %89 : vector<128x128xf32>
    %91 = arith.truncf %90 : vector<128x128xf32> to vector<128x128xbf16>
    %c121_i32 = arith.constant 121 : i32
    %92 = tpu.dynamic_rotate %40 by %c121_i32 dim 0 : vector<128x128xf32>, i32 -> vector<128x128xf32>
    %c6 = arith.constant 6 : index
    %c0_49 = arith.constant 0 : index
    %c0_50 = arith.constant 0 : index
    %93 = vector.load %arg3[%c6, %c0_49, %c0_50] : memref<9x128x1xf32, #tpu.memory_space<vmem>>, vector<1x128x1xf32>
    %94 = vector.shape_cast %93 : vector<1x128x1xf32> to vector<128x1xf32>
    %95 = vector.broadcast %94 : vector<128x1xf32> to vector<128x128xf32>
    %96 = arith.mulf %92, %95 : vector<128x128xf32>
    %97 = arith.truncf %96 : vector<128x128xf32> to vector<128x128xbf16>
    %c120_i32 = arith.constant 120 : i32
    %98 = tpu.dynamic_rotate %40 by %c120_i32 dim 0 : vector<128x128xf32>, i32 -> vector<128x128xf32>
    %c7 = arith.constant 7 : index
    %c0_51 = arith.constant 0 : index
    %c0_52 = arith.constant 0 : index
    %99 = vector.load %arg3[%c7, %c0_51, %c0_52] : memref<9x128x1xf32, #tpu.memory_space<vmem>>, vector<1x128x1xf32>
    %100 = vector.shape_cast %99 : vector<1x128x1xf32> to vector<128x1xf32>
    %101 = vector.broadcast %100 : vector<128x1xf32> to vector<128x128xf32>
    %102 = arith.mulf %98, %101 : vector<128x128xf32>
    %103 = arith.truncf %102 : vector<128x128xf32> to vector<128x128xbf16>
    %c119_i32 = arith.constant 119 : i32
    %104 = tpu.dynamic_rotate %40 by %c119_i32 dim 0 : vector<128x128xf32>, i32 -> vector<128x128xf32>
    %c8 = arith.constant 8 : index
    %c0_53 = arith.constant 0 : index
    %c0_54 = arith.constant 0 : index
    %105 = vector.load %arg3[%c8, %c0_53, %c0_54] : memref<9x128x1xf32, #tpu.memory_space<vmem>>, vector<1x128x1xf32>
    %106 = vector.shape_cast %105 : vector<1x128x1xf32> to vector<128x1xf32>
    %107 = vector.broadcast %106 : vector<128x1xf32> to vector<128x128xf32>
    %108 = arith.mulf %104, %107 : vector<128x128xf32>
    %109 = arith.truncf %108 : vector<128x128xf32> to vector<128x128xbf16>
    %110 = tpu.concatenate %66, %72, %78, %84, %85, %91, %97, %103, %109 in 1 : vector<128x128xbf16>, vector<128x128xbf16>, vector<128x128xbf16>, vector<128x128xbf16>, vector<128x128xbf16>, vector<128x128xbf16>, vector<128x128xbf16>, vector<128x128xbf16>, vector<128x128xbf16> -> vector<128x1152xbf16>
    %c0_55 = arith.constant 0 : index
    %c0_56 = arith.constant 0 : index
    %111 = vector.load %arg13[%c0_55, %c0_56] : memref<1152x128xbf16, #tpu.memory_space<vmem>>, vector<1152x128xbf16>
    %cst_57 = arith.constant dense<0.000000e+00> : vector<128x128xf32>
    %112 = tpu.matmul %110, %111, %cst_57 {dimension_numbers = #tpu.dot_dimension_numbers<[1], [0], [0], [1], [0, 0, 1, 1], [], []>} : vector<128x1152xbf16>, vector<1152x128xbf16>, vector<128x128xf32> -> vector<128x128xf32>
    %c0_58 = arith.constant 0 : index
    %c0_59 = arith.constant 0 : index
    %113 = vector.load %arg14[%c0_58, %c0_59] : memref<1x128xf32, #tpu.memory_space<vmem>>, vector<1x128xf32>
    %114 = vector.broadcast %113 : vector<1x128xf32> to vector<128x128xf32>
    %115 = arith.addf %112, %114 : vector<128x128xf32>
    %cst_60 = arith.constant 0.000000e+00 : f32
    %116 = vector.broadcast %cst_60 : f32 to vector<128x128xf32>
    %117 = arith.maximumf %115, %116 : vector<128x128xf32>
    %118 = vector.shape_cast %117 : vector<128x128xf32> to vector<2x64x128xf32>
    %119 = vector.shape_cast %60 : vector<2x128xf32> to vector<2x1x128xf32>
    %120 = vector.broadcast %119 : vector<2x1x128xf32> to vector<2x64x128xf32>
    %121 = arith.mulf %118, %120 : vector<2x64x128xf32>
    %122 = vector.shape_cast %121 : vector<2x64x128xf32> to vector<128x128xf32>
    %123 = vector.shape_cast %122 : vector<128x128xf32> to vector<8x16x128xf32>
    %124 = vector.extract_strided_slice %123 {offsets = [0, 0, 0], sizes = [8, 8, 128], strides = [1, 1, 1]} : vector<8x16x128xf32> to vector<8x8x128xf32>
    %125 = vector.extract_strided_slice %123 {offsets = [0, 8, 0], sizes = [8, 8, 128], strides = [1, 1, 1]} : vector<8x16x128xf32> to vector<8x8x128xf32>
    %126 = arith.maximumf %124, %125 : vector<8x8x128xf32>
    %127 = vector.shape_cast %126 : vector<8x8x128xf32> to vector<64x128xf32>
    %c63_i32 = arith.constant 63 : i32
    %128 = tpu.dynamic_rotate %127 by %c63_i32 dim 0 : vector<64x128xf32>, i32 -> vector<64x128xf32>
    %129 = arith.maximumf %127, %128 : vector<64x128xf32>
    %c0_61 = arith.constant 0 : index
    %c0_62 = arith.constant 0 : index
    %130 = vector.load %arg6[%c0_61, %c0_62] : memref<32x64xbf16, #tpu.memory_space<vmem>>, vector<32x64xbf16>
    %131 = arith.truncf %129 : vector<64x128xf32> to vector<64x128xbf16>
    %cst_63 = arith.constant dense<0.000000e+00> : vector<32x128xf32>
    %132 = tpu.matmul %130, %131, %cst_63 {dimension_numbers = #tpu.dot_dimension_numbers<[1], [0], [0], [1], [0, 0, 1, 1], [], []>} : vector<32x64xbf16>, vector<64x128xbf16>, vector<32x128xf32> -> vector<32x128xf32>
    %133 = vector.shape_cast %132 : vector<32x128xf32> to vector<2x16x128xf32>
    %cst_64 = arith.constant dense<0.000000e+00> : vector<2x128xf32>
    %134 = vector.multi_reduction <add>, %133, %cst_64 [1] : vector<2x16x128xf32> to vector<2x128xf32>
    %cst_65 = arith.constant 1.600000e+01 : f32
    %135 = vector.broadcast %cst_65 : f32 to vector<2x128xf32>
    %136 = arith.divf %134, %135 : vector<2x128xf32>
    %c0_66 = arith.constant 0 : index
    %c0_67 = arith.constant 0 : index
    %137 = vector.load %arg21[%c0_66, %c0_67] : memref<128x16xf32, #tpu.memory_space<vmem>>, vector<128x16xf32>
    %cst_68 = arith.constant dense<0.000000e+00> : vector<2x16xf32>
    %138 = tpu.matmul %136, %137, %cst_68 {dimension_numbers = #tpu.dot_dimension_numbers<[1], [0], [0], [1], [0, 0, 1, 1], [], []>} : vector<2x128xf32>, vector<128x16xf32>, vector<2x16xf32> -> vector<2x16xf32>
    %c0_69 = arith.constant 0 : index
    %c0_70 = arith.constant 0 : index
    %139 = vector.load %arg22[%c0_69, %c0_70] : memref<1x16xf32, #tpu.memory_space<vmem>>, vector<1x16xf32>
    %140 = vector.broadcast %139 : vector<1x16xf32> to vector<2x16xf32>
    %141 = arith.addf %138, %140 : vector<2x16xf32>
    %cst_71 = arith.constant 0.000000e+00 : f32
    %142 = vector.broadcast %cst_71 : f32 to vector<2x16xf32>
    %143 = arith.maximumf %141, %142 : vector<2x16xf32>
    %c0_72 = arith.constant 0 : index
    %c0_73 = arith.constant 0 : index
    %144 = vector.load %arg23[%c0_72, %c0_73] : memref<16x128xf32, #tpu.memory_space<vmem>>, vector<16x128xf32>
    %cst_74 = arith.constant dense<0.000000e+00> : vector<2x128xf32>
    %145 = tpu.matmul %143, %144, %cst_74 {dimension_numbers = #tpu.dot_dimension_numbers<[1], [0], [0], [1], [0, 0, 1, 1], [], []>} : vector<2x16xf32>, vector<16x128xf32>, vector<2x128xf32> -> vector<2x128xf32>
    %c0_75 = arith.constant 0 : index
    %c0_76 = arith.constant 0 : index
    %146 = vector.load %arg24[%c0_75, %c0_76] : memref<1x128xf32, #tpu.memory_space<vmem>>, vector<1x128xf32>
    %147 = vector.broadcast %146 : vector<1x128xf32> to vector<2x128xf32>
    %148 = arith.addf %145, %147 : vector<2x128xf32>
    %cst_77 = arith.constant 0.000000e+00 : f32
    %149 = vector.broadcast %cst_77 : f32 to vector<2x128xf32>
    %150 = arith.cmpf ogt, %148, %149 : vector<2x128xf32>
    %151 = arith.extui %150 : vector<2x128xi1> to vector<2x128xi32>
    %152 = arith.sitofp %151 : vector<2x128xi32> to vector<2x128xf32>
    %c5_i32 = arith.constant 5 : i32
    %153 = tpu.dynamic_rotate %132 by %c5_i32 dim 0 : vector<32x128xf32>, i32 -> vector<32x128xf32>
    %c0_78 = arith.constant 0 : index
    %c0_79 = arith.constant 0 : index
    %c0_80 = arith.constant 0 : index
    %154 = vector.load %arg4[%c0_78, %c0_79, %c0_80] : memref<9x32x1xf32, #tpu.memory_space<vmem>>, vector<1x32x1xf32>
    %155 = vector.shape_cast %154 : vector<1x32x1xf32> to vector<32x1xf32>
    %156 = vector.broadcast %155 : vector<32x1xf32> to vector<32x128xf32>
    %157 = arith.mulf %153, %156 : vector<32x128xf32>
    %158 = arith.truncf %157 : vector<32x128xf32> to vector<32x128xbf16>
    %c4_i32 = arith.constant 4 : i32
    %159 = tpu.dynamic_rotate %132 by %c4_i32 dim 0 : vector<32x128xf32>, i32 -> vector<32x128xf32>
    %c1_81 = arith.constant 1 : index
    %c0_82 = arith.constant 0 : index
    %c0_83 = arith.constant 0 : index
    %160 = vector.load %arg4[%c1_81, %c0_82, %c0_83] : memref<9x32x1xf32, #tpu.memory_space<vmem>>, vector<1x32x1xf32>
    %161 = vector.shape_cast %160 : vector<1x32x1xf32> to vector<32x1xf32>
    %162 = vector.broadcast %161 : vector<32x1xf32> to vector<32x128xf32>
    %163 = arith.mulf %159, %162 : vector<32x128xf32>
    %164 = arith.truncf %163 : vector<32x128xf32> to vector<32x128xbf16>
    %c3_i32 = arith.constant 3 : i32
    %165 = tpu.dynamic_rotate %132 by %c3_i32 dim 0 : vector<32x128xf32>, i32 -> vector<32x128xf32>
    %c2_84 = arith.constant 2 : index
    %c0_85 = arith.constant 0 : index
    %c0_86 = arith.constant 0 : index
    %166 = vector.load %arg4[%c2_84, %c0_85, %c0_86] : memref<9x32x1xf32, #tpu.memory_space<vmem>>, vector<1x32x1xf32>
    %167 = vector.shape_cast %166 : vector<1x32x1xf32> to vector<32x1xf32>
    %168 = vector.broadcast %167 : vector<32x1xf32> to vector<32x128xf32>
    %169 = arith.mulf %165, %168 : vector<32x128xf32>
    %170 = arith.truncf %169 : vector<32x128xf32> to vector<32x128xbf16>
    %c1_i32_87 = arith.constant 1 : i32
    %171 = tpu.dynamic_rotate %132 by %c1_i32_87 dim 0 : vector<32x128xf32>, i32 -> vector<32x128xf32>
    %c3_88 = arith.constant 3 : index
    %c0_89 = arith.constant 0 : index
    %c0_90 = arith.constant 0 : index
    %172 = vector.load %arg4[%c3_88, %c0_89, %c0_90] : memref<9x32x1xf32, #tpu.memory_space<vmem>>, vector<1x32x1xf32>
    %173 = vector.shape_cast %172 : vector<1x32x1xf32> to vector<32x1xf32>
    %174 = vector.broadcast %173 : vector<32x1xf32> to vector<32x128xf32>
    %175 = arith.mulf %171, %174 : vector<32x128xf32>
    %176 = arith.truncf %175 : vector<32x128xf32> to vector<32x128xbf16>
    %177 = arith.truncf %132 : vector<32x128xf32> to vector<32x128xbf16>
    %c31_i32 = arith.constant 31 : i32
    %178 = tpu.dynamic_rotate %132 by %c31_i32 dim 0 : vector<32x128xf32>, i32 -> vector<32x128xf32>
    %c5_91 = arith.constant 5 : index
    %c0_92 = arith.constant 0 : index
    %c0_93 = arith.constant 0 : index
    %179 = vector.load %arg4[%c5_91, %c0_92, %c0_93] : memref<9x32x1xf32, #tpu.memory_space<vmem>>, vector<1x32x1xf32>
    %180 = vector.shape_cast %179 : vector<1x32x1xf32> to vector<32x1xf32>
    %181 = vector.broadcast %180 : vector<32x1xf32> to vector<32x128xf32>
    %182 = arith.mulf %178, %181 : vector<32x128xf32>
    %183 = arith.truncf %182 : vector<32x128xf32> to vector<32x128xbf16>
    %c29_i32 = arith.constant 29 : i32
    %184 = tpu.dynamic_rotate %132 by %c29_i32 dim 0 : vector<32x128xf32>, i32 -> vector<32x128xf32>
    %c6_94 = arith.constant 6 : index
    %c0_95 = arith.constant 0 : index
    %c0_96 = arith.constant 0 : index
    %185 = vector.load %arg4[%c6_94, %c0_95, %c0_96] : memref<9x32x1xf32, #tpu.memory_space<vmem>>, vector<1x32x1xf32>
    %186 = vector.shape_cast %185 : vector<1x32x1xf32> to vector<32x1xf32>
    %187 = vector.broadcast %186 : vector<32x1xf32> to vector<32x128xf32>
    %188 = arith.mulf %184, %187 : vector<32x128xf32>
    %189 = arith.truncf %188 : vector<32x128xf32> to vector<32x128xbf16>
    %c28_i32 = arith.constant 28 : i32
    %190 = tpu.dynamic_rotate %132 by %c28_i32 dim 0 : vector<32x128xf32>, i32 -> vector<32x128xf32>
    %c7_97 = arith.constant 7 : index
    %c0_98 = arith.constant 0 : index
    %c0_99 = arith.constant 0 : index
    %191 = vector.load %arg4[%c7_97, %c0_98, %c0_99] : memref<9x32x1xf32, #tpu.memory_space<vmem>>, vector<1x32x1xf32>
    %192 = vector.shape_cast %191 : vector<1x32x1xf32> to vector<32x1xf32>
    %193 = vector.broadcast %192 : vector<32x1xf32> to vector<32x128xf32>
    %194 = arith.mulf %190, %193 : vector<32x128xf32>
    %195 = arith.truncf %194 : vector<32x128xf32> to vector<32x128xbf16>
    %c27_i32 = arith.constant 27 : i32
    %196 = tpu.dynamic_rotate %132 by %c27_i32 dim 0 : vector<32x128xf32>, i32 -> vector<32x128xf32>
    %c8_100 = arith.constant 8 : index
    %c0_101 = arith.constant 0 : index
    %c0_102 = arith.constant 0 : index
    %197 = vector.load %arg4[%c8_100, %c0_101, %c0_102] : memref<9x32x1xf32, #tpu.memory_space<vmem>>, vector<1x32x1xf32>
    %198 = vector.shape_cast %197 : vector<1x32x1xf32> to vector<32x1xf32>
    %199 = vector.broadcast %198 : vector<32x1xf32> to vector<32x128xf32>
    %200 = arith.mulf %196, %199 : vector<32x128xf32>
    %201 = arith.truncf %200 : vector<32x128xf32> to vector<32x128xbf16>
    %202 = tpu.concatenate %158, %164, %170, %176, %177, %183, %189, %195, %201 in 1 : vector<32x128xbf16>, vector<32x128xbf16>, vector<32x128xbf16>, vector<32x128xbf16>, vector<32x128xbf16>, vector<32x128xbf16>, vector<32x128xbf16>, vector<32x128xbf16>, vector<32x128xbf16> -> vector<32x1152xbf16>
    %c0_103 = arith.constant 0 : index
    %c0_104 = arith.constant 0 : index
    %203 = vector.load %arg19[%c0_103, %c0_104] : memref<1152x128xbf16, #tpu.memory_space<vmem>>, vector<1152x128xbf16>
    %cst_105 = arith.constant dense<0.000000e+00> : vector<32x128xf32>
    %204 = tpu.matmul %202, %203, %cst_105 {dimension_numbers = #tpu.dot_dimension_numbers<[1], [0], [0], [1], [0, 0, 1, 1], [], []>} : vector<32x1152xbf16>, vector<1152x128xbf16>, vector<32x128xf32> -> vector<32x128xf32>
    %c0_106 = arith.constant 0 : index
    %c0_107 = arith.constant 0 : index
    %205 = vector.load %arg20[%c0_106, %c0_107] : memref<1x128xf32, #tpu.memory_space<vmem>>, vector<1x128xf32>
    %206 = vector.broadcast %205 : vector<1x128xf32> to vector<32x128xf32>
    %207 = arith.addf %204, %206 : vector<32x128xf32>
    %cst_108 = arith.constant 0.000000e+00 : f32
    %208 = vector.broadcast %cst_108 : f32 to vector<32x128xf32>
    %209 = arith.maximumf %207, %208 : vector<32x128xf32>
    %210 = vector.shape_cast %209 : vector<32x128xf32> to vector<2x16x128xf32>
    %211 = vector.shape_cast %152 : vector<2x128xf32> to vector<2x1x128xf32>
    %212 = vector.broadcast %211 : vector<2x1x128xf32> to vector<2x16x128xf32>
    %213 = arith.mulf %210, %212 : vector<2x16x128xf32>
    %214 = vector.shape_cast %213 : vector<2x16x128xf32> to vector<32x128xf32>
    %215 = vector.shape_cast %214 : vector<32x128xf32> to vector<2x16x128xf32>
    %cst_109 = arith.constant dense<0.000000e+00> : vector<2x128xf32>
    %216 = vector.multi_reduction <add>, %215, %cst_109 [1] : vector<2x16x128xf32> to vector<2x128xf32>
    %cst_110 = arith.constant 1.600000e+01 : f32
    %217 = vector.broadcast %cst_110 : f32 to vector<2x128xf32>
    %218 = arith.divf %216, %217 : vector<2x128xf32>
    %c0_111 = arith.constant 0 : index
    %c0_112 = arith.constant 0 : index
    %219 = vector.load %arg25[%c0_111, %c0_112] : memref<128x128xf32, #tpu.memory_space<vmem>>, vector<128x128xf32>
    %cst_113 = arith.constant dense<0.000000e+00> : vector<2x128xf32>
    %220 = tpu.matmul %218, %219, %cst_113 {dimension_numbers = #tpu.dot_dimension_numbers<[1], [0], [0], [1], [0, 0, 1, 1], [], []>} : vector<2x128xf32>, vector<128x128xf32>, vector<2x128xf32> -> vector<2x128xf32>
    %c0_114 = arith.constant 0 : index
    %c0_115 = arith.constant 0 : index
    %221 = vector.load %arg26[%c0_114, %c0_115] : memref<1x128xf32, #tpu.memory_space<vmem>>, vector<1x128xf32>
    %222 = vector.broadcast %221 : vector<1x128xf32> to vector<2x128xf32>
    %223 = arith.addf %220, %222 : vector<2x128xf32>
    %c0_116 = arith.constant 0 : index
    %c0_117 = arith.constant 0 : index
    %c0_118 = arith.constant 0 : index
    %224 = vector.load %arg27[%c0_116, %c0_117, %c0_118] : memref<1x2x128xf32, #tpu.memory_space<vmem>>, vector<1x2x128xf32>
    %225 = vector.shape_cast %224 : vector<1x2x128xf32> to vector<2x128xf32>
    %226 = vector.shape_cast %223 : vector<2x128xf32> to vector<1x2x128xf32>
    tpu.vector_store %arg27[%c0_116, %c0_117, %c0_118], %226 {strides = array<i32>} : memref<1x2x128xf32, #tpu.memory_space<vmem>>, vector<1x2x128xf32>,
    return
  }
  func.func @transform_0(%arg0: i32) -> (i32, i32) {
    %c0_i32 = arith.constant 0 : i32
    %c0_i32_0 = arith.constant 0 : i32
    return %arg0, %c0_i32 : i32, i32
  }
  func.func @transform_1(%arg0: i32) -> (i32, i32, i32) {
    %c0_i32 = arith.constant 0 : i32
    %c0_i32_0 = arith.constant 0 : i32
    %c0_i32_1 = arith.constant 0 : i32
    return %arg0, %c0_i32, %c0_i32_0 : i32, i32, i32
  }
  func.func @transform_2(%arg0: i32) -> (i32, i32, i32) {
    %c0_i32 = arith.constant 0 : i32
    %c0_i32_0 = arith.constant 0 : i32
    %c0_i32_1 = arith.constant 0 : i32
    %c0_i32_2 = arith.constant 0 : i32
    return %c0_i32, %c0_i32_0, %c0_i32_1 : i32, i32, i32
  }
  func.func @transform_3(%arg0: i32) -> (i32, i32, i32) {
    %c0_i32 = arith.constant 0 : i32
    %c0_i32_0 = arith.constant 0 : i32
    %c0_i32_1 = arith.constant 0 : i32
    %c0_i32_2 = arith.constant 0 : i32
    return %c0_i32, %c0_i32_0, %c0_i32_1 : i32, i32, i32
  }
  func.func @transform_4(%arg0: i32) -> (i32, i32) {
    %c0_i32 = arith.constant 0 : i32
    %c0_i32_0 = arith.constant 0 : i32
    %c0_i32_1 = arith.constant 0 : i32
    return %c0_i32, %c0_i32_0 : i32, i32
  }
  func.func @transform_5(%arg0: i32) -> (i32, i32) {
    %c0_i32 = arith.constant 0 : i32
    %c0_i32_0 = arith.constant 0 : i32
    %c0_i32_1 = arith.constant 0 : i32
    return %c0_i32, %c0_i32_0 : i32, i32
  }
  func.func @transform_6(%arg0: i32) -> (i32, i32) {
    %c0_i32 = arith.constant 0 : i32
    %c0_i32_0 = arith.constant 0 : i32
    %c0_i32_1 = arith.constant 0 : i32
    return %c0_i32, %c0_i32_0 : i32, i32
  }
  func.func @transform_7(%arg0: i32) -> (i32, i32) {
    %c0_i32 = arith.constant 0 : i32
    %c0_i32_0 = arith.constant 0 : i32
    %c0_i32_1 = arith.constant 0 : i32
    return %c0_i32, %c0_i32_0 : i32, i32
  }
  func.func @transform_8(%arg0: i32) -> (i32, i32) {
    %c0_i32 = arith.constant 0 : i32
    %c0_i32_0 = arith.constant 0 : i32
    %c0_i32_1 = arith.constant 0 : i32
    return %c0_i32, %c0_i32_0 : i32, i32
  }
  func.func @transform_9(%arg0: i32) -> (i32, i32) {
    %c0_i32 = arith.constant 0 : i32
    %c0_i32_0 = arith.constant 0 : i32
    %c0_i32_1 = arith.constant 0 : i32
    return %c0_i32, %c0_i32_0 : i32, i32
  }
  func.func @transform_10(%arg0: i32) -> (i32, i32) {
    %c0_i32 = arith.constant 0 : i32
    %c0_i32_0 = arith.constant 0 : i32
    %c0_i32_1 = arith.constant 0 : i32
    return %c0_i32, %c0_i32_0 : i32, i32
  }
  func.func @transform_11(%arg0: i32) -> (i32, i32) {
    %c0_i32 = arith.constant 0 : i32
    %c0_i32_0 = arith.constant 0 : i32
    %c0_i32_1 = arith.constant 0 : i32
    return %c0_i32, %c0_i32_0 : i32, i32
  }
  func.func @transform_12(%arg0: i32) -> (i32, i32) {
    %c0_i32 = arith.constant 0 : i32
    %c0_i32_0 = arith.constant 0 : i32
    %c0_i32_1 = arith.constant 0 : i32
    return %c0_i32, %c0_i32_0 : i32, i32
  }
  func.func @transform_13(%arg0: i32) -> (i32, i32) {
    %c0_i32 = arith.constant 0 : i32
    %c0_i32_0 = arith.constant 0 : i32
    %c0_i32_1 = arith.constant 0 : i32
    return %c0_i32, %c0_i32_0 : i32, i32
  }
  func.func @transform_14(%arg0: i32) -> (i32, i32) {
    %c0_i32 = arith.constant 0 : i32
    %c0_i32_0 = arith.constant 0 : i32
    %c0_i32_1 = arith.constant 0 : i32
    return %c0_i32, %c0_i32_0 : i32, i32
  }
  func.func @transform_15(%arg0: i32) -> (i32, i32) {
    %c0_i32 = arith.constant 0 : i32
    %c0_i32_0 = arith.constant 0 : i32
    %c0_i32_1 = arith.constant 0 : i32
    return %c0_i32, %c0_i32_0 : i32, i32
  }
  func.func @transform_16(%arg0: i32) -> (i32, i32) {
    %c0_i32 = arith.constant 0 : i32
    %c0_i32_0 = arith.constant 0 : i32
    %c0_i32_1 = arith.constant 0 : i32
    return %c0_i32, %c0_i32_0 : i32, i32
  }
  func.func @transform_17(%arg0: i32) -> (i32, i32) {
    %c0_i32 = arith.constant 0 : i32
    %c0_i32_0 = arith.constant 0 : i32
    %c0_i32_1 = arith.constant 0 : i32
    return %c0_i32, %c0_i32_0 : i32, i32
  }
  func.func @transform_18(%arg0: i32) -> (i32, i32) {
    %c0_i32 = arith.constant 0 : i32
    %c0_i32_0 = arith.constant 0 : i32
    %c0_i32_1 = arith.constant 0 : i32
    return %c0_i32, %c0_i32_0 : i32, i32
  }
  func.func @transform_19(%arg0: i32) -> (i32, i32) {
    %c0_i32 = arith.constant 0 : i32
    %c0_i32_0 = arith.constant 0 : i32
    %c0_i32_1 = arith.constant 0 : i32
    return %c0_i32, %c0_i32_0 : i32, i32
  }
  func.func @transform_20(%arg0: i32) -> (i32, i32) {
    %c0_i32 = arith.constant 0 : i32
    %c0_i32_0 = arith.constant 0 : i32
    %c0_i32_1 = arith.constant 0 : i32
    return %c0_i32, %c0_i32_0 : i32, i32
  }
  func.func @transform_21(%arg0: i32) -> (i32, i32) {
    %c0_i32 = arith.constant 0 : i32
    %c0_i32_0 = arith.constant 0 : i32
    %c0_i32_1 = arith.constant 0 : i32
    return %c0_i32, %c0_i32_0 : i32, i32
  }
  func.func @transform_22(%arg0: i32) -> (i32, i32) {
    %c0_i32 = arith.constant 0 : i32
    %c0_i32_0 = arith.constant 0 : i32
    %c0_i32_1 = arith.constant 0 : i32
    return %c0_i32, %c0_i32_0 : i32, i32
  }
  func.func @transform_23(%arg0: i32) -> (i32, i32) {
    %c0_i32 = arith.constant 0 : i32
    %c0_i32_0 = arith.constant 0 : i32
    %c0_i32_1 = arith.constant 0 : i32
    return %c0_i32, %c0_i32_0 : i32, i32
  }
  func.func @transform_24(%arg0: i32) -> (i32, i32) {
    %c0_i32 = arith.constant 0 : i32
    %c0_i32_0 = arith.constant 0 : i32
    %c0_i32_1 = arith.constant 0 : i32
    return %c0_i32, %c0_i32_0 : i32, i32
  }
  func.func @transform_25(%arg0: i32) -> (i32, i32) {
    %c0_i32 = arith.constant 0 : i32
    %c0_i32_0 = arith.constant 0 : i32
    %c0_i32_1 = arith.constant 0 : i32
    return %c0_i32, %c0_i32_0 : i32, i32
  }
  func.func @transform_26(%arg0: i32) -> (i32, i32, i32) {
    %c0_i32 = arith.constant 0 : i32
    %c0_i32_0 = arith.constant 0 : i32
    %c0_i32_1 = arith.constant 0 : i32
    return %arg0, %c0_i32, %c0_i32_0 : i32, i32, i32
  }
}

</mosaic_0001>

<bundles_post_ra>
// kernel: channel_gated_cl_forward.1
= control target key start
LH: loop header
LB: loop body
LE: loop exit
PB: predicated region body
PF: predicated region fallthrough
CT: control target
= control target key end

     0   :  { %s10195_s0 = inlined_call_operand.vmem [shape: bf16[512,36], index: 0, kind: input, shape index: {}]   ;;  %s10196_s1 = inlined_call_operand.vmem [shape: f32[1,2,4], index: 1, kind: input, shape index: {}]   ;;  %s10197_s2 = inlined_call_operand.vmem [shape: f32[9,128,1], index: 2, kind: input, shape index: {}]   ;;  %s10198_s3 = inlined_call_operand.vmem [shape: f32[9,32,1], index: 3, kind: input, shape index: {}]   ;;  %s10199_s4 = inlined_call_operand.vmem [shape: bf16[128,256], index: 4, kind: input, shape index: {}]   ;;  %s10200_s5 = inlined_call_operand.vmem [shape: bf16[32,64], index: 5, kind: input, shape index: {}]   ;;  %s10201_s6 = inlined_call_operand.vmem [shape: bf16[36,128], index: 6, kind: input, shape index: {}]   ;;  %s10202_s7 = inlined_call_operand.vmem [shape: f32[1,128], index: 7, kind: input, shape index: {}]   ;;  %s10203_s8 = inlined_call_operand.vmem [shape: f32[4,16], index: 8, kind: input, shape index: {}]   ;;  %s10204_s9 = inlined_call_operand.vmem [shape: f32[1,16], index: 9, kind: input, shape index: {}]   ;;  %s10205_s10 = inlined_call_operand.vmem [shape: f32[16,128], index: 10, kind: input, shape index: {}]   ;;  %s10206_s11 = inlined_call_operand.vmem [shape: f32[1,128], index: 11, kind: input, shape index: {}]   ;;  %s10207_s12 = inlined_call_operand.vmem [shape: bf16[1152,128], index: 12, kind: input, shape index: {}]   ;;  %s10208_s13 = inlined_call_operand.vmem [shape: f32[1,128], index: 13, kind: input, shape index: {}]   ;;  %s10209_s14 = inlined_call_operand.vmem [shape: f32[128,16], index: 14, kind: input, shape index: {}]   ;;  %s10210_s15 = inlined_call_operand.vmem [shape: f32[1,16], index: 15, kind: input, shape index: {}]   ;;  %s10211_s16 = inlined_call_operand.vmem [shape: f32[16,128], index: 16, kind: input, shape index: {}]   ;;  %s10212_s17 = inlined_call_operand.vmem [shape: f32[1,128], index: 17, kind: input, shape index: {}]   ;;  %s10213_s18 = inlined_call_operand.vmem [shape: bf16[1152,128], index: 18, kind: input, shape index: {}]   ;;  %s10214_s19 = inlined_call_operand.vmem [shape: f32[1,128], index: 19, kind: input, shape index: {}]   ;;  %s10215_s20 = inlined_call_operand.vmem [shape: f32[128,16], index: 20, kind: input, shape index: {}]   ;;  %s10216_s21 = inlined_call_operand.vmem [shape: f32[1,16], index: 21, kind: input, shape index: {}]   ;;  %s10217_s22 = inlined_call_operand.vmem [shape: f32[16,128], index: 22, kind: input, shape index: {}]   ;;  %s10218_s23 = inlined_call_operand.vmem [shape: f32[1,128], index: 23, kind: input, shape index: {}]   ;;  %s10219_s24 = inlined_call_operand.vmem [shape: f32[128,128], index: 24, kind: input, shape index: {}]   ;;  %s10220_s25 = inlined_call_operand.vmem [shape: f32[1,128], index: 25, kind: input, shape index: {}]   ;;  %s10221_s26 = inlined_call_operand.hbm [shape: f32[1,2,128], index: 26, kind: output, shape index: {}]  }
   0x1   :  { %10326 = sst [smem:[#allocation140_spill]] %s10195_s0 }
   0x2   :  { %10327 = sst [smem:[#allocation141_spill]] %s10196_s1 }
   0x3   :  { %10328 = sst [smem:[#allocation142_spill]] %s10197_s2 }
   0x4   :  { %10329 = sst [smem:[#allocation143_spill]] %s10198_s3 }
   0x5   :  { %10330 = sst [smem:[#allocation144_spill]] %s10199_s4 }
   0x6   :  { %10331 = sst [smem:[#allocation145_spill]] %s10200_s5 }
   0x7   :  { %10332 = sst [smem:[#allocation146_spill]] %s10201_s6 }
   0x8   :  { %10333 = sst [smem:[#allocation147_spill]] %s10202_s7 }
   0x9   :  { %10334 = sst [smem:[#allocation148_spill]] %s10203_s8 }
   0xa   :  { %10335 = sst [smem:[#allocation149_spill]] %s10204_s9 }
   0xb   :  { %10336 = sst [smem:[#allocation150_spill]] %s10205_s10 }
   0xc   :  { %s10337_s7 = sld [smem:[#allocation148_spill]]  ;;  %vm95_vm0 = vcmask 1043456   ;;  %vm91_vm1 = vcmask 31744   ;;  %vm498_vm2 = vcmask 1041408  }
   0xd   :  { %s10338_s4 = sld [smem:[#allocation141_spill]] }
   0xe   :  { %s10339_s9 = sld [smem:[#allocation146_spill]] }
  0x12   :  { %v86_v0 = vld [vmem:[%s10337_s7] sm:$0xf] }
  0x13   :  { %v85_v1 = vld [vmem:[%s10338_s4] sm:$0x3]  ;;  %5298 = vmatpush.msk.msra.mxu0 %vm95_vm0, %v86_v0 }
  0x14   :  { %v221_v2 = vld [vmem:[%s10339_s9 + $0x10] sm:$0x3]  ;;  %5299 = vmatmul.msk.f32.vlgmr.msra.gmra.mxu0 %vm91_vm1, %v85_v1 }
  0x15   :  { %v395_v3 = vunpack.c.l.b16 %v221_v2 }
  0x17   :  { %v398_v4 = vpack.c.b16 %v395_v3, %v395_v3 }
  0x19   :  { %v500_v5 = vsel %vm498_vm2, %v398_v4, 0 }
  0x1a   :  { %31 = vsyncpa [#allocation3], 0  ;;  %507 = vmatpush.bf16.msra.mxu2 %v500_v5  ;;  %v6297_v6 = vld [vmem:[%s10339_s9 + $0x8] sm:$0xff]  ;;  %v6296_v7 = vld [vmem:[%s10339_s9] sm:$0xff]  ;;  %s10340_s27 = sld [smem:[#allocation140_spill]]  ;;  %vm401_vm3 = vcmask 293888   ;;  %v869_v63 = vlaneseq }
  0x1b   :  { %s10341_s6 = sld [smem:[#allocation150_spill]]  ;;  %vm126_vm4 = vcmask 130048   ;;  %v6470_v45 = vld [vmem:[%s10206_s11] ss:$0 sm:$0xff]  ;;  %vm1203_vm9 = vcmask 1041409   ;;  %vm3912_vm11 = vcmask 523264  }
  0x1c   :  { %s10342_s29 = sld [smem:[#allocation149_spill]]  ;;  %s5289_s28 = sshll.u32 %s10221_s26, 4  ;;  %s5290_s28 = int_to_ptr.hbm [resolvable:$true] %s5289_s28 }
  0x1d   :  { %s10343_s5 = sld [smem:[#allocation147_spill]] }
  0x1e   :  { %508 = vmatpush.bf16.msra.mxu2 %v6297_v6  ;;  %v10230_v6 = vmov 0.0   ;;  %s10345_s11 = sld [smem:[#allocation142_spill]] }
  0x1f   :  { %s10377_s30 = sld [smem:[#allocation144_spill]] }
  0x20   :  { %v6264_v8 = vld [vmem:[%s10340_s27] sm:$0xff]  ;;  %v6265_v9 = vld [vmem:[%s10340_s27 + $0x8] sm:$0xff]  ;;  %v6266_v10 = vld [vmem:[%s10340_s27 + $0x10] sm:$0xff]  ;;  %s10421_s2 = sld [smem:[#allocation143_spill]] }
  0x21   :  { %v6267_v11 = vld [vmem:[%s10340_s27 + $0x18] sm:$0xff]  ;;  %v6268_v12 = vld [vmem:[%s10340_s27 + $0x20] sm:$0xff]  ;;  %v6269_v13 = vld [vmem:[%s10340_s27 + $0x28] sm:$0xff] }
  0x22   :  { %509 = vmatpush.bf16.msra.mxu2 %v6296_v7  ;;  %v121_v14 = vld [vmem:[%s10341_s6 + $0x8] sm:$0xff]  ;;  %v120_v15 = vld [vmem:[%s10341_s6] sm:$0xff]  ;;  %v6270_v16 = vld [vmem:[%s10340_s27 + $0x30] sm:$0xff] }
  0x23   :  { %144 = vmatpush.msra.mxu1 %v121_v14  ;;  %v6468_v17 = vld [vmem:[%s10342_s29] ss:$0 sm:$0xff]  ;;  %v6271_v18 = vld [vmem:[%s10340_s27 + $0x38] sm:$0xff]  ;;  %v6273_v25 = vld [vmem:[%s10340_s27 + $0x48] sm:$0xff] }
  0x24   :  { %v6272_v22 = vld [vmem:[%s10340_s27 + $0x40] sm:$0xff]  ;;  %v6274_v28 = vld [vmem:[%s10340_s27 + $0x50] sm:$0xff]  ;;  %v6275_v31 = vld [vmem:[%s10340_s27 + $0x58] sm:$0xff] }
  0x25   :  { %5438 = vmatmul.msk.bf16.vlgmr.msra.gmra.mxu2 %vm401_vm3, %v6264_v8  ;;  %145 = vmatpush.msra.mxu1 %v120_v15  ;;  %v6276_v34 = vld [vmem:[%s10340_s27 + $0x60] sm:$0xff]  ;;  %v6277_v37 = vld [vmem:[%s10340_s27 + $0x68] sm:$0xff]  ;;  %v6278_v40 = vld [vmem:[%s10340_s27 + $0x70] sm:$0xff] }
  0x26   :  { %v6737_v42 = vld [vmem:[%s10343_s5] ss:$0 sm:$0xff]  ;;  %v6279_v46 = vld [vmem:[%s10340_s27 + $0x78] sm:$0xff] }
  0x35   :  { %5439 = vmatmul.msk.bf16.gmra.mxu2 %vm401_vm3, %v6265_v9 }
  0x45   :  { %5440 = vmatmul.msk.bf16.gmra.mxu2 %vm401_vm3, %v6266_v10 }
  0x55   :  { %5441 = vmatmul.msk.bf16.gmra.mxu2 %vm401_vm3, %v6267_v11 }
  0x65   :  { %5442 = vmatmul.msk.bf16.gmra.mxu2 %vm401_vm3, %v6268_v12 }
  0x75   :  { %5443 = vmatmul.msk.bf16.gmra.mxu2 %vm401_vm3, %v6269_v13 }
  0x85   :  { %5444 = vmatmul.msk.bf16.gmra.mxu2 %vm401_vm3, %v6270_v16  ;;  %v6766_v16 = vshrl.u32 %v869_v63, 7 }
  0x87   :  { %10344 = vst [vmem:[#allocation5_spill] sm:$0xff] %v6766_v16  ;;  %vm871_vm6 = vcmp.lt.s32.totalorder %v6766_v16, 7  ;;  %vm1275_vm7 = vcmp.lt.s32.totalorder %v6766_v16, 1 }
  0x91   :  { %v116_v19 = vpop.f32.mrf.mxu0 }
  0x92   :  { %v117_v20 = vadd.f32 %v6468_v17, %v116_v19 }
  0x94   :  { %v119_v21 = vmax.f32 %v117_v20, 0.0 }
  0x95   :  { %5445 = vmatmul.msk.bf16.gmra.mxu2 %vm401_vm3, %v6271_v18 }
  0x96   :  { %5300 = vmatmul.msk.f32.vlgmr.msra.gmra.mxu1 %vm126_vm4, %v119_v21 }
  0xa5   :  { %5446 = vmatmul.msk.bf16.gmra.mxu2 %vm401_vm3, %v6272_v22 }
  0xa8   :  { %v511_v23 = vpop.f32.mrf.mxu2 }
  0xa9   :  { %v512_v43 = vadd.f32 %v6737_v42, %v511_v23 }
  0xab   :  { %v671_v48 = vmax.f32 %v512_v43, 0.0 }
  0xb0   :  { %v513_v24 = vpop.f32.mrf.mxu2 }
  0xb1   :  { %v514_v47 = vadd.f32 %v6737_v42, %v513_v24 }
  0xb3   :  { %v672_v60 = vmax.f32 %v514_v47, 0.0 }
  0xb5   :  { %5447 = vmatmul.msk.bf16.gmra.mxu2 %vm401_vm3, %v6273_v25 }
  0xb8   :  { %v516_v26 = vpop.f32.mrf.mxu2 }
  0xb9   :  { %v517_v49 = vadd.f32 %v6737_v42, %v516_v26 }
  0xbb   :  { %v673_v0 = vmax.f32 %v517_v49, 0.0 }
  0xc0   :  { %v518_v27 = vpop.f32.mrf.mxu2 }
  0xc1   :  { %v519_v50 = vadd.f32 %v6737_v42, %v518_v27 }
  0xc3   :  { %v674_v1 = vmax.f32 %v519_v50, 0.0 }
  0xc5   :  { %5448 = vmatmul.msk.bf16.gmra.mxu2 %vm401_vm3, %v6274_v28 }
  0xc8   :  { %v521_v29 = vpop.f32.mrf.mxu2 }
  0xc9   :  { %v522_v51 = vadd.f32 %v6737_v42, %v521_v29 }
  0xcb   :  { %v675_v2 = vmax.f32 %v522_v51, 0.0 }
  0xd0   :  { %v523_v30 = vpop.f32.mrf.mxu2 }
  0xd1   :  { %v524_v52 = vadd.f32 %v6737_v42, %v523_v30 }
  0xd3   :  { %v676_v3 = vmax.f32 %v524_v52, 0.0 }
  0xd5   :  { %5449 = vmatmul.msk.bf16.gmra.mxu2 %vm401_vm3, %v6275_v31 }
  0xd8   :  { %v526_v32 = vpop.f32.mrf.mxu2 }
  0xd9   :  { %v527_v53 = vadd.f32 %v6737_v42, %v526_v32 }
  0xdb   :  { %v677_v4 = vmax.f32 %v527_v53, 0.0 }
  0xe0   :  { %v528_v33 = vpop.f32.mrf.mxu2 }
  0xe1   :  { %v529_v54 = vadd.f32 %v6737_v42, %v528_v33 }
  0xe3   :  { %v678_v5 = vmax.f32 %v529_v54, 0.0 }
  0xe5   :  { %5450 = vmatmul.msk.bf16.gmra.mxu2 %vm401_vm3, %v6276_v34 }
  0xe8   :  { %v531_v35 = vpop.f32.mrf.mxu2 }
  0xe9   :  { %v532_v55 = vadd.f32 %v6737_v42, %v531_v35 }
  0xeb   :  { %v679_v9 = vmax.f32 %v532_v55, 0.0 }
  0xf0   :  { %v533_v36 = vpop.f32.mrf.mxu2 }
  0xf1   :  { %v534_v57 = vadd.f32 %v6737_v42, %v533_v36 }
  0xf3   :  { %v680_v10 = vmax.f32 %v534_v57, 0.0 }
  0xf5   :  { %5451 = vmatmul.msk.bf16.gmra.mxu2 %vm401_vm3, %v6277_v37 }
  0xf8   :  { %v536_v38 = vpop.f32.mrf.mxu2 }
  0xf9   :  { %v537_v58 = vadd.f32 %v6737_v42, %v536_v38 }
  0xfb   :  { %v681_v11 = vmax.f32 %v537_v58, 0.0 }
 0x100   :  { %v538_v39 = vpop.f32.mrf.mxu2 }
 0x101   :  { %v539_v61 = vadd.f32 %v6737_v42, %v538_v39 }
 0x103   :  { %v682_v13 = vmax.f32 %v539_v61, 0.0 }
 0x105   :  { %5452 = vmatmul.msk.bf16.gmra.mxu2 %vm401_vm3, %v6278_v40 }
 0x108   :  { %v541_v41 = vpop.f32.mrf.mxu2 }
 0x109   :  { %v542_v62 = vadd.f32 %v6737_v42, %v541_v41 }
 0x10b   :  { %v683_v14 = vmax.f32 %v542_v62, 0.0 }
 0x110   :  { %v543_v44 = vpop.f32.mrf.mxu2 }
 0x111   :  { %v544_v15 = vadd.f32 %v6737_v42, %v543_v44 }
 0x113   :  { %v147_v56 = vpop.f32.mrf.mxu1  ;;  %v684_v36 = vmax.f32 %v544_v15, 0.0  ;;  %v6281_v15 = vld [vmem:[%s10340_s27 + $0x88] sm:$0xff] }
 0x114   :  { %v148_v59 = vadd.f32 %v6470_v45, %v147_v56  ;;  %v6280_v45 = vld [vmem:[%s10340_s27 + $0x80] sm:$0xff] }
 0x115   :  { %5453 = vmatmul.msk.bf16.gmra.mxu2 %vm401_vm3, %v6279_v46 }
 0x116   :  { %vm150_vm5 = vcmp.gt.f32.partialorder %v148_v59, 0.0 }
 0x117   :  { %v6760_v7 = vsel %vm150_vm5, 1.0, %v10230_v6 }
 0x118   :  { %v546_v8 = vpop.f32.mrf.mxu2  ;;  %v6763_v12 = vperm.slane %v6760_v7, 0 }
 0x119   :  { %v547_v20 = vadd.f32 %v6737_v42, %v546_v8 }
 0x11a   :  { %v741_v17 = vmul.f32 %v6763_v12, %v671_v48  ;;  %v742_v18 = vmul.f32 %v6763_v12, %v672_v60  ;;  %v743_v19 = vmul.f32 %v6763_v12, %v673_v0  ;;  %v744_v21 = vmul.f32 %v6763_v12, %v674_v1 }
 0x11b   :  { %v745_v22 = vmul.f32 %v6763_v12, %v675_v2  ;;  %v746_v23 = vmul.f32 %v6763_v12, %v676_v3  ;;  %v747_v24 = vmul.f32 %v6763_v12, %v677_v4  ;;  %v748_v25 = vmul.f32 %v6763_v12, %v678_v5 }
 0x11c   :  { %v749_v26 = vmul.f32 %v6763_v12, %v679_v9  ;;  %v750_v27 = vmul.f32 %v6763_v12, %v680_v10  ;;  %v751_v28 = vmul.f32 %v6763_v12, %v681_v11  ;;  %v752_v29 = vmul.f32 %v6763_v12, %v682_v13 }
 0x11d   :  { %v753_v30 = vmul.f32 %v6763_v12, %v683_v14  ;;  %v6782_v31 = vmax.f32 %v741_v17, %v743_v19  ;;  %v807_v32 = vmax.f32 %v745_v22, %v747_v24  ;;  %v685_v34 = vmax.f32 %v547_v20, 0.0 }
 0x11e   :  { %v809_v33 = vmax.f32 %v749_v26, %v751_v28  ;;  %v808_v35 = vmax.f32 %v746_v23, %v748_v25  ;;  %v810_v38 = vmax.f32 %v750_v27, %v752_v29  ;;  %v806_v39 = vmax.f32 %v742_v18, %v744_v21 }
 0x11f   :  { %v755_v40 = vmul.f32 %v6763_v12, %v685_v34  ;;  %v839_v41 = vrot.slane %v807_v32, 1  ;;  %v10233_v46 = vrot.slane %v6782_v31, 1  ;;  %v754_v50 = vmul.f32 %v6763_v12, %v684_v36 }
 0x120   :  { %v548_v37 = vpop.f32.mrf.mxu2  ;;  %v841_v43 = vrot.slane %v809_v33, 1  ;;  %v842_v47 = vrot.slane %v810_v38, 1  ;;  %v840_v48 = vrot.slane %v808_v35, 1  ;;  %v838_v49 = vrot.slane %v806_v39, 1 }
 0x121   :  { %v549_v44 = vadd.f32 %v6737_v42, %v548_v37  ;;  %v811_v51 = vmax.f32 %v753_v30, %v755_v40  ;;  %v6282_v30 = vld [vmem:[%s10340_s27 + $0x90] sm:$0xff] }
 0x122   :  { %v898_v53 = vsel %vm871_vm6, %v841_v43, %v842_v47  ;;  %v899_v54 = vsel %vm871_vm6, %v840_v48, %v841_v43  ;;  %v900_v55 = vsel %vm871_vm6, %v839_v41, %v840_v48  ;;  %v901_v56 = vsel %vm871_vm6, %v838_v49, %v839_v41 }
 0x123   :  { %v686_v52 = vmax.f32 %v549_v44, 0.0  ;;  %v843_v57 = vrot.slane %v811_v51, 1  ;;  %v908_v59 = vmax.f32 %v809_v33, %v898_v53  ;;  %v906_v60 = vmax.f32 %v807_v32, %v900_v55 }
 0x124   :  { %v907_v61 = vmax.f32 %v808_v35, %v899_v54  ;;  %v902_v62 = vsel %vm871_vm6, %v10233_v46, %v838_v49  ;;  %v905_v63 = vmax.f32 %v806_v39, %v901_v56 }
 0x125   :  { %v756_v58 = vmul.f32 %v6763_v12, %v686_v52  ;;  %5454 = vmatmul.msk.bf16.gmra.mxu2 %vm401_vm3, %v6280_v45  ;;  %v897_v1 = vsel %vm871_vm6, %v842_v47, %v843_v57  ;;  %v904_v2 = vmax.f32 %v6782_v31, %v902_v62  ;;  %v6283_v45 = vld [vmem:[%s10340_s27 + $0x98] sm:$0xff] }
 0x126   :  { %v909_v4 = vmax.f32 %v810_v38, %v897_v1  ;;  %v6809_v5 = vpack.c.bf16 %v907_v61, %v906_v60  ;;  %v6284_v60 = vld [vmem:[%s10340_s27 + $0xa0] sm:$0xff] }
 0x127   :  { %v812_v0 = vmax.f32 %v754_v50, %v756_v58  ;;  %v6811_v9 = vpack.c.bf16 %v905_v63, %v904_v2 }
 0x128   :  { %v551_v3 = vpop.f32.mrf.mxu2  ;;  %v6813_v10 = vpack.c.bf16 %v909_v4, %v908_v59 }
 0x129   :  { %v844_v8 = vrot.slane %v812_v0, 1  ;;  %v552_v17 = vadd.f32 %v6737_v42, %v551_v3 }
 0x12b   :  { %v896_v11 = vsel %vm871_vm6, %v843_v57, %v844_v8  ;;  %v687_v19 = vmax.f32 %v552_v17, 0.0 }
 0x12c   :  { %v910_v13 = vmax.f32 %v811_v51, %v896_v11 }
 0x12d   :  { %v757_v22 = vmul.f32 %v6763_v12, %v687_v19  ;;  %v1292_v19 = vld [vmem:[%s10345_s11] sm:$0xff] }
 0x130   :  { %v553_v14 = vpop.f32.mrf.mxu2 }
 0x131   :  { %v554_v23 = vadd.f32 %v6737_v42, %v553_v14 }
 0x133   :  { %v688_v27 = vmax.f32 %v554_v23, 0.0 }
 0x135   :  { %5455 = vmatmul.msk.bf16.gmra.mxu2 %vm401_vm3, %v6281_v15  ;;  %v758_v35 = vmul.f32 %v6763_v12, %v688_v27  ;;  %v6285_v15 = vld [vmem:[%s10340_s27 + $0xa8] sm:$0xff] }
 0x138   :  { %v556_v18 = vpop.f32.mrf.mxu2 }
 0x139   :  { %v557_v20 = vadd.f32 %v6737_v42, %v556_v18  ;;  %v5536_v18 = vld [vmem:[%s10345_s11 + $0x80] sm:$0xff] }
 0x13b   :  { %v689_v21 = vmax.f32 %v557_v20, 0.0  ;;  %v6510_v20 = vmov 0  }
 0x13c   :  { %6465 = vset.pattern.permute.xlu0 %v6510_v20  ;;  %6466 = vset.pattern.permute.xlu1 %v6510_v20 }
 0x13d   :  { %v759_v24 = vmul.f32 %v6763_v12, %v689_v21  ;;  %1439 = vperm.xlu0 %6465, %v5536_v18   ;;  %1310 = vperm.xlu1 %6466, %v1292_v19   ;;  %v5542_v18 = vld [vmem:[%s10345_s11 + $0xb0] sm:$0xff] }
 0x13e   :  { %6467 = vset.pattern.permute.xlu2 %v6510_v20  ;;  %v5543_v20 = vld [vmem:[%s10345_s11 + $0xb8] sm:$0xff] }
 0x13f   :  { %v813_v25 = vmax.f32 %v757_v22, %v759_v24 }
 0x140   :  { %v558_v26 = vpop.f32.mrf.mxu2 }
 0x141   :  { %v845_v28 = vrot.slane %v813_v25, 1  ;;  %v559_v29 = vadd.f32 %v6737_v42, %v558_v26 }
 0x143   :  { %v690_v32 = vmax.f32 %v559_v29, 0.0  ;;  %v895_v33 = vsel %vm871_vm6, %v844_v8, %v845_v28  ;;  %v1293_v29 = vld [vmem:[%s10345_s11 + $0x8] sm:$0xff] }
 0x144   :  { %v911_v34 = vmax.f32 %v812_v0, %v895_v33 }
 0x145   :  { %v760_v36 = vmul.f32 %v6763_v12, %v690_v32  ;;  %5456 = vmatmul.msk.bf16.gmra.mxu2 %vm401_vm3, %v6282_v30  ;;  %1315 = vperm.xlu1 %6466, %v1293_v29  }
 0x146   :  { %v6835_v37 = vpack.c.bf16 %v911_v34, %v910_v13 }
 0x147   :  { %v814_v38 = vmax.f32 %v758_v35, %v760_v36  ;;  %v6286_v36 = vld [vmem:[%s10340_s27 + $0xb0] sm:$0xff] }
 0x148   :  { %v561_v39 = vpop.f32.mrf.mxu2 }
 0x149   :  { %v846_v40 = vrot.slane %v814_v38, 1  ;;  %v562_v47 = vadd.f32 %v6737_v42, %v561_v39 }
 0x14b   :  { %v894_v41 = vsel %vm871_vm6, %v845_v28, %v846_v40  ;;  %v691_v49 = vmax.f32 %v562_v47, 0.0  ;;  %v5537_v28 = vld [vmem:[%s10345_s11 + $0x88] sm:$0xff] }
 0x14c   :  { %v912_v43 = vmax.f32 %v813_v25, %v894_v41  ;;  %1444 = vperm.xlu0 %6465, %v5537_v28   ;;  %v6289_v28 = vld [vmem:[%s10340_s27 + $0xc8] sm:$0xff] }
 0x14d   :  { %v761_v52 = vmul.f32 %v6763_v12, %v691_v49 }
 0x150   :  { %v563_v44 = vpop.f32.mrf.mxu2 }
 0x151   :  { %v564_v53 = vadd.f32 %v6737_v42, %v563_v44  ;;  %v5538_v44 = vld [vmem:[%s10345_s11 + $0x90] sm:$0xff] }
 0x153   :  { %v692_v57 = vmax.f32 %v564_v53, 0.0  ;;  %v1295_v53 = vld [vmem:[%s10345_s11 + $0x18] sm:$0xff] }
 0x154   :  { %1449 = vperm.xlu0 %6465, %v5538_v44  }
 0x155   :  { %5457 = vmatmul.msk.bf16.gmra.mxu2 %vm401_vm3, %v6283_v45  ;;  %v762_v0 = vmul.f32 %v6763_v12, %v692_v57  ;;  %v5539_v45 = vld [vmem:[%s10345_s11 + $0x98] sm:$0xff] }
 0x156   :  { %1454 = vperm.xlu1 %6466, %v5539_v45  }
 0x158   :  { %v566_v48 = vpop.f32.mrf.mxu2 }
 0x159   :  { %v567_v50 = vadd.f32 %v6737_v42, %v566_v48 }
 0x15b   :  { %v693_v51 = vmax.f32 %v567_v50, 0.0 }
 0x15c   :  { %1325 = vperm.xlu0 %6465, %v1295_v53  }
 0x15d   :  { %v763_v54 = vmul.f32 %v6763_v12, %v693_v51 }
 0x15f   :  { %v815_v55 = vmax.f32 %v761_v52, %v763_v54  ;;  %v5554_v54 = vld [vmem:[%s10345_s11 + $0x110] sm:$0xff] }
 0x160   :  { %v568_v56 = vpop.f32.mrf.mxu2  ;;  %1610 = vperm.xlu1 %6466, %v5554_v54  }
 0x161   :  { %v847_v58 = vrot.slane %v815_v55, 1  ;;  %v569_v59 = vadd.f32 %v6737_v42, %v568_v56  ;;  %v6287_v56 = vld [vmem:[%s10340_s27 + $0xb8] sm:$0xff] }
 0x163   :  { %v694_v61 = vmax.f32 %v569_v59, 0.0  ;;  %v893_v62 = vsel %vm871_vm6, %v846_v40, %v847_v58  ;;  %v5541_v59 = vld [vmem:[%s10345_s11 + $0xa8] sm:$0xff] }
 0x164   :  { %v913_v63 = vmax.f32 %v814_v38, %v893_v62 }
 0x165   :  { %v764_v1 = vmul.f32 %v6763_v12, %v694_v61  ;;  %5458 = vmatmul.msk.bf16.gmra.mxu2 %vm401_vm3, %v6284_v60 }
 0x166   :  { %v6857_v2 = vpack.c.bf16 %v913_v63, %v912_v43 }
 0x167   :  { %v816_v3 = vmax.f32 %v762_v0, %v764_v1 }
 0x168   :  { %v571_v4 = vpop.f32.mrf.mxu2  ;;  %1464 = vperm.xlu1 %6466, %v5541_v59  }
 0x169   :  { %v848_v8 = vrot.slane %v816_v3, 1  ;;  %v572_v17 = vadd.f32 %v6737_v42, %v571_v4 }
 0x16b   :  { %v892_v11 = vsel %vm871_vm6, %v847_v58, %v848_v8  ;;  %v695_v22 = vmax.f32 %v572_v17, 0.0  ;;  %v5540_v58 = vld [vmem:[%s10345_s11 + $0xa0] sm:$0xff] }
 0x16c   :  { %v914_v13 = vmax.f32 %v815_v55, %v892_v11  ;;  %1459 = vperm.xlu0 %6465, %v5540_v58   ;;  %v6288_v11 = vld [vmem:[%s10340_s27 + $0xc0] sm:$0xff] }
 0x16d   :  { %v765_v25 = vmul.f32 %v6763_v12, %v695_v22 }
 0x170   :  { %v573_v14 = vpop.f32.mrf.mxu2 }
 0x171   :  { %v574_v26 = vadd.f32 %v6737_v42, %v573_v14 }
 0x173   :  { %v696_v33 = vmax.f32 %v574_v26, 0.0 }
 0x175   :  { %5459 = vmatmul.msk.bf16.gmra.mxu2 %vm401_vm3, %v6285_v15  ;;  %v766_v41 = vmul.f32 %v6763_v12, %v696_v33 }
 0x178   :  { %v576_v21 = vpop.f32.mrf.mxu2 }
 0x179   :  { %v577_v23 = vadd.f32 %v6737_v42, %v576_v21 }
 0x17b   :  { %v697_v24 = vmax.f32 %v577_v23, 0.0  ;;  %v1299_v23 = vld [vmem:[%s10345_s11 + $0x38] sm:$0xff] }
 0x17d   :  { %v767_v27 = vmul.f32 %v6763_v12, %v697_v24 }
 0x17f   :  { %v817_v30 = vmax.f32 %v765_v25, %v767_v27  ;;  %v5558_v25 = vld [vmem:[%s10345_s11 + $0x130] sm:$0xff] }
 0x180   :  { %v578_v32 = vpop.f32.mrf.mxu2 }
 0x181   :  { %v849_v34 = vrot.slane %v817_v30, 1  ;;  %v579_v35 = vadd.f32 %v6737_v42, %v578_v32 }
 0x183   :  { %v698_v38 = vmax.f32 %v579_v35, 0.0  ;;  %v891_v39 = vsel %vm871_vm6, %v848_v8, %v849_v34 }
 0x184   :  { %v915_v40 = vmax.f32 %v816_v3, %v891_v39  ;;  %v1297_v3 = vld [vmem:[%s10345_s11 + $0x28] sm:$0xff] }
 0x185   :  { %v768_v43 = vmul.f32 %v6763_v12, %v698_v38  ;;  %5460 = vmatmul.msk.bf16.gmra.mxu2 %vm401_vm3, %v6286_v36  ;;  %1335 = vperm.xlu0 %6465, %v1297_v3   ;;  %v5545_v36 = vld [vmem:[%s10345_s11 + $0xc8] sm:$0xff]  ;;  %v5547_v3 = vld [vmem:[%s10345_s11 + $0xd8] sm:$0xff] }
 0x186   :  { %v6897_v47 = vpack.c.bf16 %v915_v40, %v914_v13  ;;  %v5556_v13 = vld [vmem:[%s10345_s11 + $0x120] sm:$0xff] }
 0x187   :  { %v818_v48 = vmax.f32 %v766_v41, %v768_v43  ;;  %1620 = vperm.xlu1 %6466, %v5556_v13  }
 0x188   :  { %v581_v49 = vpop.f32.mrf.mxu2 }
 0x189   :  { %v850_v50 = vrot.slane %v818_v48, 1  ;;  %v582_v57 = vadd.f32 %v6737_v42, %v581_v49 }
 0x18b   :  { %v890_v51 = vsel %vm871_vm6, %v849_v34, %v850_v50  ;;  %v699_v61 = vmax.f32 %v582_v57, 0.0  ;;  %v5544_v34 = vld [vmem:[%s10345_s11 + $0xc0] sm:$0xff] }
 0x18c   :  { %v916_v52 = vmax.f32 %v817_v30, %v890_v51  ;;  %v736_v30 = vrot.slane %v6760_v7, 1  ;;  %v5560_v57 = vld [vmem:[%s10345_s11 + $0x140] sm:$0xff] }
 0x18d   :  { %v769_v0 = vmul.f32 %v6763_v12, %v699_v61  ;;  %1469 = vperm.xlu0 %6465, %v5542_v18  }
 0x18e   :  { %v6966_v39 = vperm.slane %v736_v30, 0 }
 0x18f   :  { %1474 = vperm.xlu1 %6466, %v5543_v20   ;;  %v6291_v20 = vld [vmem:[%s10340_s27 + $0xd8] sm:$0xff] }
 0x190   :  { %v583_v55 = vpop.f32.mrf.mxu2 }
 0x191   :  { %v584_v24 = vadd.f32 %v6737_v42, %v583_v55  ;;  %v6290_v55 = vld [vmem:[%s10340_s27 + $0xd0] sm:$0xff] }
 0x193   :  { %v700_v29 = vmax.f32 %v584_v24, 0.0 }
 0x195   :  { %5461 = vmatmul.msk.bf16.gmra.mxu2 %vm401_vm3, %v6287_v56  ;;  %1345 = vperm.xlu0 %6465, %v1299_v23   ;;  %v770_v35 = vmul.f32 %v6763_v12, %v700_v29 }
 0x197   :  { %1630 = vperm.xlu1 %6466, %v5558_v25  }
 0x198   :  { %v586_v60 = vpop.f32.mrf.mxu2 }
 0x199   :  { %v587_v62 = vadd.f32 %v6737_v42, %v586_v60 }
 0x19b   :  { %v701_v63 = vmax.f32 %v587_v62, 0.0 }
 0x19d   :  { %v771_v1 = vmul.f32 %v6763_v12, %v701_v63  ;;  %1479 = vperm.xlu0 %6465, %v5544_v34   ;;  %v5564_v34 = vld [vmem:[%s10345_s11 + $0x160] sm:$0xff] }
 0x19f   :  { %v6924_v4 = vmax.f32 %v769_v0, %v771_v1  ;;  %1484 = vperm.xlu1 %6466, %v5545_v36   ;;  %v5546_v0 = vld [vmem:[%s10345_s11 + $0xd0] sm:$0xff] }
 0x1a0   :  { %v588_v8 = vpop.f32.mrf.mxu2 }
 0x1a1   :  { %v851_v14 = vrot.slane %v6924_v4, 1  ;;  %v589_v22 = vadd.f32 %v6737_v42, %v588_v8 }
 0x1a3   :  { %v889_v15 = vsel %vm871_vm6, %v850_v50, %v851_v14  ;;  %v702_v27 = vmax.f32 %v589_v22, 0.0  ;;  %v1301_v50 = vld [vmem:[%s10345_s11 + $0x48] sm:$0xff] }
 0x1a4   :  { %v917_v17 = vmax.f32 %v818_v48, %v889_v15  ;;  %v1303_v15 = vld [vmem:[%s10345_s11 + $0x58] sm:$0xff] }
 0x1a5   :  { %5462 = vmatmul.msk.bf16.gmra.mxu2 %vm401_vm3, %v6288_v11  ;;  %v772_v32 = vmul.f32 %v6763_v12, %v702_v27  ;;  %1355 = vperm.xlu0 %6465, %v1301_v50   ;;  %v5566_v50 = vld [vmem:[%s10345_s11 + $0x170] sm:$0xff] }
 0x1a6   :  { %v6939_v19 = vpack.c.bf16 %v917_v17, %v916_v52  ;;  %v5562_v17 = vld [vmem:[%s10345_s11 + $0x150] sm:$0xff] }
 0x1a7   :  { %v820_v41 = vmax.f32 %v770_v35, %v772_v32  ;;  %1640 = vperm.xlu1 %6466, %v5560_v57  }
 0x1a8   :  { %v591_v21 = vpop.f32.mrf.mxu2 }
 0x1a9   :  { %v592_v33 = vadd.f32 %v6737_v42, %v591_v21  ;;  %v852_v48 = vrot.slane %v820_v41, 1  ;;  %v5548_v21 = vld [vmem:[%s10345_s11 + $0xe0] sm:$0xff] }
 0x1ab   :  { %v703_v7 = vmax.f32 %v592_v33, 0.0  ;;  %v888_v56 = vsel %vm871_vm6, %v851_v14, %v852_v48  ;;  %v6292_v33 = vld [vmem:[%s10340_s27 + $0xe0] sm:$0xff] }
 0x1ac   :  { %v918_v60 = vmax.f32 %v6924_v4, %v888_v56 }
 0x1ad   :  { %v773_v44 = vmul.f32 %v6966_v39, %v703_v7  ;;  %1489 = vperm.xlu0 %6465, %v5546_v0  }
 0x1af   :  { %1494 = vperm.xlu1 %6466, %v5547_v3  }
 0x1b0   :  { %v593_v26 = vpop.f32.mrf.mxu2 }
 0x1b1   :  { %v594_v45 = vadd.f32 %v6737_v42, %v593_v26 }
 0x1b3   :  { %v704_v52 = vmax.f32 %v594_v45, 0.0 }
 0x1b5   :  { %5463 = vmatmul.msk.bf16.gmra.mxu2 %vm401_vm3, %v6289_v28  ;;  %v774_v62 = vmul.f32 %v6966_v39, %v704_v52  ;;  %1365 = vperm.xlu0 %6465, %v1303_v15   ;;  %v6293_v52 = vld [vmem:[%s10340_s27 + $0xe8] sm:$0xff] }
 0x1b7   :  { %1650 = vperm.xlu1 %6466, %v5562_v17  }
 0x1b8   :  { %v596_v38 = vpop.f32.mrf.mxu2 }
 0x1b9   :  { %v597_v40 = vadd.f32 %v6737_v42, %v596_v38 }
 0x1bb   :  { %v705_v43 = vmax.f32 %v597_v40, 0.0  ;;  %v5550_v40 = vld [vmem:[%s10345_s11 + $0xf0] sm:$0xff] }
 0x1bd   :  { %v775_v12 = vmul.f32 %v6966_v39, %v705_v43  ;;  %1499 = vperm.xlu0 %6465, %v5548_v21   ;;  %v5551_v43 = vld [vmem:[%s10345_s11 + $0xf8] sm:$0xff] }
 0x1be   :  { %v5587_v21 = vld [vmem:[%s10345_s11 + $0x298] sm:$0xff] }
 0x1bf   :  { %v6972_v49 = vmax.f32 %v773_v44, %v775_v12 }
 0x1c0   :  { %v598_v51 = vpop.f32.mrf.mxu2 }
 0x1c1   :  { %v853_v53 = vrot.slane %v6972_v49, 1  ;;  %v599_v54 = vadd.f32 %v6737_v42, %v598_v51 }
 0x1c3   :  { %v706_v58 = vmax.f32 %v599_v54, 0.0  ;;  %v887_v59 = vsel %vm871_vm6, %v852_v48, %v853_v53  ;;  %v5568_v54 = vld [vmem:[%s10345_s11 + $0x180] sm:$0xff] }
 0x1c4   :  { %v919_v61 = vmax.f32 %v820_v41, %v887_v59  ;;  %v7077_v59 = vpop.permute.xlu1 %1310 }
 0x1c5   :  { %v776_v63 = vmul.f32 %v6966_v39, %v706_v58  ;;  %5464 = vmatmul.msk.bf16.gmra.mxu2 %vm401_vm3, %v6290_v55  ;;  %v5569_v55 = vld [vmem:[%s10345_s11 + $0x188] sm:$0xff]  ;;  %10346 = vst [vmem:[#allocation6_spill] sm:$0xff] %v7077_v59 }
 0x1c6   :  { %v959_v1 = vpack.c.bf16 %v919_v61, %v918_v60  ;;  %v7079_v60 = vpop.permute.xlu0 %1439 }
 0x1c7   :  { %v822_v8 = vmax.f32 %v774_v62, %v776_v63  ;;  %10347 = vst [vmem:[#allocation7_spill] sm:$0xff] %v7079_v60 }
 0x1c8   :  { %v601_v11 = vpop.f32.mrf.mxu2  ;;  %1048 = vmatpush.bf16.msra.mxu3 %v959_v1  ;;  %v5585_v1 = vld [vmem:[%s10345_s11 + $0x288] sm:$0xff] }
 0x1c9   :  { %v854_v4 = vrot.slane %v822_v8, 1 }
 0x1cb   :  { %v886_v13 = vsel %vm871_vm6, %v853_v53, %v854_v4 }
 0x1cc   :  { %1049 = vmatpush.bf16.msra.mxu3 %v6939_v19  ;;  %v920_v14 = vmax.f32 %v6972_v49, %v886_v13  ;;  %v602_v19 = vadd.f32 %v6737_v42, %v601_v11  ;;  %v1307_v49 = vld [vmem:[%s10345_s11 + $0x78] sm:$0xff]  ;;  %v6294_v11 = vld [vmem:[%s10340_s27 + $0xf0] sm:$0xff]  ;;  %v7095_v13 = vpop.permute.xlu1 %1315 }
 0x1cd   :  { %10348 = vst [vmem:[#allocation8_spill] sm:$0xff] %v7095_v13  ;;  %v5630_v13 = vld [vmem:[%s10345_s11 + $0x3f0] sm:$0xff] }
 0x1ce   :  { %v707_v23 = vmax.f32 %v602_v19, 0.0  ;;  %v7099_v15 = vpop.permute.xlu0 %1444 }
 0x1d0   :  { %v603_v18 = vpop.f32.mrf.mxu2  ;;  %1050 = vmatpush.bf16.msra.mxu3 %v6897_v47  ;;  %v5549_v47 = vld [vmem:[%s10345_s11 + $0xe8] sm:$0xff]  ;;  %v777_v25 = vmul.f32 %v6966_v39, %v707_v23 }
 0x1d1   :  { %1504 = vperm.xlu1 %6466, %v5549_v47   ;;  %v604_v26 = vadd.f32 %v6737_v42, %v603_v18  ;;  %v5586_v18 = vld [vmem:[%s10345_s11 + $0x290] sm:$0xff] }
 0x1d3   :  { %v708_v30 = vmax.f32 %v604_v26, 0.0 }
 0x1d4   :  { %1051 = vmatpush.bf16.msra.mxu3 %v6857_v2  ;;  %v7114_v23 = vpop.permute.xlu1 %1454 }
 0x1d5   :  { %5465 = vmatmul.msk.bf16.gmra.mxu2 %vm401_vm3, %v6291_v20  ;;  %v778_v38 = vmul.f32 %v6966_v39, %v708_v30  ;;  %v5552_v20 = vld [vmem:[%s10345_s11 + $0x100] sm:$0xff] }
 0x1d6   :  { %1600 = vperm.xlu2 %6467, %v5552_v20   ;;  %v5557_v20 = vld [vmem:[%s10345_s11 + $0x128] sm:$0xff] }
 0x1d8   :  { %v606_v22 = vpop.f32.mrf.mxu2  ;;  %1052 = vmatpush.bf16.msra.mxu3 %v6835_v37  ;;  %v1305_v37 = vld [vmem:[%s10345_s11 + $0x68] sm:$0xff] }
 0x1d9   :  { %v607_v24 = vadd.f32 %v6737_v42, %v606_v22  ;;  %1375 = vperm.xlu0 %6465, %v1305_v37   ;;  %1660 = vperm.xlu1 %6466, %v5564_v34   ;;  %v1294_v34 = vld [vmem:[%s10345_s11 + $0x10] sm:$0xff] }
 0x1db   :  { %v709_v2 = vmax.f32 %v607_v24, 0.0  ;;  %v5573_v24 = vld [vmem:[%s10345_s11 + $0x1a8] sm:$0xff] }
 0x1dc   :  { %1053 = vmatpush.bf16.msra.mxu3 %v6813_v10 }
 0x1dd   :  { %v779_v27 = vmul.f32 %v6966_v39, %v709_v2  ;;  %v5553_v2 = vld [vmem:[%s10345_s11 + $0x108] sm:$0xff] }
 0x1de   :  { %1605 = vperm.xlu2 %6467, %v5553_v2  }
 0x1df   :  { %v7028_v28 = vmax.f32 %v777_v25, %v779_v27  ;;  %v7122_v25 = vpop.permute.xlu0 %1449  ;;  %v5588_v27 = vld [vmem:[%s10345_s11 + $0x2a0] sm:$0xff] }
 0x1e0   :  { %v608_v29 = vpop.f32.mrf.mxu2  ;;  %1054 = vmatpush.bf16.msra.mxu3 %v6809_v5 }
 0x1e1   :  { %v855_v32 = vrot.slane %v7028_v28, 1  ;;  %v609_v10 = vadd.f32 %v6737_v42, %v608_v29  ;;  %1509 = vperm.xlu0 %6465, %v5550_v40   ;;  %1514 = vperm.xlu1 %6466, %v5551_v43   ;;  %v6295_v29 = vld [vmem:[%s10340_s27 + $0xf8] sm:$0xff] }
 0x1e3   :  { %v710_v35 = vmax.f32 %v609_v10, 0.0  ;;  %v885_v36 = vsel %vm871_vm6, %v854_v4, %v855_v32  ;;  %v5570_v4 = vld [vmem:[%s10345_s11 + $0x190] sm:$0xff] }
 0x1e4   :  { %1055 = vmatpush.bf16.msra.mxu3 %v6811_v9  ;;  %v921_v5 = vmax.f32 %v822_v8, %v885_v36  ;;  %v7141_v36 = vpop.permute.xlu1 %1610 }
 0x1e5   :  { %v780_v7 = vmul.f32 %v6966_v39, %v710_v35  ;;  %5466 = vmatmul.msk.bf16.gmra.mxu2 %vm401_vm3, %v6292_v33  ;;  %v5574_v33 = vld [vmem:[%s10345_s11 + $0x1b0] sm:$0xff]  ;;  %10349 = vst [vmem:[#allocation9_spill] sm:$0xff] %v7141_v36 }
 0x1e6   :  { %v7051_v41 = vpack.c.bf16 %v921_v5, %v920_v14  ;;  %1320 = vperm.xlu2 %6467, %v1294_v34   ;;  %v5575_v5 = vld [vmem:[%s10345_s11 + $0x1b8] sm:$0xff] }
 0x1e7   :  { %v824_v44 = vmax.f32 %v778_v38, %v780_v7  ;;  %v7146_v7 = vpop.permute.xlu0 %1325 }
 0x1e8   :  { %v611_v45 = vpop.f32.mrf.mxu2 }
 0x1e9   :  { %v856_v9 = vrot.slane %v824_v44, 1  ;;  %1385 = vperm.xlu0 %6465, %v1307_v49   ;;  %1670 = vperm.xlu1 %6466, %v5566_v50   ;;  %v612_v53 = vadd.f32 %v6737_v42, %v611_v45  ;;  %v5591_v50 = vld [vmem:[%s10345_s11 + $0x2b8] sm:$0xff] }
 0x1eb   :  { %v884_v12 = vsel %vm871_vm6, %v855_v32, %v856_v9  ;;  %v711_v57 = vmax.f32 %v612_v53, 0.0 }
 0x1ec   :  { %v922_v48 = vmax.f32 %v7028_v28, %v884_v12  ;;  %v7157_v53 = vpop.permute.xlu1 %1464 }
 0x1ed   :  { %v781_v62 = vmul.f32 %v6966_v39, %v711_v57  ;;  %10350 = vst [vmem:[#allocation10_spill] sm:$0xff] %v7157_v53 }
 0x1ef   :  { %v7167_v57 = vpop.permute.xlu0 %1459 }
 0x1f0   :  { %v613_v51 = vpop.f32.mrf.mxu2  ;;  %10351 = vst [vmem:[#allocation11_spill] sm:$0xff] %v7167_v57 }
 0x1f1   :  { %1729 = vperm.xlu0 %6465, %v5568_v54   ;;  %1734 = vperm.xlu1 %6466, %v5569_v55   ;;  %v614_v26 = vadd.f32 %v6737_v42, %v613_v51  ;;  %v5555_v54 = vld [vmem:[%s10345_s11 + $0x118] sm:$0xff]  ;;  %v5576_v55 = vld [vmem:[%s10345_s11 + $0x1c0] sm:$0xff] }
 0x1f2   :  { %1615 = vperm.xlu2 %6467, %v5555_v54   ;;  %v5582_v54 = vld [vmem:[%s10345_s11 + $0x1f0] sm:$0xff] }
 0x1f3   :  { %v712_v30 = vmax.f32 %v614_v26, 0.0 }
 0x1f5   :  { %5467 = vmatmul.msk.bf16.gmra.mxu2 %vm401_vm3, %v6293_v52  ;;  %v782_v35 = vmul.f32 %v6966_v39, %v712_v30  ;;  %v1298_v30 = vld [vmem:[%s10345_s11 + $0x30] sm:$0xff] }
 0x1f8   :  { %v616_v56 = vpop.f32.mrf.mxu2 }
 0x1f9   :  { %v617_v58 = vadd.f32 %v6737_v42, %v616_v56  ;;  %1879 = vperm.xlu0 %6465, %v5585_v1   ;;  %1739 = vperm.xlu1 %6466, %v5570_v4   ;;  %v7185_v4 = vpop.permute.xlu0 %1335 }
 0x1fa   :  { %10353 = vst [vmem:[#allocation13_spill] sm:$0xff] %v7185_v4 }
 0x1fb   :  { %v713_v61 = vmax.f32 %v617_v58, 0.0 }
 0x1fd   :  { %v783_v63 = vmul.f32 %v6966_v39, %v713_v61 }
 0x1ff   :  { %v7083_v0 = vmax.f32 %v781_v62, %v783_v63  ;;  %v5592_v63 = vld [vmem:[%s10345_s11 + $0x2c0] sm:$0xff] }
 0x200   :  { %v618_v3 = vpop.f32.mrf.mxu2 }
 0x201   :  { %v857_v8 = vrot.slane %v7083_v0, 1  ;;  %1884 = vperm.xlu0 %6465, %v5586_v18   ;;  %1889 = vperm.xlu1 %6466, %v5587_v21   ;;  %v619_v22 = vadd.f32 %v6737_v42, %v618_v3  ;;  %v1296_v3 = vld [vmem:[%s10345_s11 + $0x20] sm:$0xff]  ;;  %v5594_v21 = vld [vmem:[%s10345_s11 + $0x2d0] sm:$0xff] }
 0x202   :  { %1330 = vperm.xlu2 %6467, %v1296_v3  }
 0x203   :  { %v883_v14 = vsel %vm871_vm6, %v856_v9, %v857_v8  ;;  %v714_v37 = vmax.f32 %v619_v22, 0.0 }
 0x204   :  { %v923_v17 = vmax.f32 %v824_v44, %v883_v14 }
 0x205   :  { %5468 = vmatmul.msk.bf16.gmra.mxu2 %vm401_vm3, %v6294_v11  ;;  %v784_v32 = vmul.f32 %v6966_v39, %v714_v37  ;;  %v7205_v37 = vpop.permute.xlu0 %1469 }
 0x206   :  { %v7108_v19 = vpack.c.bf16 %v923_v17, %v922_v48  ;;  %v5579_v17 = vld [vmem:[%s10345_s11 + $0x1d8] sm:$0xff]  ;;  %10355 = vst [vmem:[#allocation15_spill] sm:$0xff] %v7205_v37 }
 0x207   :  { %v826_v44 = vmax.f32 %v782_v35, %v784_v32  ;;  %v5581_v32 = vld [vmem:[%s10345_s11 + $0x1e8] sm:$0xff] }
 0x208   :  { %v621_v47 = vpop.f32.mrf.mxu2 }
 0x209   :  { %1754 = vperm.xlu0 %6465, %v5573_v24   ;;  %1894 = vperm.xlu1 %6466, %v5588_v27   ;;  %v622_v10 = vadd.f32 %v6737_v42, %v621_v47  ;;  %v858_v48 = vrot.slane %v826_v44, 1 }
 0x20a   :  { %1625 = vperm.xlu2 %6467, %v5557_v20   ;;  %v5561_v20 = vld [vmem:[%s10345_s11 + $0x148] sm:$0xff] }
 0x20b   :  { %v715_v40 = vmax.f32 %v622_v10, 0.0  ;;  %v882_v56 = vsel %vm871_vm6, %v857_v8, %v858_v48  ;;  %v5593_v8 = vld [vmem:[%s10345_s11 + $0x2c8] sm:$0xff] }
 0x20c   :  { %v924_v61 = vmax.f32 %v7083_v0, %v882_v56  ;;  %v7183_v0 = vpop.permute.xlu1 %1620 }
 0x20d   :  { %v785_v9 = vmul.f32 %v6966_v39, %v715_v40  ;;  %10352 = vst [vmem:[#allocation12_spill] sm:$0xff] %v7183_v0  ;;  %v5611_v0 = vld [vmem:[%s10345_s11 + $0x358] sm:$0xff] }
 0x210   :  { %v623_v28 = vpop.f32.mrf.mxu2 }
 0x211   :  { %1759 = vperm.xlu0 %6465, %v5574_v33   ;;  %1764 = vperm.xlu1 %6466, %v5575_v5   ;;  %v624_v18 = vadd.f32 %v6737_v42, %v623_v28  ;;  %v5580_v28 = vld [vmem:[%s10345_s11 + $0x1e0] sm:$0xff] }
 0x212   :  { %1340 = vperm.xlu2 %6467, %v1298_v30   ;;  %v5632_v30 = vld [vmem:[%s10345_s11 + $0x400] sm:$0xff] }
 0x213   :  { %v716_v24 = vmax.f32 %v624_v18, 0.0 }
 0x214   :  { %v7200_v27 = vpop.permute.xlu1 %1474 }
 0x215   :  { %5469 = vmatmul.msk.bf16.gmra.mxu2 %vm401_vm3, %v6295_v29  ;;  %10354 = vst [vmem:[#allocation14_spill] sm:$0xff] %v7200_v27  ;;  %v786_v29 = vmul.f32 %v6966_v39, %v716_v24 }
 0x218   :  { %v626_v38 = vpop.f32.mrf.mxu2 }
 0x219   :  { %v627_v43 = vadd.f32 %v6737_v42, %v626_v38  ;;  %1909 = vperm.xlu0 %6465, %v5591_v50   ;;  %1769 = vperm.xlu1 %6466, %v5576_v55  }
 0x21b   :  { %v717_v45 = vmax.f32 %v627_v43, 0.0 }
 0x21d   :  { %v787_v12 = vmul.f32 %v6966_v39, %v717_v45  ;;  %v7219_v45 = vpop.permute.xlu1 %1630 }
 0x21e   :  { %10356 = vst [vmem:[#allocation16_spill] sm:$0xff] %v7219_v45 }
 0x21f   :  { %v7151_v49 = vmax.f32 %v785_v9, %v787_v12  ;;  %v5597_v9 = vld [vmem:[%s10345_s11 + $0x2e8] sm:$0xff]  ;;  %v7224_v12 = vpop.permute.xlu0 %1345 }
 0x220   :  { %v628_v51 = vpop.f32.mrf.mxu2  ;;  %10357 = vst [vmem:[#allocation17_spill] sm:$0xff] %v7224_v12 }
 0x221   :  { %v859_v52 = vrot.slane %v7151_v49, 1  ;;  %1914 = vperm.xlu0 %6465, %v5592_v63   ;;  %1919 = vperm.xlu1 %6466, %v5593_v8   ;;  %v629_v14 = vadd.f32 %v6737_v42, %v628_v51  ;;  %v5559_v51 = vld [vmem:[%s10345_s11 + $0x138] sm:$0xff]  ;;  %v5598_v63 = vld [vmem:[%s10345_s11 + $0x2f0] sm:$0xff] }
 0x222   :  { %1635 = vperm.xlu2 %6467, %v5559_v51  }
 0x223   :  { %v881_v58 = vsel %vm871_vm6, %v858_v48, %v859_v52  ;;  %v718_v22 = vmax.f32 %v629_v14, 0.0 }
 0x224   :  { %v925_v62 = vmax.f32 %v826_v44, %v881_v58 }
 0x225   :  { %v788_v2 = vmul.f32 %v6966_v39, %v718_v22  ;;  %v7245_v8 = vpop.permute.xlu1 %1484 }
 0x226   :  { %v7175_v1 = vpack.c.bf16 %v925_v62, %v924_v61  ;;  %10358 = vst [vmem:[#allocation18_spill] sm:$0xff] %v7245_v8 }
 0x227   :  { %v828_v35 = vmax.f32 %v786_v29, %v788_v2 }
 0x228   :  { %v631_v11 = vpop.f32.mrf.mxu2 }
 0x229   :  { %1784 = vperm.xlu0 %6465, %v5579_v17   ;;  %1924 = vperm.xlu1 %6466, %v5594_v21   ;;  %v632_v26 = vadd.f32 %v6737_v42, %v631_v11  ;;  %v860_v43 = vrot.slane %v828_v35, 1  ;;  %v5599_v11 = vld [vmem:[%s10345_s11 + $0x2f8] sm:$0xff]  ;;  %v5617_v17 = vld [vmem:[%s10345_s11 + $0x388] sm:$0xff]  ;;  %v5600_v21 = vld [vmem:[%s10345_s11 + $0x300] sm:$0xff] }
 0x22b   :  { %v719_v33 = vmax.f32 %v632_v26, 0.0  ;;  %v880_v55 = vsel %vm871_vm6, %v859_v52, %v860_v43  ;;  %v1300_v52 = vld [vmem:[%s10345_s11 + $0x40] sm:$0xff] }
 0x22c   :  { %v926_v58 = vmax.f32 %v7151_v49, %v880_v55  ;;  %v7253_v49 = vpop.permute.xlu0 %1479  ;;  %1350 = vperm.xlu2 %6467, %v1300_v52  }
 0x22d   :  { %v789_v38 = vmul.f32 %v6966_v39, %v719_v33  ;;  %10359 = vst [vmem:[#allocation19_spill] sm:$0xff] %v7253_v49  ;;  %v7266_v26 = vpop.permute.xlu1 %1640  ;;  %v5633_v33 = vld [vmem:[%s10345_s11 + $0x408] sm:$0xff] }
 0x230   :  { %v633_v47 = vpop.f32.mrf.mxu2 }
 0x231   :  { %1789 = vperm.xlu0 %6465, %v5580_v28   ;;  %1794 = vperm.xlu1 %6466, %v5581_v32   ;;  %v634_v18 = vadd.f32 %v6737_v42, %v633_v47  ;;  %v7274_v47 = vld [vmem:[%s10343_s5] ss:$0 sm:$0xff] }
 0x233   :  { %v720_v2 = vmax.f32 %v634_v18, 0.0 }
 0x234   :  { %1645 = vperm.xlu2 %6467, %v5561_v20   ;;  %v7268_v28 = vpop.permute.xlu0 %1355 }
 0x235   :  { %10360 = vst [vmem:[#allocation20_spill] sm:$0xff] %v7268_v28  ;;  %v790_v32 = vmul.f32 %v6966_v39, %v720_v2  ;;  %v7291_v51 = vpop.permute.xlu1 %1494 }
 0x238   :  { %v636_v10 = vpop.f32.mrf.mxu2 }
 0x239   :  { %v637_v34 = vadd.f32 %v6737_v42, %v636_v10  ;;  %1939 = vperm.xlu0 %6465, %v5597_v9   ;;  %1799 = vperm.xlu1 %6466, %v5582_v54   ;;  %v1302_v10 = vld [vmem:[%s10345_s11 + $0x50] sm:$0xff] }
 0x23b   :  { %v721_v5 = vmax.f32 %v637_v34, 0.0 }
 0x23c   :  { %1360 = vperm.xlu2 %6467, %v1302_v10   ;;  %v7293_v55 = vpop.permute.xlu0 %1489 }
 0x23d   :  { %v791_v40 = vmul.f32 %v6966_v39, %v721_v5 }
 0x23f   :  { %v7217_v44 = vmax.f32 %v789_v38, %v791_v40 }
 0x240   :  { %v638_v48 = vpop.f32.mrf.mxu2 }
 0x241   :  { %v861_v50 = vrot.slane %v7217_v44, 1  ;;  %1944 = vperm.xlu0 %6465, %v5598_v63   ;;  %1949 = vperm.xlu1 %6466, %v5599_v11   ;;  %v639_v14 = vadd.f32 %v6737_v42, %v638_v48  ;;  %v5563_v11 = vld [vmem:[%s10345_s11 + $0x158] sm:$0xff] }
 0x243   :  { %v879_v56 = vsel %vm871_vm6, %v860_v43, %v861_v50  ;;  %v722_v24 = vmax.f32 %v639_v14, 0.0  ;;  %v5602_v14 = vld [vmem:[%s10345_s11 + $0x310] sm:$0xff] }
 0x244   :  { %v927_v61 = vmax.f32 %v828_v35, %v879_v56  ;;  %1655 = vperm.xlu2 %6467, %v5563_v11   ;;  %v7326_v10 = vpop.permute.xlu0 %1365  ;;  %v5637_v11 = vld [vmem:[%s10345_s11 + $0x428] sm:$0xff] }
 0x245   :  { %v792_v42 = vmul.f32 %v6966_v39, %v722_v24  ;;  %10362 = vst [vmem:[#allocation22_spill] sm:$0xff] %v7326_v10 }
 0x246   :  { %v7240_v62 = vpack.c.bf16 %v927_v61, %v926_v58  ;;  %v5619_v58 = vld [vmem:[%s10345_s11 + $0x398] sm:$0xff] }
 0x247   :  { %v830_v38 = vmax.f32 %v790_v32, %v792_v42  ;;  %v7317_v42 = vpop.permute.xlu2 %1600  ;;  %v7321_v32 = vpop.permute.xlu1 %1650 }
 0x248   :  { %v641_v3 = vpop.f32.mrf.mxu2  ;;  %10361 = vst [vmem:[#allocation21_spill] sm:$0xff] %v7317_v42 }
 0x249   :  { %2137 = vperm.xlu0 %6465, %v5617_v17   ;;  %2003 = vperm.xlu1 %6466, %v5600_v21   ;;  %v642_v29 = vadd.f32 %v7274_v47, %v641_v3  ;;  %v862_v54 = vrot.slane %v830_v38, 1 }
 0x24b   :  { %v723_v35 = vmax.f32 %v642_v29, 0.0  ;;  %v878_v17 = vsel %vm871_vm6, %v861_v50, %v862_v54  ;;  %v5634_v50 = vld [vmem:[%s10345_s11 + $0x410] sm:$0xff] }
 0x24c   :  { %v928_v21 = vmax.f32 %v7217_v44, %v878_v17 }
 0x24d   :  { %v793_v43 = vmul.f32 %v6966_v39, %v723_v35  ;;  %v5635_v35 = vld [vmem:[%s10345_s11 + $0x418] sm:$0xff] }
 0x250   :  { %v643_v22 = vpop.f32.mrf.mxu2 }
 0x251   :  { %2261 = vperm.xlu0 %6465, %v5632_v30   ;;  %2266 = vperm.xlu1 %6466, %v5633_v33   ;;  %v644_v9 = vadd.f32 %v7274_v47, %v643_v22 }
 0x253   :  { %v724_v63 = vmax.f32 %v644_v9, 0.0  ;;  %v5565_v9 = vld [vmem:[%s10345_s11 + $0x168] sm:$0xff] }
 0x255   :  { %v794_v24 = vmul.f32 %v6966_v39, %v724_v63 }
 0x258   :  { %v646_v34 = vpop.f32.mrf.mxu2 }
 0x259   :  { %v647_v5 = vadd.f32 %v7274_v47, %v646_v34  ;;  %2147 = vperm.xlu0 %6465, %v5619_v58   ;;  %2013 = vperm.xlu1 %6466, %v5602_v14   ;;  %v1304_v34 = vld [vmem:[%s10345_s11 + $0x60] sm:$0xff]  ;;  %v7350_v58 = vpop.permute.xlu1 %1504 }
 0x25a   :  { %1370 = vperm.xlu2 %6467, %v1304_v34   ;;  %10363 = vst [vmem:[#allocation23_spill] sm:$0xff] %v7350_v58  ;;  %v5623_v34 = vld [vmem:[%s10345_s11 + $0x3b8] sm:$0xff] }
 0x25b   :  { %v725_v40 = vmax.f32 %v647_v5, 0.0 }
 0x25d   :  { %v795_v48 = vmul.f32 %v6966_v39, %v725_v40  ;;  %v7337_v40 = vpop.permute.xlu2 %1605 }
 0x25f   :  { %v7295_v56 = vmax.f32 %v793_v43, %v795_v48  ;;  %v5621_v43 = vld [vmem:[%s10345_s11 + $0x3a8] sm:$0xff]  ;;  %v5604_v48 = vld [vmem:[%s10345_s11 + $0x320] sm:$0xff] }
 0x260   :  { %v648_v61 = vpop.f32.mrf.mxu2 }
 0x261   :  { %v863_v3 = vrot.slane %v7295_v56, 1  ;;  %v649_v52 = vadd.f32 %v7274_v47, %v648_v61  ;;  %2271 = vperm.xlu0 %6465, %v5634_v50   ;;  %2276 = vperm.xlu1 %6466, %v5635_v35  }
 0x262   :  { %1665 = vperm.xlu2 %6467, %v5565_v9   ;;  %v5606_v9 = vld [vmem:[%s10345_s11 + $0x330] sm:$0xff] }
 0x263   :  { %v726_v18 = vmax.f32 %v649_v52, 0.0  ;;  %v877_v20 = vsel %vm871_vm6, %v862_v54, %v863_v3  ;;  %v1306_v52 = vld [vmem:[%s10345_s11 + $0x70] sm:$0xff] }
 0x264   :  { %v929_v22 = vmax.f32 %v830_v38, %v877_v20  ;;  %v7367_v20 = vpop.permute.xlu1 %1660 }
 0x265   :  { %v796_v2 = vmul.f32 %v6966_v39, %v726_v18  ;;  %v7355_v63 = vpop.permute.xlu2 %1320  ;;  %10365 = vst [vmem:[#allocation25_spill] sm:$0xff] %v7367_v20 }
 0x266   :  { %v7319_v29 = vpack.c.bf16 %v929_v22, %v928_v21 }
 0x267   :  { %v832_v30 = vmax.f32 %v794_v24, %v796_v2 }
 0x268   :  { %v651_v33 = vpop.f32.mrf.mxu2 }
 0x269   :  { %v864_v44 = vrot.slane %v832_v30, 1  ;;  %2157 = vperm.xlu0 %6465, %v5621_v43   ;;  %2023 = vperm.xlu1 %6466, %v5604_v48   ;;  %v652_v61 = vadd.f32 %v7274_v47, %v651_v33  ;;  %v5567_v43 = vld [vmem:[%s10345_s11 + $0x178] sm:$0xff] }
 0x26a   :  { %1380 = vperm.xlu2 %6467, %v1306_v52  }
 0x26b   :  { %v876_v5 = vsel %vm871_vm6, %v863_v3, %v864_v44  ;;  %v5636_v3 = vld [vmem:[%s10345_s11 + $0x420] sm:$0xff]  ;;  %v727_v17 = vmax.f32 %v652_v61, 0.0 }
 0x26c   :  { %v930_v38 = vmax.f32 %v7295_v56, %v876_v5  ;;  %v7352_v56 = vpop.permute.xlu0 %1499 }
 0x26d   :  { %10364 = vst [vmem:[#allocation24_spill] sm:$0xff] %v7352_v56  ;;  %v797_v24 = vmul.f32 %v6966_v39, %v727_v17  ;;  %v7373_v50 = vpop.permute.xlu2 %1615  ;;  %v5638_v17 = vld [vmem:[%s10345_s11 + $0x430] sm:$0xff] }
 0x26e   :  { %10367 = vst [vmem:[#allocation27_spill] sm:$0xff] %v7373_v50 }
 0x270   :  { %v7348_v54 = vpop.f32.mrf.mxu2 }
 0x271   :  { %2281 = vperm.xlu0 %6465, %v5636_v3   ;;  %2286 = vperm.xlu1 %6466, %v5637_v11   ;;  %v7391_v3 = vpop.permute.xlu1 %1514  ;;  %v654_v46 = vadd.f32 %v7274_v47, %v7348_v54  ;;  %v5610_v54 = vld [vmem:[%s10345_s11 + $0x350] sm:$0xff] }
 0x272   :  { %1675 = vperm.xlu2 %6467, %v5567_v43   ;;  %10368 = vst [vmem:[#allocation28_spill] sm:$0xff] %v7391_v3 }
 0x274   :  { %v7369_v22 = vpop.permute.xlu0 %1375 }
 0x275   :  { %10366 = vst [vmem:[#allocation26_spill] sm:$0xff] %v7369_v22  ;;  %v7393_v52 = vpop.permute.xlu2 %1330 }
 0x276   :  { %10369 = vst [vmem:[#allocation29_spill] sm:$0xff] %v7393_v52 }
 0x278   :  { %v656_v14 = vpop.f32.mrf.mxu2 }
 0x279   :  { %v657_v18 = vadd.f32 %v7274_v47, %v656_v14  ;;  %2167 = vperm.xlu0 %6465, %v5623_v34   ;;  %2033 = vperm.xlu1 %6466, %v5606_v9   ;;  %v5608_v34 = vld [vmem:[%s10345_s11 + $0x340] sm:$0xff] }
 0x27b   :  { %v729_v21 = vmax.f32 %v657_v18, 0.0 }
 0x27c   :  { %v7395_v11 = vpop.permute.xlu0 %1509 }
 0x27d   :  { %v799_v2 = vmul.f32 %v6966_v39, %v729_v21  ;;  %10370 = vst [vmem:[#allocation30_spill] sm:$0xff] %v7395_v11  ;;  %v5584_v21 = vld [vmem:[%s10345_s11 + $0x280] sm:$0xff] }
 0x27e   :  { %1874 = vperm.xlu2 %6467, %v5584_v21   ;;  %v5641_v21 = vld [vmem:[%s10345_s11 + $0x448] sm:$0xff] }
 0x27f   :  { %v7375_v33 = vmax.f32 %v797_v24, %v799_v2  ;;  %v7413_v24 = vpop.permute.xlu1 %1670  ;;  %v5571_v2 = vld [vmem:[%s10345_s11 + $0x198] sm:$0xff] }
 0x280   :  { %v658_v35 = vpop.f32.mrf.mxu2  ;;  %10372 = vst [vmem:[#allocation32_spill] sm:$0xff] %v7413_v24 }
 0x281   :  { %v10232_v5 = vrot.slane %v7375_v33, 1  ;;  %2291 = vperm.xlu0 %6465, %v5638_v17   ;;  %v5572_v17 = vld [vmem:[%s10345_s11 + $0x1a0] sm:$0xff] }
 0x283   :  { %v875_v48 = vsel %vm871_vm6, %v864_v44, %v10232_v5  ;;  %v7408_v44 = vpop.permute.xlu2 %1625 }
 0x284   :  { %v931_v61 = vmax.f32 %v832_v30, %v875_v48  ;;  %v5639_v30 = vld [vmem:[%s10345_s11 + $0x438] sm:$0xff]  ;;  %10371 = vst [vmem:[#allocation31_spill] sm:$0xff] %v7408_v44  ;;  %v7421_v43 = vpop.permute.xlu0 %1385 }
 0x285   :  { %2296 = vperm.xlu1 %6466, %v5639_v30   ;;  %10373 = vst [vmem:[#allocation33_spill] sm:$0xff] %v7421_v43  ;;  %v659_v30 = vadd.f32 %v7274_v47, %v658_v35 }
 0x286   :  { %v7397_v14 = vpack.c.bf16 %v931_v61, %v930_v38  ;;  %v5625_v38 = vld [vmem:[%s10345_s11 + $0x3c8] sm:$0xff]  ;;  %1744 = vperm.xlu2 %6467, %v5571_v2   ;;  %v5640_v61 = vld [vmem:[%s10345_s11 + $0x440] sm:$0xff] }
 0x287   :  { %v7436_v2 = vpop.permute.xlu1 %1734  ;;  %v730_v22 = vmax.f32 %v659_v30, 0.0  ;;  %v5472_v30 = vld [vmem:[%s10377_s30] sm:$0xf] }
 0x288   :  { %v661_v18 = vpop.f32.mrf.mxu2 }
 0x289   :  { %2177 = vperm.xlu0 %6465, %v5625_v38   ;;  %v662_v38 = vadd.f32 %v7274_v47, %v661_v18  ;;  %v5627_v18 = vld [vmem:[%s10345_s11 + $0x3d8] sm:$0xff] }
 0x28b   :  { %v7423_v48 = vpop.permute.xlu2 %1340  ;;  %v731_v10 = vmax.f32 %v662_v38, 0.0 }
 0x28c   :  { %10374 = vst [vmem:[#allocation34_spill] sm:$0xff] %v7423_v48  ;;  %v7439_v5 = vpop.permute.xlu0 %1729 }
 0x28d   :  { %2043 = vperm.xlu1 %6466, %v5608_v34   ;;  %10375 = vst [vmem:[#allocation35_spill] sm:$0xff] %v7439_v5 }
 0x28e   :  { %1749 = vperm.xlu2 %6467, %v5572_v17   ;;  %v5589_v17 = vld [vmem:[%s10345_s11 + $0x2a8] sm:$0xff] }
 0x28f   :  { %v7466_v12 = vpop.permute.xlu1 %1739 }
 0x290   :  { %v663_v9 = vpop.f32.mrf.mxu2  ;;  %10378 = vst [vmem:[#allocation37_spill] sm:$0xff] %v7466_v12  ;;  %v6306_v12 = vld [vmem:[%s10377_s30 + $0x44] sm:$0xf] }
 0x291   :  { %2301 = vperm.xlu0 %6465, %v5640_v61   ;;  %v664_v35 = vadd.f32 %v7274_v47, %v663_v9  ;;  %v728_v61 = vmax.f32 %v654_v46, 0.0  ;;  %v6299_v46 = vld [vmem:[%s10377_s30 + $0x4] sm:$0xf0] }
 0x292   :  { %v5473_v48 = vor.u32 %v6299_v46, %v5472_v30 }
 0x293   :  { %v7444_v28 = vpop.permute.xlu2 %1635  ;;  %v732_v38 = vmax.f32 %v664_v35, 0.0 }
 0x294   :  { %10376 = vst [vmem:[#allocation36_spill] sm:$0xff] %v7444_v28  ;;  %1056 = vmatmul.bf16.vlgmr.msra.gmra.mxu3 %v5473_v48  ;;  %v7468_v4 = vpop.permute.xlu0 %1879  ;;  %v5643_v48 = vld [vmem:[%s10345_s11 + $0x458] sm:$0xff] }
 0x295   :  { %2306 = vperm.xlu1 %6466, %v5641_v21   ;;  %v800_v21 = vmul.f32 %v6966_v39, %v730_v22  ;;  %v798_v22 = vmul.f32 %v6966_v39, %v728_v61  ;;  %v802_v8 = vmul.f32 %v6966_v39, %v732_v38  ;;  %v10381_v38 = vrot.slane %v7375_v33, 1 }
 0x296   :  { %1899 = vperm.xlu2 %6467, %v5589_v17  }
 0x297   :  { %v834_v49 = vmax.f32 %v798_v22, %v800_v21 }
 0x298   :  { %v666_v6 = vpop.f32.mrf.mxu2 }
 0x299   :  { %v667_v34 = vadd.f32 %v7274_v47, %v666_v6  ;;  %2187 = vperm.xlu0 %6465, %v5627_v18  }
 0x29b   :  { %v733_v43 = vmax.f32 %v667_v34, 0.0  ;;  %v7472_v35 = vpop.permute.xlu2 %1350 }
 0x29c   :  { %10379 = vst [vmem:[#allocation38_spill] sm:$0xff] %v7472_v35 }
 0x29d   :  { %v803_v6 = vmul.f32 %v6966_v39, %v733_v43  ;;  %v801_v43 = vmul.f32 %v6966_v39, %v731_v10  ;;  %2053 = vperm.xlu1 %6466, %v5610_v54   ;;  %v866_v54 = vrot.slane %v834_v49, 1 }
 0x29f   :  { %v835_v18 = vmax.f32 %v801_v43, %v803_v6  ;;  %v5590_v6 = vld [vmem:[%s10345_s11 + $0x2b0] sm:$0xff]  ;;  %v7491_v43 = vpop.permute.xlu1 %1889 }
 0x2a0   :  { %v668_v9 = vpop.f32.mrf.mxu2  ;;  %1904 = vperm.xlu2 %6467, %v5590_v6  }
 0x2a1   :  { %v669_v34 = vadd.f32 %v7274_v47, %v668_v9  ;;  %v5642_v47 = vld [vmem:[%s10345_s11 + $0x450] sm:$0xff]  ;;  %v867_v17 = vrot.slane %v835_v18, 1 }
 0x2a2   :  { %2311 = vperm.xlu0 %6465, %v5642_v47  }
 0x2a3   :  { %v734_v52 = vmax.f32 %v669_v34, 0.0  ;;  %v873_v9 = vsel %vm871_vm6, %v866_v54, %v867_v17  ;;  %v874_v34 = vsel %vm871_vm6, %v10381_v38, %v866_v54  ;;  %v7497_v22 = vpop.permute.xlu2 %1645  ;;  %v5631_v38 = vld [vmem:[%s10345_s11 + $0x3f8] sm:$0xff] }
 0x2a4   :  { %v933_v6 = vmax.f32 %v834_v49, %v873_v9  ;;  %v932_v54 = vmax.f32 %v7375_v33, %v874_v34  ;;  %v5578_v9 = vld [vmem:[%s10345_s11 + $0x1d0] sm:$0xff]  ;;  %v5645_v33 = vld [vmem:[%s10345_s11 + $0x468] sm:$0xff]  ;;  %v5595_v34 = vld [vmem:[%s10345_s11 + $0x2d8] sm:$0xff] }
 0x2a5   :  { %v804_v10 = vmul.f32 %v6966_v39, %v734_v52  ;;  %2316 = vperm.xlu1 %6466, %v5643_v48   ;;  %v10380_v52 = vrot.slane %v6782_v31, 1  ;;  %v5629_v31 = vld [vmem:[%s10345_s11 + $0x3e8] sm:$0xff]  ;;  %v6301_v48 = vld [vmem:[%s10377_s30 + $0x14] sm:$0xf0] }
 0x2a7   :  { %v836_v61 = vmax.f32 %v802_v8, %v804_v10  ;;  %v7502_v10 = vpop.permute.xlu0 %1884 }
 0x2a9   :  { %v868_v21 = vrot.slane %v836_v61, 1 }
 0x2aa   :  { %2197 = vperm.xlu0 %6465, %v5629_v31   ;;  %v5614_v31 = vld [vmem:[%s10345_s11 + $0x370] sm:$0xff] }
 0x2ab   :  { %v872_v39 = vsel %vm871_vm6, %v867_v17, %v868_v21  ;;  %v903_v8 = vsel %vm871_vm6, %v868_v21, %v10380_v52  ;;  %v5612_v17 = vld [vmem:[%s10345_s11 + $0x360] sm:$0xff]  ;;  %v966_v21 = vpack.c.bf16 %v933_v6, %v932_v54 }
 0x2ac   :  { %v934_v30 = vmax.f32 %v835_v18, %v872_v39  ;;  %v935_v46 = vmax.f32 %v836_v61, %v903_v8  ;;  %v5577_v18 = vld [vmem:[%s10345_s11 + $0x1c8] sm:$0xff]  ;;  %v5480_v61 = vld [vmem:[%s10377_s30 + $0x10] sm:$0xf]  ;;  %v7517_v39 = vpop.permute.xlu2 %1360  ;;  %v5644_v52 = vld [vmem:[%s10345_s11 + $0x460] sm:$0xff]  ;;  %v7522_v8 = vpop.permute.xlu1 %1894 }
 0x2ad   :  { %v5481_v49 = vor.u32 %v6301_v48, %v5480_v61  ;;  %1774 = vperm.xlu2 %6467, %v5577_v18   ;;  %2063 = vperm.xlu1 %6466, %v5612_v17   ;;  %10382 = vst [vmem:[#allocation39_spill] sm:$0xff] %v7517_v39  ;;  %v5596_v61 = vld [vmem:[%s10345_s11 + $0x2e0] sm:$0xff] }
 0x2ae   :  { %v967_v47 = vpack.c.bf16 %v935_v46, %v934_v30  ;;  %v6298_v48 = vld [vmem:[%s10377_s30 + $0x4] sm:$0xf] }
 0x2af   :  { %1061 = vmatmul.bf16.gmra.mxu3 %v5481_v49  ;;  %v7530_v30 = vpop.permute.xlu0 %1754 }
 0x2b0   :  { %1097 = vmatpush.bf16.msrb.mxu0 %v967_v47  ;;  %10383 = vst [vmem:[#allocation40_spill] sm:$0xff] %v7530_v30 }
 0x2b2   :  { %2321 = vperm.xlu0 %6465, %v5644_v52  }
 0x2b4   :  { %1098 = vmatpush.bf16.msrb.mxu0 %v966_v21  ;;  %v7534_v46 = vpop.permute.xlu2 %1655  ;;  %v7552_v6 = vpop.permute.xlu1 %1764 }
 0x2b5   :  { %1779 = vperm.xlu2 %6467, %v5578_v9   ;;  %2326 = vperm.xlu1 %6466, %v5645_v33   ;;  %10384 = vst [vmem:[#allocation41_spill] sm:$0xff] %v7552_v6  ;;  %v5496_v9 = vld [vmem:[%s10377_s30 + $0x30] sm:$0xf]  ;;  %v6305_v33 = vld [vmem:[%s10377_s30 + $0x34] sm:$0xf0] }
 0x2b6   :  { %v5520_v6 = vld [vmem:[%s10377_s30 + $0x60] sm:$0xf] }
 0x2b7   :  { %v7554_v18 = vpop.permute.xlu0 %1759 }
 0x2b8   :  { %1099 = vmatpush.bf16.msrb.mxu0 %v7397_v14  ;;  %v5488_v14 = vld [vmem:[%s10377_s30 + $0x20] sm:$0xf]  ;;  %10385 = vst [vmem:[#allocation42_spill] sm:$0xff] %v7554_v18  ;;  %v5605_v18 = vld [vmem:[%s10345_s11 + $0x328] sm:$0xff] }
 0x2ba   :  { %2207 = vperm.xlu0 %6465, %v5631_v38   ;;  %v5497_v38 = vor.u32 %v6305_v33, %v5496_v9 }
 0x2bc   :  { %1100 = vmatpush.bf16.msrb.mxu0 %v7319_v29  ;;  %v6303_v29 = vld [vmem:[%s10377_s30 + $0x24] sm:$0xf0]  ;;  %v7557_v17 = vpop.permute.xlu2 %1370  ;;  %v7572_v54 = vpop.permute.xlu1 %1769 }
 0x2bd   :  { %v5489_v47 = vor.u32 %v6303_v29, %v5488_v14  ;;  %1929 = vperm.xlu2 %6467, %v5595_v34   ;;  %2073 = vperm.xlu1 %6466, %v5614_v31   ;;  %10386 = vst [vmem:[#allocation43_spill] sm:$0xff] %v7557_v17  ;;  %v5616_v14 = vld [vmem:[%s10345_s11 + $0x380] sm:$0xff]  ;;  %v6300_v29 = vld [vmem:[%s10377_s30 + $0x14] sm:$0xf] }
 0x2be   :  { %10387 = vst [vmem:[#allocation44_spill] sm:$0xff] %v7572_v54  ;;  %v6309_v54 = vld [vmem:[%s10377_s30 + $0x54] sm:$0xf0] }
 0x2bf   :  { %1066 = vmatmul.bf16.gmra.mxu3 %v5489_v47  ;;  %v7574_v21 = vpop.permute.xlu0 %1909  ;;  %v5482_v47 = vld [vmem:[%s10377_s30 + $0x18] sm:$0xf0] }
 0x2c0   :  { %1101 = vmatpush.bf16.msrb.mxu0 %v7240_v62  ;;  %v5647_v62 = vld [vmem:[%s10345_s11 + $0x478] sm:$0xff] }
 0x2c4   :  { %1102 = vmatpush.bf16.msrb.mxu0 %v7175_v1  ;;  %v5474_v1 = vld [vmem:[%s10377_s30 + $0x8] sm:$0xf0]  ;;  %v7577_v52 = vpop.permute.xlu2 %1665  ;;  %v7588_v34 = vpop.permute.xlu1 %1919 }
 0x2c5   :  { %1934 = vperm.xlu2 %6467, %v5596_v61   ;;  %2336 = vperm.xlu1 %6466, %v5647_v62   ;;  %v5477_v49 = vor.u32 %v6298_v48, %v5474_v1  ;;  %10388 = vst [vmem:[#allocation45_spill] sm:$0xff] %v7577_v52  ;;  %v5485_v61 = vor.u32 %v6300_v29, %v5482_v47  ;;  %v5601_v1 = vld [vmem:[%s10345_s11 + $0x308] sm:$0xff]  ;;  %v6302_v29 = vld [vmem:[%s10377_s30 + $0x24] sm:$0xf] }
 0x2c6   :  { %v5490_v47 = vld [vmem:[%s10377_s30 + $0x28] sm:$0xf0] }
 0x2c7   :  { %v7592_v31 = vpop.permute.xlu0 %1914 }
 0x2c8   :  { %1103 = vmatpush.bf16.msrb.mxu0 %v7108_v19  ;;  %v5583_v19 = vld [vmem:[%s10345_s11 + $0x1f8] sm:$0xff] }
 0x2cc   :  { %1104 = vmatpush.bf16.msrb.mxu0 %v7051_v41  ;;  %v7590_v41 = vpop.permute.xlu2 %1380  ;;  %v7605_v48 = vpop.permute.xlu1 %1924 }
 0x2cd   :  { %1804 = vperm.xlu2 %6467, %v5583_v19   ;;  %10389 = vst [vmem:[#allocation46_spill] sm:$0xff] %v7590_v41  ;;  %v6307_v19 = vld [vmem:[%s10377_s30 + $0x44] sm:$0xf0]  ;;  %v6313_v41 = vld [vmem:[%s10377_s30 + $0x74] sm:$0xf0] }
 0x2ce   :  { %10391 = vst [vmem:[#allocation48_spill] sm:$0xff] %v7605_v48 }
 0x2cf   :  { %1105 = vmatmul.bf16.vlgmr.msrb.gmra.mxu0 %v5477_v49  ;;  %1071 = vmatmul.bf16.gmra.mxu3 %v5497_v38  ;;  %v5504_v49 = vld [vmem:[%s10377_s30 + $0x40] sm:$0xf]  ;;  %v7616_v9 = vpop.permute.xlu0 %1784 }
 0x2d0   :  { %10392 = vst [vmem:[#allocation49_spill] sm:$0xff] %v7616_v9  ;;  %v5505_v33 = vor.u32 %v6307_v19, %v5504_v49  ;;  %v5603_v19 = vld [vmem:[%s10345_s11 + $0x318] sm:$0xff] }
 0x2d4   :  { %v7603_v62 = vpop.permute.xlu2 %1675 }
 0x2d5   :  { %2132 = vperm.xlu2 %6467, %v5616_v14   ;;  %10390 = vst [vmem:[#allocation47_spill] sm:$0xff] %v7603_v62  ;;  %v5618_v14 = vld [vmem:[%s10345_s11 + $0x390] sm:$0xff] }
 0x2d7   :  { %v7631_v9 = vpop.permute.xlu0 %1789 }
 0x2d8   :  { %10394 = vst [vmem:[#allocation51_spill] sm:$0xff] %v7631_v9 }
 0x2dc   :  { %v7618_v38 = vpop.permute.xlu2 %1874 }
 0x2dd   :  { %2008 = vperm.xlu2 %6467, %v5601_v1   ;;  %v5493_v1 = vor.u32 %v6302_v29, %v5490_v47  ;;  %v5620_v47 = vld [vmem:[%s10345_s11 + $0x3a0] sm:$0xff] }
 0x2df   :  { %1110 = vmatmul.bf16.gmra.mxu0 %v5485_v61  ;;  %1076 = vmatmul.bf16.gmra.mxu3 %v5505_v33  ;;  %v7629_v61 = vpop.permute.xlu1 %1794  ;;  %v5512_v33 = vld [vmem:[%s10377_s30 + $0x50] sm:$0xf] }
 0x2e0   :  { %10393 = vst [vmem:[#allocation50_spill] sm:$0xff] %v7629_v61  ;;  %v5513_v61 = vor.u32 %v6309_v54, %v5512_v33  ;;  %v5498_v54 = vld [vmem:[%s10377_s30 + $0x38] sm:$0xf0] }
 0x2e4   :  { %v7633_v49 = vpop.permute.xlu2 %1744 }
 0x2e5   :  { %2142 = vperm.xlu2 %6467, %v5618_v14   ;;  %10395 = vst [vmem:[#allocation52_spill] sm:$0xff] %v7633_v49  ;;  %v7646_v14 = vpop.permute.xlu0 %1939  ;;  %v5528_v49 = vld [vmem:[%s10377_s30 + $0x70] sm:$0xf] }
 0x2e6   :  { %10397 = vst [vmem:[#allocation54_spill] sm:$0xff] %v7646_v14  ;;  %v5529_v17 = vor.u32 %v6313_v41, %v5528_v49  ;;  %v5514_v41 = vld [vmem:[%s10377_s30 + $0x58] sm:$0xf0] }
 0x2e7   :  { %v7644_v9 = vpop.permute.xlu1 %1799 }
 0x2e8   :  { %10396 = vst [vmem:[#allocation53_spill] sm:$0xff] %v7644_v9 }
 0x2ec   :  { %v7648_v29 = vpop.permute.xlu2 %1749 }
 0x2ed   :  { %2018 = vperm.xlu2 %6467, %v5603_v19   ;;  %10398 = vst [vmem:[#allocation55_spill] sm:$0xff] %v7648_v29  ;;  %v7663_v9 = vpop.permute.xlu0 %1944 }
 0x2ee   :  { %10400 = vst [vmem:[#allocation57_spill] sm:$0xff] %v7663_v9  ;;  %v5613_v9 = vld [vmem:[%s10345_s11 + $0x368] sm:$0xff] }
 0x2ef   :  { %1115 = vmatmul.bf16.gmra.mxu0 %v5493_v1  ;;  %1081 = vmatmul.bf16.gmra.mxu3 %v5513_v61  ;;  %v6304_v1 = vld [vmem:[%s10377_s30 + $0x34] sm:$0xf]  ;;  %v7659_v33 = vpop.permute.xlu1 %1949 }
 0x2f0   :  { %v5501_v19 = vor.u32 %v6304_v1, %v5498_v54  ;;  %10399 = vst [vmem:[#allocation56_spill] sm:$0xff] %v7659_v33 }
 0x2f4   :  { %v7661_v61 = vpop.permute.xlu2 %1899 }
 0x2f5   :  { %2152 = vperm.xlu2 %6467, %v5620_v47   ;;  %v6311_v47 = vld [vmem:[%s10377_s30 + $0x64] sm:$0xf0]  ;;  %v7681_v30 = vpop.permute.xlu0 %2137 }
 0x2f6   :  { %v5521_v1 = vor.u32 %v6311_v47, %v5520_v6  ;;  %v5506_v6 = vld [vmem:[%s10377_s30 + $0x48] sm:$0xf0] }
 0x2f7   :  { %v7676_v29 = vpop.permute.xlu1 %2003 }
 0x2fc   :  { %v7674_v54 = vpop.permute.xlu2 %1904 }
 0x2fd   :  { %2028 = vperm.xlu2 %6467, %v5605_v18   ;;  %v5509_v18 = vor.u32 %v6306_v12, %v5506_v6  ;;  %v5624_v6 = vld [vmem:[%s10345_s11 + $0x3c0] sm:$0xff] }
 0x2ff   :  { %1120 = vmatmul.bf16.gmra.mxu0 %v5501_v19  ;;  %1086 = vmatmul.bf16.gmra.mxu3 %v5521_v1  ;;  %v5622_v19 = vld [vmem:[%s10345_s11 + $0x3b0] sm:$0xff]  ;;  %v5607_v1 = vld [vmem:[%s10345_s11 + $0x338] sm:$0xff]  ;;  %v7700_v39 = vpop.permute.xlu1 %2266 }
 0x305   :  { %2162 = vperm.xlu2 %6467, %v5622_v19   ;;  %v7702_v19 = vpop.permute.xlu0 %2261 }
 0x307   :  { %v7689_v47 = vpop.permute.xlu2 %1774  ;;  %v7715_v49 = vpop.permute.xlu1 %2013 }
 0x308   :  { %10401 = vst [vmem:[#allocation58_spill] sm:$0xff] %v7689_v47 }
 0x309   :  { %10403 = vst [vmem:[#allocation60_spill] sm:$0xff] %v7715_v49 }
 0x30d   :  { %2038 = vperm.xlu2 %6467, %v5607_v1   ;;  %v7717_v1 = vpop.permute.xlu0 %2147 }
 0x30f   :  { %1125 = vmatmul.bf16.gmra.mxu0 %v5509_v18  ;;  %1091 = vmatmul.bf16.gmra.mxu3 %v5529_v17  ;;  %v7704_v12 = vpop.permute.xlu2 %1779  ;;  %v6308_v18 = vld [vmem:[%s10377_s30 + $0x54] sm:$0xf]  ;;  %v7724_v35 = vpop.permute.xlu1 %2276 }
 0x310   :  { %10402 = vst [vmem:[#allocation59_spill] sm:$0xff] %v7704_v12  ;;  %v5517_v47 = vor.u32 %v6308_v18, %v5514_v41  ;;  %v5609_v12 = vld [vmem:[%s10345_s11 + $0x348] sm:$0xff]  ;;  %v6310_v18 = vld [vmem:[%s10377_s30 + $0x64] sm:$0xf] }
 0x315   :  { %2172 = vperm.xlu2 %6467, %v5624_v6   ;;  %v7728_v28 = vpop.permute.xlu0 %2271  ;;  %v5626_v6 = vld [vmem:[%s10345_s11 + $0x3d0] sm:$0xff] }
 0x317   :  { %v7719_v17 = vpop.permute.xlu2 %1929  ;;  %v1057_v49 = vpop.f32.mrf.mxu3 }
 0x318   :  { %10404 = vst [vmem:[#allocation61_spill] sm:$0xff] %v7719_v17  ;;  %v7741_v37 = vpop.permute.xlu1 %2023 }
 0x319   :  { %10407 = vst [vmem:[#allocation64_spill] sm:$0xff] %v7741_v37 }
 0x31d   :  { %2048 = vperm.xlu2 %6467, %v5609_v12   ;;  %v7743_v27 = vpop.permute.xlu0 %2157 }
 0x31f   :  { %1130 = vmatmul.bf16.gmra.mxu0 %v5517_v47  ;;  %v7726_v45 = vpop.permute.xlu2 %1934  ;;  %v5522_v47 = vld [vmem:[%s10377_s30 + $0x68] sm:$0xf0] }
 0x320   :  { %10405 = vst [vmem:[#allocation62_spill] sm:$0xff] %v7726_v45  ;;  %v5525_v12 = vor.u32 %v6310_v18, %v5522_v47  ;;  %v6312_v18 = vld [vmem:[%s10377_s30 + $0x74] sm:$0xf]  ;;  %v5530_v47 = vld [vmem:[%s10377_s30 + $0x78] sm:$0xf0]  ;;  %v7762_v37 = vpop.permute.xlu1 %2286 }
 0x321   :  { %v5533_v57 = vor.u32 %v6312_v18, %v5530_v47 }
 0x325   :  { %2182 = vperm.xlu2 %6467, %v5626_v6   ;;  %v5646_v6 = vld [vmem:[%s10345_s11 + $0x470] sm:$0xff] }
 0x326   :  { %2331 = vperm.xlu0 %6465, %v5646_v6  }
 0x327   :  { %v7739_v41 = vpop.permute.xlu2 %1804 }
 0x328   :  { %10406 = vst [vmem:[#allocation63_spill] sm:$0xff] %v7739_v41  ;;  %v7764_v41 = vpop.permute.xlu0 %2281  ;;  %v7769_v62 = vpop.permute.xlu1 %2033 }
 0x329   :  { %10408 = vst [vmem:[#allocation65_spill] sm:$0xff] %v7769_v62 }
 0x32d   :  { %2058 = vperm.xlu2 %6467, %v5611_v0   ;;  %v5628_v0 = vld [vmem:[%s10345_s11 + $0x3e0] sm:$0xff] }
 0x32f   :  { %1135 = vmatmul.bf16.gmra.mxu0 %v5525_v12  ;;  %v7748_v44 = vpop.permute.xlu2 %2132  ;;  %v1059_v12 = vpop.f32.mrf.mxu3 }
 0x330   :  { %v7771_v6 = vpop.permute.xlu0 %2167 }
 0x335   :  { %2192 = vperm.xlu2 %6467, %v5628_v0  }
 0x337   :  { %v2009_v53 = vpop.permute.xlu2 %2008  ;;  %v1062_v59 = vpop.f32.mrf.mxu3 }
 0x338   :  { %v7782_v33 = vpop.permute.xlu0 %2291 }
 0x33d   :  { %2068 = vperm.xlu2 %6467, %v5613_v9   ;;  %v5615_v9 = vld [vmem:[%s10345_s11 + $0x378] sm:$0xff] }
 0x33f   :  { %1140 = vmatmul.bf16.gmra.mxu0 %v5533_v57  ;;  %v7773_v5 = vpop.permute.xlu2 %2142  ;;  %v1064_v47 = vpop.f32.mrf.mxu3 }
 0x340   :  { %v7778_v57 = vpop.permute.xlu1 %2296 }
 0x345   :  { %2202 = vperm.xlu2 %6467, %v5630_v13  }
 0x347   :  { %v7784_v42 = vpop.permute.xlu2 %2018  ;;  %v7793_v50 = vpop.f32.mrf.mxu3 }
 0x348   :  { %10409 = vst [vmem:[#allocation66_spill] sm:$0xff] %v7784_v42  ;;  %v7795_v14 = vpop.permute.xlu1 %2043  ;;  %v7801_v42 = vpop.permute.xlu0 %2177 }
 0x349   :  { %10410 = vst [vmem:[#allocation67_spill] sm:$0xff] %v7795_v14 }
 0x34a   :  { %10411 = vst [vmem:[#allocation68_spill] sm:$0xff] %v7801_v42 }
 0x34c   :  { %v1106_v18 = vpop.f32.mrf.mxu0 }
 0x34d   :  { %v7780_v0 = vadd.f32 %v1106_v18, %v1057_v49  ;;  %2078 = vperm.xlu2 %6467, %v5615_v9  }
 0x34f   :  { %v1839_v13 = vpack.c.bf16 %v7780_v0, %v7780_v0  ;;  %v10234_v9 = vrot.slane %v7780_v0, 7  ;;  %v7810_v14 = vpop.permute.xlu2 %2152  ;;  %v7834_v58 = vpop.f32.mrf.mxu3 }
 0x351   :  { %v7806_v24 = vunpack.c.l.b16 %v1839_v13 }
 0x353   :  { %10412 = vst [vmem:[#allocation69_spill] sm:$0xff] %v7806_v24  ;;  %v7839_v24 = vpop.permute.xlu1 %2306 }
 0x354   :  { %v1108_v62 = vpop.f32.mrf.mxu0  ;;  %10414 = vst [vmem:[#allocation71_spill] sm:$0xff] %v7839_v24 }
 0x355   :  { %v7789_v60 = vadd.f32 %v1108_v62, %v1059_v12  ;;  %v10235_v12 = vrot.slane %v7780_v0, 1 }
 0x357   :  { %v1550_v49 = vrot.slane %v7789_v60, 1  ;;  %v1840_v18 = vpack.c.bf16 %v7789_v60, %v7789_v60  ;;  %v1260_v62 = vrot.slane %v7789_v60, 7  ;;  %v7862_v42 = vpop.permute.xlu2 %2028 }
 0x358   :  { %10419 = vst [vmem:[#allocation76_spill] sm:$0xff] %v7862_v42 }
 0x359   :  { %v7808_v3 = vunpack.c.l.b16 %v1840_v18  ;;  %v7816_v45 = vsel %vm1275_vm7, %v10234_v9, %v1260_v62  ;;  %v7822_v11 = vsel %vm871_vm6, %v10235_v12, %v1550_v49  ;;  %v1146_v18 = vadd.f32 %v7789_v60, %v7780_v0 }
 0x35a   :  { %v1952_v17 = vmul.f32 %v7618_v38, %v7822_v11  ;;  %v1390_v13 = vmul.f32 %v7355_v63, %v7816_v45  ;;  %v7847_v38 = vpop.permute.xlu0 %2301 }
 0x35b   :  { %10413 = vst [vmem:[#allocation70_spill] sm:$0xff] %v7808_v3 }
 0x35c   :  { %v1111_v52 = vpop.f32.mrf.mxu0  ;;  %10416 = vst [vmem:[#allocation73_spill] sm:$0xff] %v7847_v38  ;;  %v1406_v38 = vpack.c.bf16 %v1390_v13, %v1390_v13 }
 0x35d   :  { %v7828_v20 = vadd.f32 %v1111_v52, %v1062_v59 }
 0x35f   :  { %v1147_v9 = vadd.f32 %v1146_v18, %v7828_v20  ;;  %v1551_v36 = vrot.slane %v7828_v20, 1  ;;  %v1261_v12 = vrot.slane %v7828_v20, 7  ;;  %v2211_v52 = vmul.f32 %v7681_v30, %v7828_v20 }
 0x360   :  { %v1968_v18 = vpack.c.bf16 %v1952_v17, %v1952_v17 }
 0x361   :  { %v7843_v59 = vsel %vm871_vm6, %v1550_v49, %v1551_v36  ;;  %v7853_v48 = vsel %vm1275_vm7, %v1260_v62, %v1261_v12  ;;  %v2210_v49 = vmul.f32 %v7748_v44, %v7789_v60 }
 0x362   :  { %10415 = vst [vmem:[#allocation72_spill] sm:$0xff] %v7843_v59  ;;  %v1953_v3 = vmul.f32 %v7468_v4, %v7843_v59  ;;  %v1391_v63 = vmul.f32 %v7146_v7, %v7853_v48  ;;  %v7858_v24 = vmul.f32 %v2009_v53, %v7853_v48  ;;  %v4048_v4 = vld [vmem:[%s10421_s2 + $0x8] sm:$0xff]  ;;  %v1841_v7 = vpack.c.bf16 %v7828_v20, %v7828_v20 }
 0x363   :  { %10417 = vst [vmem:[#allocation74_spill] sm:$0xff] %v7853_v48  ;;  %v2227_v53 = vpack.c.bf16 %v2211_v52, %v2211_v52  ;;  %v7871_v48 = vunpack.c.l.b16 %v1968_v18  ;;  %4058 = vperm.xlu0 %6465, %v4048_v4   ;;  %v2339_v44 = vmul.f32 %v7702_v19, %v7843_v59  ;;  %v2226_v13 = vpack.c.bf16 %v2210_v49, %v2210_v49  ;;  %v1072_v49 = vpop.f32.mrf.mxu3 }
 0x364   :  { %10418 = vst [vmem:[#allocation75_spill] sm:$0xff] %v7858_v24  ;;  %v1113_v30 = vpop.f32.mrf.mxu0  ;;  %v1969_v17 = vpack.c.bf16 %v1953_v3, %v1953_v3  ;;  %v1407_v62 = vpack.c.bf16 %v1391_v63, %v1391_v63  ;;  %v7882_v24 = vunpack.c.l.b16 %v1406_v38  ;;  %v7891_v63 = vunpack.c.l.b16 %v1841_v7 }
 0x365   :  { %v7864_v56 = vadd.f32 %v1113_v30, %v1064_v47  ;;  %10422 = vst [vmem:[#allocation78_spill] sm:$0xff] %v7871_v48  ;;  %v7895_v4 = vunpack.c.l.b16 %v2227_v53  ;;  %v2355_v38 = vpack.c.bf16 %v2339_v44, %v2339_v44  ;;  %v7899_v48 = vpop.permute.xlu1 %2053  ;;  %v7911_v53 = vpop.permute.xlu0 %2187 }
 0x366   :  { %v7875_v42 = vunpack.c.l.b16 %v1969_v17  ;;  %10424 = vst [vmem:[#allocation80_spill] sm:$0xff] %v7882_v24  ;;  %v7884_v52 = vunpack.c.l.b16 %v1407_v62  ;;  %v5952_v62 = vld [vmem:[%s10421_s2 + $0x40] sm:$0xff] }
 0x367   :  { %10420 = vst [vmem:[#allocation77_spill] sm:$0xff] %v7864_v56  ;;  %v1552_v3 = vrot.slane %v7864_v56, 1  ;;  %v1842_v47 = vpack.c.bf16 %v7864_v56, %v7864_v56  ;;  %v1262_v18 = vrot.slane %v7864_v56, 7 }
 0x368   :  { %10423 = vst [vmem:[#allocation79_spill] sm:$0xff] %v7875_v42 }
 0x369   :  { %10425 = vst [vmem:[#allocation81_spill] sm:$0xff] %v7884_v52  ;;  %v7889_v19 = vsel %vm871_vm6, %v1551_v36, %v1552_v3  ;;  %v7893_v17 = vunpack.c.l.b16 %v1842_v47  ;;  %v7907_v7 = vsel %vm1275_vm7, %v1261_v12, %v1262_v18  ;;  %v7909_v47 = vunpack.c.l.b16 %v2226_v13  ;;  %v7922_v12 = vpop.permute.xlu2 %2162 }
 0x36a   :  { %10426 = vst [vmem:[#allocation82_spill] sm:$0xff] %v7891_v63  ;;  %v2340_v30 = vmul.f32 %v7700_v39, %v7889_v19  ;;  %v1148_v39 = vadd.f32 %v1147_v9, %v7864_v56  ;;  %v7924_v13 = vunpack.c.l.b16 %v2355_v38  ;;  %v1954_v9 = vmul.f32 %v7502_v10, %v7889_v19 }
 0x36b   :  { %10427 = vst [vmem:[#allocation83_spill] sm:$0xff] %v7893_v17  ;;  %4137 = vperm.xlu0 %6465, %v5952_v62  }
 0x36c   :  { %10428 = vst [vmem:[#allocation84_spill] sm:$0xff] %v7895_v4  ;;  %v1116_v42 = vpop.f32.mrf.mxu0  ;;  %v2356_v59 = vpack.c.bf16 %v2340_v30, %v2340_v30  ;;  %v1970_v10 = vpack.c.bf16 %v1954_v9, %v1954_v9 }
 0x36d   :  { %10429 = vst [vmem:[#allocation85_spill] sm:$0xff] %v7899_v48  ;;  %v7915_v44 = vadd.f32 %v1116_v42, %v7793_v50  ;;  %v7954_v24 = vpop.permute.xlu0 %2311 }
 0x36e   :  { %10430 = vst [vmem:[#allocation86_spill] sm:$0xff] %v7907_v7  ;;  %v7926_v48 = vunpack.c.l.b16 %v2356_v59  ;;  %v2212_v59 = vmul.f32 %v7773_v5, %v7864_v56  ;;  %v1074_v7 = vpop.f32.mrf.mxu3 }
 0x36f   :  { %10431 = vst [vmem:[#allocation87_spill] sm:$0xff] %v7909_v47  ;;  %v1149_v42 = vadd.f32 %v1148_v39, %v7915_v44  ;;  %v1553_v50 = vrot.slane %v7915_v44, 1  ;;  %v1263_v30 = vrot.slane %v7915_v44, 7  ;;  %v2213_v39 = vmul.f32 %v7717_v1, %v7915_v44  ;;  %v4049_v1 = vld [vmem:[%s10421_s2 + $0x10] sm:$0xff] }
 0x370   :  { %10432 = vst [vmem:[#allocation88_spill] sm:$0xff] %v7924_v13  ;;  %v2228_v5 = vpack.c.bf16 %v2212_v59, %v2212_v59  ;;  %4063 = vperm.xlu1 %6466, %v4049_v1  }
 0x371   :  { %10433 = vst [vmem:[#allocation89_spill] sm:$0xff] %v7926_v48  ;;  %v7937_v36 = vsel %vm871_vm6, %v1552_v3, %v1553_v50  ;;  %v7945_v62 = vsel %vm1275_vm7, %v1262_v18, %v1263_v30  ;;  %v2229_v48 = vpack.c.bf16 %v2213_v39, %v2213_v39  ;;  %v7949_v3 = vpop.permute.xlu1 %2316  ;;  %v1843_v18 = vpack.c.bf16 %v7915_v44, %v7915_v44  ;;  %v7971_v59 = vpop.permute.xlu2 %2038 }
 0x372   :  { %10434 = vst [vmem:[#allocation90_spill] sm:$0xff] %v7937_v36  ;;  %v1955_v38 = vmul.f32 %v7491_v43, %v7937_v36  ;;  %v7956_v43 = vunpack.c.l.b16 %v1970_v10  ;;  %v7982_v52 = vunpack.c.l.b16 %v2228_v5 }
 0x373   :  { %10435 = vst [vmem:[#allocation91_spill] sm:$0xff] %v7945_v62 }
 0x374   :  { %v1118_v47 = vpop.f32.mrf.mxu0  ;;  %v1971_v13 = vpack.c.bf16 %v1955_v38, %v1955_v38  ;;  %10437 = vst [vmem:[#allocation93_spill] sm:$0xff] %v7956_v43  ;;  %v5949_v38 = vld [vmem:[%s10421_s2 + $0x28] sm:$0xff] }
 0x375   :  { %v7952_v4 = vadd.f32 %v1118_v47, %v7834_v58  ;;  %v7969_v47 = vunpack.c.l.b16 %v2229_v48  ;;  %10440 = vst [vmem:[#allocation96_spill] sm:$0xff] %v7971_v59  ;;  %4100 = vperm.xlu0 %6465, %v5949_v38   ;;  %v2341_v48 = vmul.f32 %v7728_v28, %v7937_v36  ;;  %v7986_v59 = vunpack.c.l.b16 %v1843_v18 }
 0x376   :  { %v7958_v9 = vunpack.c.l.b16 %v1971_v13  ;;  %10442 = vst [vmem:[#allocation98_spill] sm:$0xff] %v7982_v52  ;;  %v1077_v63 = vpop.f32.mrf.mxu3  ;;  %v5954_v13 = vld [vmem:[%s10421_s2 + $0x50] sm:$0xff] }
 0x377   :  { %10436 = vst [vmem:[#allocation92_spill] sm:$0xff] %v7952_v4  ;;  %v1554_v58 = vrot.slane %v7952_v4, 1  ;;  %v1844_v10 = vpack.c.bf16 %v7952_v4, %v7952_v4  ;;  %v1264_v62 = vrot.slane %v7952_v4, 7  ;;  %v1150_v28 = vadd.f32 %v1149_v42, %v7952_v4 }
 0x378   :  { %10438 = vst [vmem:[#allocation94_spill] sm:$0xff] %v7958_v9  ;;  %v2357_v18 = vpack.c.bf16 %v2341_v48, %v2341_v48  ;;  %v8019_v48 = vpop.permute.xlu0 %2197 }
 0x379   :  { %10439 = vst [vmem:[#allocation95_spill] sm:$0xff] %v7969_v47  ;;  %v7979_v39 = vsel %vm871_vm6, %v1553_v50, %v1554_v58  ;;  %v7988_v1 = vunpack.c.l.b16 %v1844_v10  ;;  %v7992_v38 = vsel %vm1275_vm7, %v1263_v30, %v1264_v62 }
 0x37a   :  { %10441 = vst [vmem:[#allocation97_spill] sm:$0xff] %v7979_v39  ;;  %v2342_v50 = vmul.f32 %v7724_v35, %v7979_v39  ;;  %v1956_v30 = vmul.f32 %v7522_v8, %v7979_v39  ;;  %v5953_v35 = vld [vmem:[%s10421_s2 + $0x48] sm:$0xff]  ;;  %v8026_v5 = vunpack.c.l.b16 %v2357_v18 }
 0x37b   :  { %10443 = vst [vmem:[#allocation99_spill] sm:$0xff] %v7986_v59  ;;  %4142 = vperm.xlu1 %6466, %v5953_v35  }
 0x37c   :  { %10444 = vst [vmem:[#allocation100_spill] sm:$0xff] %v7988_v1  ;;  %v1121_v43 = vpop.f32.mrf.mxu0  ;;  %v2358_v10 = vpack.c.bf16 %v2342_v50, %v2342_v50 }
 0x37d   :  { %10445 = vst [vmem:[#allocation101_spill] sm:$0xff] %v7992_v38  ;;  %v8000_v9 = vadd.f32 %v1121_v43, %v1072_v49  ;;  %v8005_v38 = vpop.permute.xlu1 %2063  ;;  %v2214_v43 = vmul.f32 %v7810_v14, %v7952_v4  ;;  %4147 = vperm.xlu0 %6465, %v5954_v13   ;;  %v1972_v14 = vpack.c.bf16 %v1956_v30, %v1956_v30 }
 0x37e   :  { %10447 = vst [vmem:[#allocation103_spill] sm:$0xff] %v8005_v38  ;;  %v8028_v38 = vunpack.c.l.b16 %v2358_v10 }
 0x37f   :  { %10446 = vst [vmem:[#allocation102_spill] sm:$0xff] %v8000_v9  ;;  %v8014_v49 = vadd.f32 %v1150_v28, %v8000_v9  ;;  %v1555_v42 = vrot.slane %v8000_v9, 1  ;;  %v1265_v8 = vrot.slane %v8000_v9, 7  ;;  %v8030_v28 = vpop.permute.xlu2 %2172  ;;  %v2215_v13 = vmul.f32 %v7743_v27, %v8000_v9  ;;  %v5956_v27 = vld [vmem:[%s10421_s2 + $0x60] sm:$0xff] }
 0x380   :  { %10449 = vst [vmem:[#allocation105_spill] sm:$0xff] %v8026_v5  ;;  %v2230_v18 = vpack.c.bf16 %v2214_v43, %v2214_v43  ;;  %v8046_v30 = vunpack.c.l.b16 %v1972_v14  ;;  %v1079_v14 = vpop.f32.mrf.mxu3 }
 0x381   :  { %v8024_v50 = vsel %vm871_vm6, %v1554_v58, %v1555_v42  ;;  %10450 = vst [vmem:[#allocation106_spill] sm:$0xff] %v8028_v38  ;;  %v8036_v35 = vsel %vm1275_vm7, %v1264_v62, %v1265_v8  ;;  %v2231_v59 = vpack.c.bf16 %v2215_v13, %v2215_v13  ;;  %v8077_v38 = vpop.permute.xlu0 %2321 }
 0x382   :  { %10448 = vst [vmem:[#allocation104_spill] sm:$0xff] %v8024_v50  ;;  %v1957_v52 = vmul.f32 %v7661_v61, %v8024_v50  ;;  %v1845_v61 = vpack.c.bf16 %v8000_v9, %v8000_v9  ;;  %v8050_v62 = vunpack.c.l.b16 %v2230_v18  ;;  %v5964_v18 = vld [vmem:[%s10421_s2 + $0xc0] sm:$0xff] }
 0x383   :  { %10451 = vst [vmem:[#allocation107_spill] sm:$0xff] %v8036_v35  ;;  %v8052_v35 = vunpack.c.l.b16 %v2231_v59  ;;  %4178 = vperm.xlu1 %6466, %v5956_v27   ;;  %v5948_v9 = vld [vmem:[%s10421_s2 + $0x20] sm:$0xff] }
 0x384   :  { %v1123_v47 = vpop.f32.mrf.mxu0  ;;  %v1973_v10 = vpack.c.bf16 %v1957_v52, %v1957_v52  ;;  %10452 = vst [vmem:[#allocation108_spill] sm:$0xff] %v8046_v30  ;;  %v5951_v52 = vld [vmem:[%s10421_s2 + $0x38] sm:$0xff]  ;;  %v8073_v58 = vunpack.c.l.b16 %v1845_v61 }
 0x385   :  { %v8042_v1 = vadd.f32 %v1123_v47, %v1074_v7  ;;  %10454 = vst [vmem:[#allocation110_spill] sm:$0xff] %v8050_v62  ;;  %v4047_v7 = vld [vmem:[%s10421_s2] sm:$0xff]  ;;  %4110 = vperm.xlu0 %6465, %v5951_v52  }
 0x386   :  { %v8048_v17 = vunpack.c.l.b16 %v1973_v10  ;;  %10455 = vst [vmem:[#allocation111_spill] sm:$0xff] %v8052_v35  ;;  %v8071_v10 = vpop.permute.xlu1 %2326  ;;  %4053 = vperm.xlu2 %6467, %v4047_v7  }
 0x387   :  { %v1556_v47 = vrot.slane %v8042_v1, 1  ;;  %v1846_v43 = vpack.c.bf16 %v8042_v1, %v8042_v1  ;;  %v1266_v13 = vrot.slane %v8042_v1, 7  ;;  %10456 = vst [vmem:[#allocation112_spill] sm:$0xff] %v8073_v58  ;;  %v8089_v62 = vpop.permute.xlu2 %2048 }
 0x388   :  { %10453 = vst [vmem:[#allocation109_spill] sm:$0xff] %v8048_v17 }
 0x389   :  { %v8075_v5 = vunpack.c.l.b16 %v1846_v43  ;;  %v8081_v27 = vsel %vm871_vm6, %v1555_v42, %v1556_v47  ;;  %v8085_v52 = vsel %vm1275_vm7, %v1265_v8, %v1266_v13  ;;  %10460 = vst [vmem:[#allocation116_spill] sm:$0xff] %v8089_v62  ;;  %v2343_v43 = vmul.f32 %v7764_v41, %v8024_v50  ;;  %v5955_v42 = vld [vmem:[%s10421_s2 + $0x58] sm:$0xff] }
 0x38a   :  { %10458 = vst [vmem:[#allocation114_spill] sm:$0xff] %v8081_v27  ;;  %v1958_v7 = vmul.f32 %v7674_v54, %v8081_v27  ;;  %v6329_v8 = vld [vmem:[%s10207_s12 + $0x78] sm:$0xff]  ;;  %v2344_v62 = vmul.f32 %v7762_v37, %v8081_v27 }
 0x38b   :  { %10457 = vst [vmem:[#allocation113_spill] sm:$0xff] %v8075_v5  ;;  %4152 = vperm.xlu1 %6466, %v5955_v42   ;;  %v4050_v54 = vld [vmem:[%s10421_s2 + $0x18] sm:$0xff]  ;;  %3432 = vmatpush.bf16.msrb.mxu3 %v6329_v8  ;;  %v8120_v42 = vpop.f32.mrf.mxu3  ;;  %v2359_v5 = vpack.c.bf16 %v2343_v43, %v2343_v43  ;;  %v2208_v8 = vpop.permute.xlu0 %2207 }
 0x38c   :  { %10459 = vst [vmem:[#allocation115_spill] sm:$0xff] %v8085_v52  ;;  %v1126_v59 = vpop.f32.mrf.mxu0  ;;  %v6337_v41 = vld [vmem:[%s10207_s12 + $0xb8] sm:$0xff]  ;;  %v2360_v37 = vpack.c.bf16 %v2344_v62, %v2344_v62  ;;  %v6336_v62 = vld [vmem:[%s10207_s12 + $0xb0] sm:$0xff]  ;;  %v8169_v4 = vmul.f32 %v2208_v8, %v7780_v0 }
 0x38d   :  { %v8091_v61 = vadd.f32 %v1126_v59, %v1077_v63  ;;  %4256 = vperm.xlu0 %6465, %v5964_v18   ;;  %v1974_v18 = vpack.c.bf16 %v1958_v7, %v1958_v7  ;;  %3481 = vmatpush.bf16.msra.mxu0 %v6337_v41  ;;  %v6327_v41 = vld [vmem:[%s10207_s12 + $0x68] sm:$0xff] }
 0x38e   :  { %4068 = vperm.xlu2 %6467, %v4050_v54   ;;  %v8128_v30 = vpop.permute.xlu1 %2073  ;;  %v8164_v50 = vunpack.c.l.b16 %v2360_v37 }
 0x38f   :  { %v1557_v63 = vrot.slane %v8091_v61, 1  ;;  %v1267_v59 = vrot.slane %v8091_v61, 7  ;;  %v8145_v43 = vunpack.c.l.b16 %v1974_v18  ;;  %v8162_v18 = vunpack.c.l.b16 %v2359_v5  ;;  %v6335_v5 = vld [vmem:[%s10207_s12 + $0xa8] sm:$0xff] }
 0x390   :  { %10465 = vst [vmem:[#allocation121_spill] sm:$0xff] %v8164_v50  ;;  %v2217_v27 = vmul.f32 %v7771_v6, %v8091_v61  ;;  %v8182_v6 = vmul.f32 %v7099_v15, %v7780_v0 }
 0x391   :  { %v8118_v35 = vsel %vm871_vm6, %v1556_v47, %v1557_v63  ;;  %v8126_v58 = vsel %vm1275_vm7, %v1266_v13, %v1267_v59  ;;  %v2216_v47 = vmul.f32 %v7922_v12, %v8042_v1  ;;  %v5958_v13 = vld [vmem:[%s10421_s2 + $0x70] sm:$0xff]  ;;  %10462 = vst [vmem:[#allocation118_spill] sm:$0xff] %v8145_v43  ;;  %v1847_v12 = vpack.c.bf16 %v8091_v61, %v8091_v61 }
 0x392   :  { %v1959_v52 = vmul.f32 %v7574_v21, %v8118_v35  ;;  %10461 = vst [vmem:[#allocation117_spill] sm:$0xff] %v8126_v58  ;;  %v6328_v21 = vld [vmem:[%s10207_s12 + $0x70] sm:$0xff]  ;;  %v5961_v58 = vld [vmem:[%s10421_s2 + $0xa8] sm:$0xff]  ;;  %3482 = vmatpush.bf16.msra.mxu0 %v6336_v62 }
 0x393   :  { %10464 = vst [vmem:[#allocation120_spill] sm:$0xff] %v8162_v18  ;;  %3433 = vmatpush.bf16.msrb.mxu3 %v6328_v21  ;;  %4188 = vperm.xlu1 %6466, %v5958_v13   ;;  %v2232_v39 = vpack.c.bf16 %v2216_v47, %v2216_v47  ;;  %v8198_v56 = vunpack.c.l.b16 %v1847_v12 }
 0x394   :  { %v1128_v54 = vpop.f32.mrf.mxu0  ;;  %v1975_v17 = vpack.c.bf16 %v1959_v52, %v1959_v52  ;;  %v1686_v52 = vmul.f32 %v7266_v26, %v8118_v35 }
 0x395   :  { %v8132_v7 = vadd.f32 %v1128_v54, %v1079_v14  ;;  %v8149_v14 = vpop.permute.xlu2 %2182  ;;  %v1196_v54 = vld [vmem:[%s10209_s14 + $0x78] sm:$0xff]  ;;  %4228 = vperm.xlu0 %6465, %v5961_v58   ;;  %10466 = vst [vmem:[#allocation122_spill] sm:$0xff] %v8198_v56 }
 0x396   :  { %v8160_v26 = vunpack.c.l.b16 %v1975_v17  ;;  %v1195_v17 = vld [vmem:[%s10209_s14 + $0x70] sm:$0xff]  ;;  %1206 = vmatpush.msrb.mxu1 %v1196_v54  ;;  %4095 = vperm.xlu2 %6467, %v5948_v9   ;;  %v2233_v54 = vpack.c.bf16 %v2217_v27, %v2217_v27  ;;  %v1702_v62 = vpack.c.bf16 %v1686_v52, %v1686_v52  ;;  %v1084_v27 = vpop.f32.mrf.mxu3  ;;  %v5968_v52 = vld [vmem:[%s10421_s2 + $0xe0] sm:$0xff] }
 0x397   :  { %v10278_v37 = vrot.slane %v8132_v7, 1  ;;  %v1848_v8 = vpack.c.bf16 %v8132_v7, %v8132_v7  ;;  %v10468_v47 = vrot.slane %v8132_v7, 7  ;;  %3434 = vmatpush.bf16.msrb.mxu3 %v6327_v41  ;;  %3483 = vmatpush.bf16.msra.mxu0 %v6335_v5  ;;  %v1527_v58 = vmul.f32 %v7293_v55, %v8132_v7  ;;  %v6326_v5 = vld [vmem:[%s10207_s12 + $0x60] sm:$0xff] }
 0x398   :  { %10463 = vst [vmem:[#allocation119_spill] sm:$0xff] %v8160_v26  ;;  %1207 = vmatpush.msrb.mxu1 %v1195_v17  ;;  %v8222_v41 = vmul.f32 %v7337_v40, %v7822_v11  ;;  %v1193_v40 = vld [vmem:[%s10209_s14 + $0x60] sm:$0xff] }
 0x399   :  { %v8196_v15 = vsel %vm871_vm6, %v1557_v63, %v10278_v37  ;;  %v8200_v13 = vunpack.c.l.b16 %v1848_v8  ;;  %v8208_v9 = vsel %vm1275_vm7, %v1267_v59, %v10468_v47  ;;  %v8214_v8 = vunpack.c.l.b16 %v2232_v39  ;;  %v2337_v59 = vpop.permute.xlu1 %2336  ;;  %v1194_v39 = vld [vmem:[%s10209_s14 + $0x68] sm:$0xff]  ;;  %v6325_v47 = vld [vmem:[%s10207_s12 + $0x58] sm:$0xff] }
 0x39a   :  { %v1687_v21 = vmul.f32 %v7497_v22, %v8196_v15  ;;  %10469 = vst [vmem:[#allocation124_spill] sm:$0xff] %v8208_v9  ;;  %v8216_v22 = vunpack.c.l.b16 %v2233_v54  ;;  %v1534_v54 = vpack.c.bf16 %v8182_v6, %v8182_v6  ;;  %1208 = vmatpush.msrb.mxu1 %v1194_v39  ;;  %v1960_v6 = vmul.f32 %v7592_v31, %v8196_v15  ;;  %v1192_v63 = vld [vmem:[%s10209_s14 + $0x58] sm:$0xff] }
 0x39b   :  { %10467 = vst [vmem:[#allocation123_spill] sm:$0xff] %v8200_v13  ;;  %3435 = vmatpush.bf16.msrb.mxu3 %v6326_v5  ;;  %v1543_v37 = vpack.c.bf16 %v1527_v58, %v1527_v58  ;;  %v8268_v39 = vmul.f32 %v2337_v59, %v7822_v11  ;;  %v6333_v11 = vld [vmem:[%s10207_s12 + $0x98] sm:$0xff] }
 0x39c   :  { %v1131_v12 = vpop.f32.mrf.mxu0  ;;  %v1703_v17 = vpack.c.bf16 %v1687_v21, %v1687_v21  ;;  %10470 = vst [vmem:[#allocation125_spill] sm:$0xff] %v8214_v8  ;;  %v5965_v21 = vld [vmem:[%s10421_s2 + $0xc8] sm:$0xff]  ;;  %1209 = vmatpush.msrb.mxu1 %v1193_v40  ;;  %v8297_v59 = vunpack.c.l.b16 %v1534_v54  ;;  %v1976_v40 = vpack.c.bf16 %v1960_v6, %v1960_v6  ;;  %v10535_v26 = vld [vmem:[#allocation8_spill] sm:$0xff] }
 0x39d   :  { %10471 = vst [vmem:[#allocation126_spill] sm:$0xff] %v8216_v22  ;;  %v8225_v55 = vadd.f32 %v1131_v12, %v8120_v42  ;;  %v6334_v42 = vld [vmem:[%s10207_s12 + $0xa0] sm:$0xff]  ;;  %v8247_v12 = vunpack.c.l.b16 %v1702_v62  ;;  %v5957_v62 = vld [vmem:[%s10421_s2 + $0x68] sm:$0xff]  ;;  %v8270_v8 = vpop.permute.xlu2 %2058  ;;  %4261 = vperm.xlu1 %6466, %v5965_v21   ;;  %v8274_v22 = vmul.f32 %v7122_v25, %v7789_v60  ;;  %4289 = vperm.xlu0 %6465, %v5968_v52   ;;  %v10473_v60 = vrot.slane %v8132_v7, 1 }
 0x39e   :  { %v8249_v36 = vunpack.c.l.b16 %v1703_v17  ;;  %v6511_v17 = vmov 64.0   ;;  %10472 = vst [vmem:[#allocation127_spill] sm:$0xff] %v8270_v8  ;;  %3484 = vmatpush.bf16.msra.mxu0 %v6334_v42  ;;  %v8295_v52 = vmul.f32 %v7436_v2, %v7816_v45  ;;  %1210 = vmatpush.msrb.mxu1 %v1192_v63  ;;  %v10474_v42 = vrot.slane %v8132_v7, 7  ;;  %v1188_v8 = vld [vmem:[%s10209_s14 + $0x38] sm:$0xff] }
 0x39f   :  { %6478 = vrcp.f32 %v6511_v17  ;;  %v1528_v31 = vmul.f32 %v7291_v51, %v8225_v55  ;;  %v1559_v5 = vrot.slane %v8225_v55, 1  ;;  %v10282_v18 = vrot.slane %v8225_v55, 7  ;;  %v1191_v51 = vld [vmem:[%s10209_s14 + $0x50] sm:$0xff]  ;;  %4183 = vperm.xlu2 %6467, %v5957_v62   ;;  %3436 = vmatpush.bf16.msrb.mxu3 %v6325_v47 }
 0x3a0   :  { %v1695_v2 = vpack.c.bf16 %v8222_v41, %v8222_v41  ;;  %v8311_v63 = vunpack.c.l.b16 %v1543_v37  ;;  %v2370_v6 = vpack.c.bf16 %v8268_v39, %v8268_v39  ;;  %1211 = vmatpush.msrb.mxu1 %v1191_v51  ;;  %v5972_v39 = vld [vmem:[%s10421_s2 + $0x100] sm:$0xff]  ;;  %v1087_v51 = vpop.f32.mrf.mxu3 }
 0x3a1   :  { %v1544_v58 = vpack.c.bf16 %v1528_v31, %v1528_v31  ;;  %v8291_v25 = vsel %vm871_vm6, %v10473_v60, %v1559_v5  ;;  %v8307_v31 = vsel %vm1275_vm7, %v10474_v42, %v10282_v18  ;;  %v8323_v42 = vmul.f32 %v7676_v29, %v7816_v45 }
 0x3a2   :  { %v1961_v21 = vmul.f32 %v7588_v34, %v8291_v25  ;;  %10475 = vst [vmem:[#allocation128_spill] sm:$0xff] %v8307_v31  ;;  %v2345_v34 = vmul.f32 %v7782_v33, %v8118_v35  ;;  %3485 = vmatpush.bf16.msra.mxu0 %v6333_v11  ;;  %v6324_v33 = vld [vmem:[%s10207_s12 + $0x50] sm:$0xff]  ;;  %v1190_v35 = vld [vmem:[%s10209_s14 + $0x48] sm:$0xff]  ;;  %v1849_v29 = vpack.c.bf16 %v8225_v55, %v8225_v55  ;;  %v1189_v11 = vld [vmem:[%s10209_s14 + $0x40] sm:$0xff]  ;;  %v8354_v45 = vunpack.c.l.b16 %v1976_v40 }
 0x3a3   :  { %v8313_v54 = vunpack.c.l.b16 %v1544_v58  ;;  %1212 = vmatpush.msrb.mxu1 %v1190_v35  ;;  %v6332_v58 = vld [vmem:[%s10207_s12 + $0x90] sm:$0xff]  ;;  %3437 = vmatpush.bf16.msrb.mxu3 %v6324_v33 }
 0x3a4   :  { %v1133_v62 = vpop.f32.mrf.mxu0  ;;  %v1977_v41 = vpack.c.bf16 %v1961_v21, %v1961_v21  ;;  %v1688_v21 = vmul.f32 %v7321_v32, %v8291_v25  ;;  %10476 = vst [vmem:[#allocation129_spill] sm:$0xff] %v8354_v45  ;;  %v2361_v32 = vpack.c.bf16 %v2345_v34, %v2345_v34  ;;  %v8378_v34 = vunpack.c.l.b16 %v1849_v29 }
 0x3a5   :  { %v8325_v37 = vpop.eup %6478  ;;  %v8327_v47 = vadd.f32 %v1133_v62, %v1084_v27  ;;  %v2346_v27 = vmul.f32 %v7778_v57, %v8196_v15  ;;  %v8358_v57 = vunpack.c.l.b16 %v1695_v2  ;;  %v6323_v15 = vld [vmem:[%s10207_s12 + $0x48] sm:$0xff]  ;;  %4322 = vperm.xlu1 %6466, %v5972_v39   ;;  %1213 = vmatpush.msrb.mxu1 %v1189_v11  ;;  %v2218_v11 = vmul.f32 %v8030_v28, %v8132_v7  ;;  %v10482_v28 = vld [vmem:[#allocation24_spill] sm:$0xff] }
 0x3a6   :  { %v8356_v17 = vunpack.c.l.b16 %v1977_v41  ;;  %v1173_v40 = vmul.f32 64.0, %v8325_v37  ;;  %3486 = vmatpush.bf16.msra.mxu0 %v6332_v58  ;;  %10478 = vst [vmem:[#allocation131_spill] sm:$0xff] %v8378_v34  ;;  %v8384_v41 = vpop.permute.xlu2 %2192  ;;  %v1704_v18 = vpack.c.bf16 %v1688_v21, %v1688_v21  ;;  %v10493_v34 = vld [vmem:[#allocation61_spill] sm:$0xff]  ;;  %vm1177_vm8 = vweird.f32 %v8325_v37 }
 0x3a7   :  { %v10283_v35 = vrot.slane %v8327_v47, 1  ;;  %v1850_v60 = vpack.c.bf16 %v8327_v47, %v8327_v47  ;;  %v10284_v2 = vrot.slane %v8327_v47, 7  ;;  %v2362_v33 = vpack.c.bf16 %v2346_v27, %v2346_v27  ;;  %3438 = vmatpush.bf16.msrb.mxu3 %v6323_v15  ;;  %v10485_v15 = vld [vmem:[#allocation68_spill] sm:$0xff]  ;;  %1214 = vmatpush.msrb.mxu1 %v1188_v8  ;;  %v5950_v8 = vld [vmem:[%s10421_s2 + $0x30] sm:$0xff] }
 0x3a8   :  { %10477 = vst [vmem:[#allocation130_spill] sm:$0xff] %v8356_v17  ;;  %v8388_v27 = vmul.f32 %v7114_v23, %v7828_v20  ;;  %v1529_v29 = vmul.f32 %v10482_v28, %v8327_v47  ;;  %v8404_v20 = vunpack.c.l.b16 %v2361_v32  ;;  %v2219_v50 = vmul.f32 %v10485_v15, %v8225_v55  ;;  %v6331_v32 = vld [vmem:[%s10207_s12 + $0x88] sm:$0xff]  ;;  %4105 = vperm.xlu2 %6467, %v5950_v8   ;;  %v1089_v9 = vpop.f32.mrf.mxu3 }
 0x3a9   :  { %v8376_v62 = vsel %vm871_vm6, %v1559_v5, %v10283_v35  ;;  %v8380_v39 = vunpack.c.l.b16 %v1850_v60  ;;  %v10480_v5 = vrot.slane %v8225_v55, 7  ;;  %v8406_v35 = vunpack.c.l.b16 %v2362_v33  ;;  %v6322_v33 = vld [vmem:[%s10207_s12 + $0x40] sm:$0xff] }
 0x3aa   :  { %v1689_v58 = vmul.f32 %v7534_v46, %v8376_v62  ;;  %10483 = vst [vmem:[#allocation24_spill] sm:$0xff] %v8404_v20  ;;  %v8408_v46 = vunpack.c.l.b16 %v2370_v6  ;;  %v8422_v6 = vadd.f32 %v8014_v49, %v8042_v1  ;;  %v2234_v23 = vpack.c.bf16 %v2218_v11, %v2218_v11  ;;  %3487 = vmatpush.bf16.msra.mxu0 %v6331_v32  ;;  %v10489_v8 = vld [vmem:[#allocation9_spill] sm:$0xff] }
 0x3ab   :  { %10479 = vst [vmem:[#allocation132_spill] sm:$0xff] %v8380_v39  ;;  %v8398_v60 = vsel %vm1275_vm7, %v10480_v5, %v10284_v2  ;;  %v1174_v5 = vsub.f32 1.0, %v1173_v40  ;;  %v5967_v40 = vld [vmem:[%s10421_s2 + $0xd8] sm:$0xff]  ;;  %v2235_v11 = vpack.c.bf16 %v2219_v50, %v2219_v50  ;;  %v1536_v20 = vpack.c.bf16 %v8388_v27, %v8388_v27  ;;  %v1186_v50 = vld [vmem:[%s10209_s14 + $0x28] sm:$0xff]  ;;  %3439 = vmatpush.bf16.msrb.mxu3 %v6322_v33  ;;  %v1185_v32 = vld [vmem:[%s10209_s14 + $0x20] sm:$0xff] }
 0x3ac   :  { %10481 = vst [vmem:[#allocation133_spill] sm:$0xff] %v8398_v60  ;;  %v1136_v21 = vpop.f32.mrf.mxu0  ;;  %v1705_v2 = vpack.c.bf16 %v1689_v58, %v1689_v58  ;;  %v8435_v58 = vunpack.c.l.b16 %v1704_v18  ;;  %4271 = vperm.xlu0 %6465, %v5967_v40   ;;  %v1545_v18 = vpack.c.bf16 %v1529_v29, %v1529_v29  ;;  %v10488_v40 = vld [vmem:[#allocation72_spill] sm:$0xff]  ;;  %v5969_v29 = vld [vmem:[%s10421_s2 + $0xe8] sm:$0xff]  ;;  %v8479_v27 = vunpack.c.l.b16 %v2234_v23 }
 0x3ad   :  { %10484 = vst [vmem:[#allocation134_spill] sm:$0xff] %v8406_v35  ;;  %v8415_v28 = vadd.f32 %v1136_v21, %v1087_v51  ;;  %v1187_v51 = vld [vmem:[%s10209_s14 + $0x30] sm:$0xff]  ;;  %v10486_v21 = vld [vmem:[#allocation48_spill] sm:$0xff]  ;;  %4294 = vperm.xlu1 %6466, %v5969_v29   ;;  %v1153_v31 = vrot.slane %v8422_v6, 4 }
 0x3ae   :  { %v8437_v49 = vunpack.c.l.b16 %v1705_v2  ;;  %v1962_v15 = vmul.f32 %v10486_v21, %v8376_v62  ;;  %v10487_v35 = vld [vmem:[#allocation23_spill] sm:$0xff]  ;;  %1215 = vmatpush.msrb.mxu1 %v1187_v51  ;;  %v8454_v21 = vmul.f32 %v10489_v8, %v10488_v40  ;;  %v6330_v51 = vld [vmem:[%s10207_s12 + $0x80] sm:$0xff]  ;;  %v1175_v40 = vmul.f32 %v8325_v37, %v1174_v5  ;;  %10492 = vst [vmem:[#allocation48_spill] sm:$0xff] %v8479_v27  ;;  %v8503_v56 = vpop.permute.xlu2 %2068 }
 0x3af   :  { %v1530_v60 = vmul.f32 %v10487_v35, %v8415_v28  ;;  %v10295_v2 = vrot.slane %v8415_v28, 1  ;;  %v8459_v35 = vunpack.c.l.b16 %v2235_v11  ;;  %v10491_v11 = vrot.slane %v8327_v47, 1  ;;  %v1184_v23 = vld [vmem:[%s10209_s14 + $0x18] sm:$0xff]  ;;  %10500 = vst [vmem:[#allocation61_spill] sm:$0xff] %v8503_v56  ;;  %3488 = vmatpush.bf16.msra.mxu0 %v6330_v51  ;;  %v1182_v51 = vld [vmem:[%s10209_s14 + $0x8] sm:$0xff] }
 0x3b0   :  { %1216 = vmatpush.msrb.mxu1 %v1186_v50  ;;  %v1978_v45 = vpack.c.bf16 %v1962_v15, %v1962_v15  ;;  %v10495_v5 = vrot.slane %v8327_v47, 7  ;;  %v8495_v50 = vunpack.c.l.b16 %v1545_v18  ;;  %v10499_v15 = vld [vmem:[#allocation73_spill] sm:$0xff]  ;;  %v5959_v18 = vld [vmem:[%s10421_s2 + $0x78] sm:$0xff] }
 0x3b1   :  { %10490 = vst [vmem:[#allocation68_spill] sm:$0xff] %v8459_v35  ;;  %v1546_v8 = vpack.c.bf16 %v1530_v60, %v1530_v60  ;;  %v8477_v33 = vsel %vm871_vm6, %v10491_v11, %v10295_v2  ;;  %v10494_v60 = vrot.slane %v8415_v28, 7  ;;  %v2347_v11 = vmul.f32 %v10499_v15, %v8291_v25  ;;  %v10501_v56 = vld [vmem:[#allocation71_spill] sm:$0xff]  ;;  %4193 = vperm.xlu2 %6467, %v5959_v18   ;;  %v1092_v18 = vpop.f32.mrf.mxu3 }
 0x3b2   :  { %v1963_v39 = vmul.f32 %v10493_v34, %v8477_v33  ;;  %10497 = vst [vmem:[#allocation72_spill] sm:$0xff] %v8495_v50  ;;  %1217 = vmatpush.msrb.mxu1 %v1185_v32  ;;  %v1183_v32 = vld [vmem:[%s10209_s14 + $0x10] sm:$0xff]  ;;  %v2348_v27 = vmul.f32 %v10501_v56, %v8376_v62  ;;  %v1154_v62 = vadd.f32 %v1153_v31, %v8422_v6  ;;  %v1181_v31 = vld [vmem:[%s10209_s14] sm:$0xff]  ;;  %v10505_v6 = vrot.slane %v8415_v28, 1 }
 0x3b3   :  { %v8490_v17 = vsel %vm1275_vm7, %v10495_v5, %v10494_v60  ;;  %v8497_v29 = vunpack.c.l.b16 %v1546_v8  ;;  %v5974_v60 = vld [vmem:[%s10421_s2 + $0x110] sm:$0xff]  ;;  %v8511_v8 = vunpack.c.l.b16 %v1536_v20  ;;  %v1851_v20 = vpack.c.bf16 %v8415_v28, %v8415_v28 }
 0x3b4   :  { %10496 = vst [vmem:[#allocation23_spill] sm:$0xff] %v8490_v17  ;;  %v1138_v2 = vpop.f32.mrf.mxu0  ;;  %v1979_v15 = vpack.c.bf16 %v1963_v39, %v1963_v39  ;;  %1218 = vmatpush.msrb.mxu1 %v1184_v23  ;;  %v8529_v5 = vadd.f32 %v8325_v37, %v1175_v40  ;;  %4332 = vperm.xlu0 %6465, %v5974_v60   ;;  %v5962_v56 = vld [vmem:[%s10421_s2 + $0xb0] sm:$0xff] }
 0x3b5   :  { %10498 = vst [vmem:[#allocation9_spill] sm:$0xff] %v8497_v29  ;;  %v8517_v34 = vadd.f32 %v1138_v2, %v1089_v9  ;;  %v10502_v9 = vld [vmem:[#allocation25_spill] sm:$0xff]  ;;  %v8533_v2 = vunpack.c.l.b16 %v1978_v45  ;;  %v2363_v23 = vpack.c.bf16 %v2347_v11, %v2347_v11  ;;  %v1159_v60 = vadd.f32 %v8132_v7, %v8091_v61  ;;  %4233 = vperm.xlu1 %6466, %v5962_v56  }
 0x3b6   :  { %v1690_v39 = vmul.f32 %v10502_v9, %v8477_v33  ;;  %v8535_v25 = vunpack.c.l.b16 %v1979_v15  ;;  %1219 = vmatpush.msrb.mxu1 %v1183_v32  ;;  %v2364_v9 = vpack.c.bf16 %v2348_v27, %v2348_v27  ;;  %v8561_v11 = vunpack.c.l.b16 %v1851_v20  ;;  %v10508_v27 = vld [vmem:[#allocation45_spill] sm:$0xff] }
 0x3b7   :  { %10503 = vst [vmem:[#allocation73_spill] sm:$0xff] %v8533_v2  ;;  %v1562_v40 = vrot.slane %v8517_v34, 1  ;;  %v1852_v45 = vpack.c.bf16 %v8517_v34, %v8517_v34  ;;  %v1272_v15 = vrot.slane %v8517_v34, 7  ;;  %v2220_v32 = vmul.f32 %v8149_v14, %v8327_v47 }
 0x3b8   :  { %10504 = vst [vmem:[#allocation71_spill] sm:$0xff] %v8535_v25  ;;  %1220 = vmatpush.msrb.mxu1 %v1182_v51  ;;  %v1706_v2 = vpack.c.bf16 %v1690_v39, %v1690_v39  ;;  %v10509_v25 = vld [vmem:[#allocation30_spill] sm:$0xff]  ;;  %v10511_v14 = vrot.slane %v8415_v28, 7  ;;  %v8584_v56 = vunpack.c.l.b16 %v2363_v23  ;;  %v8586_v39 = vunpack.c.l.b16 %v2364_v9  ;;  %v5971_v23 = vld [vmem:[%s10421_s2 + $0xf8] sm:$0xff]  ;;  %v5960_v9 = vld [vmem:[%s10421_s2 + $0xa0] sm:$0xff] }
 0x3b9   :  { %v8559_v35 = vsel %vm871_vm6, %v10505_v6, %v1562_v40  ;;  %10506 = vst [vmem:[#allocation25_spill] sm:$0xff] %v8561_v11  ;;  %v8563_v7 = vunpack.c.l.b16 %v1852_v45  ;;  %v1531_v13 = vmul.f32 %v10509_v25, %v8517_v34  ;;  %v10510_v6 = vpack.c.bf16 %v8295_v52, %v8295_v52  ;;  %4223 = vperm.xlu2 %6467, %v5960_v9  }
 0x3ba   :  { %v1691_v17 = vmul.f32 %v10508_v27, %v8559_v35  ;;  %v8582_v51 = vsel %vm1275_vm7, %v10511_v14, %v1272_v15  ;;  %10513 = vst [vmem:[#allocation30_spill] sm:$0xff] %v8584_v56  ;;  %1221 = vmatpush.msrb.mxu1 %v1181_v31  ;;  %v1155_v25 = vrot.slane %v1154_v62, 2  ;;  %v1160_v45 = vadd.f32 %v1159_v60, %v8225_v55  ;;  %v10517_v55 = vld [vmem:[#allocation62_spill] sm:$0xff] }
 0x3bb   :  { %10507 = vst [vmem:[#allocation135_spill] sm:$0xff] %v8563_v7  ;;  %v8574_v20 = vunpack.c.l.b16 %v10510_v6  ;;  %v2221_v6 = vmul.f32 %v7911_v53, %v8415_v28  ;;  %v2236_v14 = vpack.c.bf16 %v2220_v32, %v2220_v32  ;;  %v1964_v60 = vmul.f32 %v10517_v55, %v8559_v35  ;;  %v5975_v7 = vld [vmem:[%s10421_s2 + $0x118] sm:$0xff] }
 0x3bc   :  { %10512 = vst [vmem:[#allocation45_spill] sm:$0xff] %v8582_v51  ;;  %v1141_v27 = vpop.f32.mrf.mxu0  ;;  %v1707_v52 = vpack.c.bf16 %v1691_v17, %v1691_v17  ;;  %v8602_v17 = vpop.permute.xlu2 %2202  ;;  %v8604_v51 = vunpack.c.l.b16 %v1706_v2  ;;  %4304 = vperm.xlu0 %6465, %v5971_v23   ;;  %v10518_v32 = vld [vmem:[#allocation28_spill] sm:$0xff]  ;;  %v1547_v56 = vpack.c.bf16 %v1531_v13, %v1531_v13 }
 0x3bd   :  { %10514 = vst [vmem:[#allocation136_spill] sm:$0xff] %v8586_v39  ;;  %v8592_v11 = vadd.f32 %v1141_v27, %v1092_v18  ;;  %v2237_v18 = vpack.c.bf16 %v2221_v6, %v2221_v6  ;;  %v8618_v39 = vadd.f32 %v1155_v25, %v1154_v62  ;;  %v8622_v55 = vunpack.c.l.b16 %v2236_v14  ;;  %4337 = vperm.xlu1 %6466, %v5975_v7   ;;  %v10522_v62 = vld [vmem:[#allocation32_spill] sm:$0xff]  ;;  %v10523_v25 = vld [vmem:[#allocation54_spill] sm:$0xff] }
 0x3be   :  { %10515 = vst [vmem:[#allocation137_spill] sm:$0xff] %v8604_v51  ;;  %v8606_v53 = vunpack.c.l.b16 %v1707_v52  ;;  %v1161_v52 = vadd.f32 %v1160_v45, %v8327_v47  ;;  %v1980_v14 = vpack.c.bf16 %v1964_v60, %v1964_v60  ;;  %v8641_v6 = vunpack.c.l.b16 %v1547_v56  ;;  %v10526_v60 = vld [vmem:[#allocation75_spill] sm:$0xff] }
 0x3bf   :  { %v1273_v27 = vrot.slane %v8592_v11, 7  ;;  %v1532_v31 = vmul.f32 %v10518_v32, %v8592_v11  ;;  %v10308_v2 = vrot.slane %v8592_v11, 1  ;;  %10519 = vst [vmem:[#allocation62_spill] sm:$0xff] %v8622_v55  ;;  %v8634_v32 = vunpack.c.l.b16 %v2237_v18  ;;  %v10527_v55 = vld [vmem:[#allocation27_spill] sm:$0xff] }
 0x3c0   :  { %10516 = vst [vmem:[#allocation138_spill] sm:$0xff] %v8606_v53  ;;  %v1162_v47 = vadd.f32 %v1161_v52, %v8415_v28  ;;  %v5973_v52 = vld [vmem:[%s10421_s2 + $0x108] sm:$0xff]  ;;  %v8661_v18 = vsel %vm1177_vm8, %v8325_v37, %v8529_v5  ;;  %v10530_v5 = vld [vmem:[#allocation7_spill] sm:$0xff] }
 0x3c1   :  { %v1548_v23 = vpack.c.bf16 %v1532_v31, %v1532_v31  ;;  %v8628_v9 = vsel %vm871_vm6, %v1562_v40, %v10308_v2  ;;  %v8632_v13 = vsel %vm1275_vm7, %v1272_v15, %v1273_v27  ;;  %10521 = vst [vmem:[#allocation139_spill] sm:$0xff] %v8634_v32  ;;  %v1853_v15 = vpack.c.bf16 %v8592_v11, %v8592_v11  ;;  %v1094_v2 = vpop.f32.mrf.mxu3 }
 0x3c2   :  { %10520 = vst [vmem:[#allocation28_spill] sm:$0xff] %v8632_v13  ;;  %v1692_v45 = vmul.f32 %v10522_v62, %v8628_v9  ;;  %v1965_v31 = vmul.f32 %v10523_v25, %v8628_v9  ;;  %v1163_v7 = vadd.f32 %v1162_v47, %v8517_v34  ;;  %v8665_v47 = vmul.f32 %v10527_v55, %v7889_v19 }
 0x3c3   :  { %10524 = vst [vmem:[#allocation32_spill] sm:$0xff] %v8641_v6  ;;  %v8643_v40 = vunpack.c.l.b16 %v1548_v23  ;;  %4327 = vperm.xlu2 %6467, %v5973_v52   ;;  %v8679_v55 = vunpack.c.l.b16 %v1853_v15  ;;  %v10532_v52 = vrot.slane %v7780_v0, 7  ;;  %v10655_v16 = vld [vmem:[#allocation45_spill] sm:$0xff] }
 0x3c4   :  { %v1143_v28 = vpop.f32.mrf.mxu0  ;;  %v1708_v62 = vpack.c.bf16 %v1692_v45, %v1692_v45  ;;  %v1981_v23 = vpack.c.bf16 %v1965_v31, %v1965_v31  ;;  %v1164_v56 = vadd.f32 %v1163_v7, %v8592_v11  ;;  %v8671_v31 = vunpack.c.l.b16 %v1980_v14  ;;  %v2079_v32 = vpop.permute.xlu2 %2078  ;;  %v10533_v14 = vld [vmem:[#allocation21_spill] sm:$0xff] }
 0x3c5   :  { %10525 = vst [vmem:[#allocation54_spill] sm:$0xff] %v8643_v40  ;;  %v8655_v25 = vadd.f32 %v1143_v28, %v1094_v2  ;;  %v2332_v28 = vpop.permute.xlu0 %2331  ;;  %v8688_v7 = vmul.f32 %v7954_v24, %v8477_v33  ;;  %v10536_v40 = vld [vmem:[#allocation35_spill] sm:$0xff] }
 0x3c6   :  { %10528 = vst [vmem:[#allocation75_spill] sm:$0xff] %v8671_v31  ;;  %v8673_v2 = vunpack.c.l.b16 %v1981_v23  ;;  %v8682_v43 = vunpack.c.l.b16 %v1708_v62  ;;  %v10531_v23 = vrot.slane %v7780_v0, 1 }
 0x3c7   :  { %v1564_v13 = vrot.slane %v8655_v25, 1  ;;  %v1274_v37 = vrot.slane %v8655_v25, 7  ;;  %v1517_v19 = vmul.f32 %v10530_v5, %v8655_v25  ;;  %v1165_v45 = vadd.f32 %v1164_v56, %v8655_v25 }
 0x3c8   :  { %10529 = vst [vmem:[#allocation27_spill] sm:$0xff] %v8673_v2  ;;  %v10534_v2 = vld [vmem:[#allocation56_spill] sm:$0xff] }
 0x3c9   :  { %v1580_v5 = vsel %vm871_vm6, %v1564_v13, %v10531_v23  ;;  %v8696_v15 = vsel %vm1275_vm7, %v1273_v27, %v1274_v37  ;;  %v1291_v62 = vsel %vm1275_vm7, %v1274_v37, %v10532_v52  ;;  %v1533_v56 = vpack.c.bf16 %v1517_v19, %v1517_v19  ;;  %v5966_v37 = vld [vmem:[%s10421_s2 + $0xd0] sm:$0xff] }
 0x3ca   :  { %v1678_v31 = vmul.f32 %v10533_v14, %v1580_v5  ;;  %v1967_v24 = vmul.f32 %v10534_v2, %v1580_v5  ;;  %v2353_v33 = vmul.f32 %v2332_v28, %v1580_v5  ;;  %v1389_v6 = vmul.f32 %v10535_v26, %v1291_v62 }
 0x3cb   :  { %v1807_v51 = vmul.f32 %v10536_v40, %v1291_v62  ;;  %v2095_v23 = vmul.f32 %v8128_v30, %v8696_v15  ;;  %v2096_v27 = vmul.f32 %v2079_v32, %v1291_v62  ;;  %v2435_v53 = vunpack.c.l.b16 %v1533_v56  ;;  %4266 = vperm.xlu2 %6467, %v5966_v37   ;;  %v10542_v37 = vld [vmem:[#allocation57_spill] sm:$0xff] }
 0x3cc   :  { %v1694_v50 = vpack.c.bf16 %v1678_v31, %v1678_v31  ;;  %v1983_v0 = vpack.c.bf16 %v1967_v24, %v1967_v24  ;;  %v2369_v29 = vpack.c.bf16 %v2353_v33, %v2353_v33  ;;  %v1854_v2 = vpack.c.bf16 %v8655_v25, %v8655_v25  ;;  %v10541_v33 = vld [vmem:[#allocation6_spill] sm:$0xff] }
 0x3cd   :  { %v1823_v28 = vpack.c.bf16 %v1807_v51, %v1807_v51  ;;  %v2111_v19 = vpack.c.bf16 %v2095_v23, %v2095_v23  ;;  %v2112_v26 = vpack.c.bf16 %v2096_v27, %v2096_v27  ;;  %v2451_v40 = vpack.c.b16 %v8297_v59, %v2435_v53  ;;  %v10540_v53 = vld [vmem:[#allocation47_spill] sm:$0xff] }
 0x3ce   :  { %v2483_v14 = vunpack.c.l.b16 %v1694_v50  ;;  %v8714_v5 = vunpack.c.l.b16 %v2369_v29  ;;  %v1405_v30 = vpack.c.bf16 %v1389_v6, %v1389_v6  ;;  %v1166_v32 = vrot.slane %v1165_v45, 4  ;;  %v10559_v59 = vld [vmem:[#allocation15_spill] sm:$0xff] }
 0x3cf   :  { %v8716_v31 = vunpack.c.l.b16 %v1823_v28  ;;  %v8718_v52 = vunpack.c.l.b16 %v2111_v19  ;;  %v8720_v62 = vunpack.c.l.b16 %v2112_v26  ;;  %3440 = vmatmul.bf16.vlgmr.msrb.gmra.mxu3 %v2451_v40  ;;  %v10539_v56 = vrot.slane %v8592_v11, 1 }
 0x3d0   :  { %v2499_v50 = vpack.c.b16 %v8358_v57, %v2483_v14  ;;  %v1167_v29 = vadd.f32 %v1166_v32, %v1165_v45  ;;  %v1388_v23 = vmul.f32 %v10541_v33, %v8696_v15  ;;  %v8734_v27 = vunpack.c.l.b16 %v1854_v2  ;;  %v5963_v2 = vld [vmem:[%s10421_s2 + $0xb8] sm:$0xff] }
 0x3d1   :  { %10537 = vst [vmem:[#allocation7_spill] sm:$0xff] %v8718_v52  ;;  %v1565_v51 = vsel %vm871_vm6, %v10539_v56, %v1564_v13  ;;  %v8737_v19 = vunpack.c.l.b16 %v1405_v30  ;;  %v8743_v32 = vunpack.c.l.b16 %v1983_v0  ;;  %v2222_v0 = vmul.f32 %v8384_v41, %v8517_v34  ;;  %v10639_v57 = vld [vmem:[#allocation75_spill] sm:$0xff] }
 0x3d2   :  { %10538 = vst [vmem:[#allocation21_spill] sm:$0xff] %v8720_v62  ;;  %v1693_v6 = vmul.f32 %v10540_v53, %v1565_v51  ;;  %v1966_v28 = vmul.f32 %v10542_v37, %v1565_v51  ;;  %3489 = vmatmul.bf16.vlgmr.msra.gmra.mxu0 %v2499_v50  ;;  %v1168_v13 = vrot.slane %v1167_v29, 2  ;;  %v1404_v45 = vpack.c.bf16 %v1388_v23, %v1388_v23 }
 0x3d3   :  { %v2350_v50 = vmul.f32 %v7949_v3, %v8559_v35  ;;  %v2365_v53 = vpack.c.bf16 %v8688_v7, %v8688_v7  ;;  %v10543_v23 = vrot.slane %v8618_v39, 1  ;;  %4238 = vperm.xlu2 %6467, %v5963_v2   ;;  %v2238_v41 = vpack.c.bf16 %v2222_v0, %v2222_v0 }
 0x3d4   :  { %v1709_v26 = vpack.c.bf16 %v1693_v6, %v1693_v6  ;;  %v1982_v14 = vpack.c.bf16 %v1966_v28, %v1966_v28  ;;  %v1169_v56 = vadd.f32 %v1168_v13, %v1167_v29  ;;  %v8754_v6 = vunpack.c.l.b16 %v1404_v45 }
 0x3d5   :  { %v2223_v29 = vmul.f32 %v8019_v48, %v8592_v11  ;;  %v1158_v37 = vadd.f32 %v10543_v23, %v8618_v39  ;;  %v2366_v35 = vpack.c.bf16 %v2350_v50, %v2350_v50  ;;  %v1697_v48 = vpack.c.bf16 %v8665_v47, %v8665_v47  ;;  %v10638_v47 = vld [vmem:[#allocation27_spill] sm:$0xff] }
 0x3d6   :  { %v8748_v30 = vunpack.c.l.b16 %v1709_v26  ;;  %v8756_v33 = vunpack.c.l.b16 %v1982_v14  ;;  %v1170_v28 = vrot.slane %v1169_v56, 1  ;;  %v2403_v7 = vpack.c.b16 %v8737_v19, %v8754_v6  ;;  %v10599_v19 = vld [vmem:[#allocation91_spill] sm:$0xff]  ;;  %v10600_v6 = vld [vmem:[#allocation13_spill] sm:$0xff] }
 0x3d7   :  { %v2239_v34 = vpack.c.bf16 %v2223_v29, %v2223_v29  ;;  %v8773_v11 = vunpack.c.l.b16 %v2365_v53  ;;  %v8775_v39 = vunpack.c.l.b16 %v2366_v35  ;;  %v10544_v45 = vpack.c.bf16 %v10526_v60, %v10526_v60 }
 0x3d8   :  { %v2506_v3 = vpack.c.b16 %v8748_v30, %v8682_v43  ;;  %v1171_v26 = vadd.f32 %v1170_v28, %v1169_v56  ;;  %v8782_v2 = vunpack.c.l.b16 %v2238_v41  ;;  %v1179_v0 = vmul.f32 %v8661_v18, %v1158_v37  ;;  %v10584_v30 = vld [vmem:[#allocation83_spill] sm:$0xff] }
 0x3d9   :  { %v8780_v14 = vunpack.c.l.b16 %v10544_v45  ;;  %v8784_v50 = vunpack.c.l.b16 %v2239_v34  ;;  %v2351_v53 = vmul.f32 %v8077_v38, %v8628_v9  ;;  %v10545_v29 = vpack.c.bf16 %v8274_v22, %v8274_v22  ;;  %v5970_v38 = vld [vmem:[%s10421_s2 + $0xf0] sm:$0xff]  ;;  %s10785_s2 = sld [smem:[#allocation145_spill]] }
 0x3da   :  { %v1180_v56 = vmul.f32 %v8661_v18, %v1171_v26  ;;  %v10546_v23 = vpack.c.bf16 %v8323_v42, %v8323_v42  ;;  %v2224_v18 = vmul.f32 %v8602_v17, %v8655_v25  ;;  %v2486_v41 = vunpack.c.l.b16 %v1697_v48  ;;  %v10557_v42 = vld [vmem:[#allocation14_spill] sm:$0xff] }
 0x3db   :  { %v2437_v60 = vunpack.c.l.b16 %v10545_v29  ;;  %v10547_v34 = vpack.c.bf16 %v8454_v21, %v8454_v21  ;;  %v2352_v17 = vmul.f32 %v8071_v10, %v1565_v51  ;;  %v2367_v25 = vpack.c.bf16 %v2351_v53, %v2351_v53  ;;  %4299 = vperm.xlu2 %6467, %v5970_v38   ;;  %v10549_v29 = vld [vmem:[#allocation10_spill] sm:$0xff]  ;;  %v10551_v53 = vld [vmem:[#allocation11_spill] sm:$0xff] }
 0x3dc   :  { %v8798_v28 = vunpack.c.l.b16 %v10546_v23  ;;  %v1204_v35 = vsel %vm1203_vm9, %v1180_v56, %v1179_v0  ;;  %v2240_v9 = vpack.c.bf16 %v2224_v18, %v2224_v18  ;;  %v10548_v48 = vpack.c.bf16 %v8169_v4, %v8169_v4  ;;  %v10550_v4 = vld [vmem:[#allocation77_spill] sm:$0xff]  ;;  %v10560_v21 = vld [vmem:[#allocation114_spill] sm:$0xff] }
 0x3dd   :  { %1222 = vmatmul.f32.vlgmr.msrb.gmra.mxu1 %v1204_v35  ;;  %v2452_v22 = vpack.c.b16 %v8511_v8, %v2437_v60  ;;  %v2485_v26 = vunpack.c.l.b16 %v10547_v34  ;;  %v2368_v56 = vpack.c.bf16 %v2352_v17, %v2352_v17  ;;  %v1522_v60 = vmul.f32 %v10549_v29, %v7915_v44  ;;  %v10552_v18 = vld [vmem:[#allocation97_spill] sm:$0xff]  ;;  %v10553_v35 = vld [vmem:[#allocation31_spill] sm:$0xff]  ;;  %v10555_v44 = vld [vmem:[#allocation12_spill] sm:$0xff] }
 0x3de   :  { %v8818_v45 = vunpack.c.l.b16 %v10548_v48  ;;  %v8820_v0 = vunpack.c.l.b16 %v2240_v9  ;;  %v8826_v10 = vunpack.c.l.b16 %v2367_v25  ;;  %v1521_v23 = vmul.f32 %v10551_v53, %v10550_v4  ;;  %v10554_v9 = vld [vmem:[#allocation90_spill] sm:$0xff] }
 0x3df   :  { %3445 = vmatmul.bf16.gmra.mxu3 %v2452_v22  ;;  %v2500_v8 = vpack.c.b16 %v2486_v41, %v2485_v26  ;;  %v8828_v51 = vunpack.c.l.b16 %v2368_v56  ;;  %v1683_v38 = vmul.f32 %v10553_v35, %v10552_v18  ;;  %v1538_v22 = vpack.c.bf16 %v1522_v60, %v1522_v60  ;;  %v10556_v53 = vld [vmem:[#allocation102_spill] sm:$0xff]  ;;  %v10558_v35 = vld [vmem:[#allocation92_spill] sm:$0xff] }
 0x3e0   :  { %v1682_v34 = vmul.f32 %v10555_v44, %v10554_v9  ;;  %v1537_v26 = vpack.c.bf16 %v1521_v23, %v1521_v23  ;;  %v1524_v18 = vmul.f32 %v10557_v42, %v10556_v53  ;;  %v1523_v60 = vmul.f32 %v10559_v59, %v10558_v35  ;;  %v10561_v41 = vld [vmem:[#allocation36_spill] sm:$0xff] }
 0x3e1   :  { %v1699_v17 = vpack.c.bf16 %v1683_v38, %v1683_v38  ;;  %v2440_v48 = vunpack.c.l.b16 %v1538_v22  ;;  %v1685_v9 = vmul.f32 %v10561_v41, %v10560_v21  ;;  %v10562_v38 = vld [vmem:[#allocation104_spill] sm:$0xff]  ;;  %v10565_v21 = vld [vmem:[#allocation19_spill] sm:$0xff]  ;;  %v10640_v13 = vpack.c.b16 %v10638_v47, %v10639_v57  ;;  %v10645_v57 = vld [vmem:[#allocation133_spill] sm:$0xff] }
 0x3e2   :  { %3494 = vmatmul.bf16.gmra.mxu0 %v2500_v8  ;;  %v1698_v25 = vpack.c.bf16 %v1682_v34, %v1682_v34  ;;  %v2439_v8 = vunpack.c.l.b16 %v1537_v26  ;;  %v1540_v23 = vpack.c.bf16 %v1524_v18, %v1524_v18  ;;  %v10563_v22 = vld [vmem:[#allocation16_spill] sm:$0xff]  ;;  %v1539_v34 = vpack.c.bf16 %v1523_v60, %v1523_v60 }
 0x3e3   :  { %v2488_v56 = vunpack.c.l.b16 %v1699_v17  ;;  %v1684_v44 = vmul.f32 %v10563_v22, %v10562_v38  ;;  %v1701_v26 = vpack.c.bf16 %v1685_v9, %v1685_v9  ;;  %v1525_v41 = vmul.f32 %v10565_v21, %v8042_v1  ;;  %v6353_v9 = vld [vmem:[%s10207_s12 + $0x138] sm:$0xff]  ;;  %v6352_v1 = vld [vmem:[%s10207_s12 + $0x130] sm:$0xff]  ;;  %v6351_v22 = vld [vmem:[%s10207_s12 + $0x128] sm:$0xff] }
 0x3e4   :  { %v2453_v29 = vpack.c.b16 %v2440_v48, %v2439_v8  ;;  %v2487_v24 = vunpack.c.l.b16 %v1698_v25  ;;  %v2442_v17 = vunpack.c.l.b16 %v1540_v23  ;;  %v2441_v25 = vunpack.c.l.b16 %v1539_v34  ;;  %3579 = vmatpush.bf16.msra.mxu3 %v6353_v9  ;;  %v6360_v38 = vld [vmem:[%s10207_s12 + $0x170] sm:$0xff]  ;;  %v6358_v34 = vld [vmem:[%s10207_s12 + $0x160] sm:$0xff]  ;;  %v6317_v9 = vld [vmem:[%s10207_s12 + $0x18] sm:$0xff] }
 0x3e5   :  { %v1700_v48 = vpack.c.bf16 %v1684_v44, %v1684_v44  ;;  %v1541_v53 = vpack.c.bf16 %v1525_v41, %v1525_v41  ;;  %v10566_v23 = vpack.c.b16 %v8249_v36, %v8247_v12  ;;  %v6359_v36 = vld [vmem:[%s10207_s12 + $0x168] sm:$0xff]  ;;  %v6350_v12 = vld [vmem:[%s10207_s12 + $0x120] sm:$0xff]  ;;  %v10567_v44 = vpack.c.b16 %v8313_v54, %v8311_v63  ;;  %v6321_v54 = vld [vmem:[%s10207_s12 + $0x38] sm:$0xff] }
 0x3e6   :  { %v2501_v4 = vpack.c.b16 %v2488_v56, %v2487_v24  ;;  %v2490_v24 = vunpack.c.l.b16 %v1701_v26  ;;  %v2454_v8 = vpack.c.b16 %v2442_v17, %v2441_v25  ;;  %v1228_v26 = vld [vmem:[%s10211_s16 + $0x8] sm:$0xff]  ;;  %v6349_v17 = vld [vmem:[%s10207_s12 + $0x118] sm:$0xff]  ;;  %v10568_v63 = vpack.c.b16 %v8437_v49, %v8435_v58  ;;  %v6356_v58 = vld [vmem:[%s10207_s12 + $0x150] sm:$0xff] }
 0x3e7   :  { %v2489_v56 = vunpack.c.l.b16 %v1700_v48  ;;  %v2443_v35 = vunpack.c.l.b16 %v1541_v53  ;;  %1250 = vmatpush.msra.mxu1 %v1228_v26  ;;  %v1227_v48 = vld [vmem:[%s10211_s16] sm:$0xff]  ;;  %v6357_v25 = vld [vmem:[%s10207_s12 + $0x158] sm:$0xff]  ;;  %v6347_v49 = vld [vmem:[%s10207_s12 + $0x108] sm:$0xff] }
 0x3e8   :  { %3580 = vmatpush.bf16.msra.mxu3 %v6352_v1  ;;  %v10569_v21 = vld [vmem:[#allocation9_spill] sm:$0xff]  ;;  %v10570_v41 = vld [vmem:[#allocation72_spill] sm:$0xff]  ;;  %v10581_v26 = vld [vmem:[#allocation79_spill] sm:$0xff] }
 0x3e9   :  { %v2502_v42 = vpack.c.b16 %v2490_v24, %v2489_v56  ;;  %1251 = vmatpush.msra.mxu1 %v1227_v48  ;;  %v6348_v24 = vld [vmem:[%s10207_s12 + $0x110] sm:$0xff]  ;;  %v6319_v56 = vld [vmem:[%s10207_s12 + $0x28] sm:$0xff]  ;;  %v6354_v53 = vld [vmem:[%s10207_s12 + $0x140] sm:$0xff] }
 0x3ea   :  { %v10576_v1 = vld [vmem:[#allocation32_spill] sm:$0xff] }
 0x3eb   :  { %3383 = vmatpush.bf16.msrb.mxu1 %v6321_v54 }
 0x3ec   :  { %3581 = vmatpush.bf16.msra.mxu3 %v6351_v22  ;;  %v6315_v22 = vld [vmem:[%s10207_s12 + $0x8] sm:$0xff] }
 0x3ef   :  { %3450 = vmatmul.bf16.gmra.mxu3 %v2453_v29  ;;  %v10564_v29 = vld [vmem:[#allocation18_spill] sm:$0xff] }
 0x3f0   :  { %v1526_v59 = vmul.f32 %v10564_v29, %v8091_v61  ;;  %v6361_v61 = vld [vmem:[%s10207_s12 + $0x178] sm:$0xff]  ;;  %3582 = vmatpush.bf16.msra.mxu3 %v6350_v12  ;;  %v6346_v29 = vld [vmem:[%s10207_s12 + $0x100] sm:$0xff]  ;;  %v10578_v12 = vld [vmem:[#allocation70_spill] sm:$0xff] }
 0x3f1   :  { %3628 = vmatpush.bf16.msrb.mxu0 %v6361_v61  ;;  %v10575_v61 = vld [vmem:[#allocation54_spill] sm:$0xff] }
 0x3f2   :  { %3499 = vmatmul.bf16.gmra.mxu0 %v2501_v4  ;;  %v1542_v4 = vpack.c.bf16 %v1526_v59, %v1526_v59  ;;  %v6318_v59 = vld [vmem:[%s10207_s12 + $0x20] sm:$0xff] }
 0x3f4   :  { %v2444_v18 = vunpack.c.l.b16 %v1542_v4  ;;  %3583 = vmatpush.bf16.msra.mxu3 %v6349_v17  ;;  %v10571_v4 = vpack.c.b16 %v10569_v21, %v10570_v41  ;;  %v10582_v17 = vld [vmem:[#allocation78_spill] sm:$0xff]  ;;  %v10590_v41 = vld [vmem:[#allocation100_spill] sm:$0xff] }
 0x3f5   :  { %3629 = vmatpush.bf16.msrb.mxu0 %v6360_v38  ;;  %v10577_v38 = vpack.c.b16 %v10575_v61, %v10576_v1  ;;  %v10583_v48 = vpack.c.b16 %v10581_v26, %v10582_v17  ;;  %v10596_v61 = vld [vmem:[#allocation81_spill] sm:$0xff]  ;;  %v10597_v1 = vld [vmem:[#allocation80_spill] sm:$0xff] }
 0x3f6   :  { %v2455_v60 = vpack.c.b16 %v2444_v18, %v2443_v35  ;;  %v10572_v18 = vld [vmem:[#allocation138_spill] sm:$0xff]  ;;  %v10573_v35 = vld [vmem:[#allocation137_spill] sm:$0xff]  ;;  %v10604_v17 = vld [vmem:[#allocation112_spill] sm:$0xff] }
 0x3f7   :  { %v10603_v26 = vld [vmem:[#allocation113_spill] sm:$0xff] }
 0x3f8   :  { %3584 = vmatpush.bf16.msra.mxu3 %v6348_v24 }
 0x3f9   :  { %3630 = vmatpush.bf16.msrb.mxu0 %v6359_v36  ;;  %v6314_v36 = vld [vmem:[%s10207_s12] sm:$0xff] }
 0x3fc   :  { %3585 = vmatpush.bf16.msra.mxu3 %v6347_v49  ;;  %v10587_v49 = vld [vmem:[#allocation94_spill] sm:$0xff] }
 0x3fd   :  { %3631 = vmatpush.bf16.msrb.mxu0 %v6358_v34 }
 0x3ff   :  { %3455 = vmatmul.bf16.gmra.mxu3 %v2454_v8  ;;  %v6320_v8 = vld [vmem:[%s10207_s12 + $0x30] sm:$0xff] }
 0x400   :  { %3384 = vmatpush.bf16.msrb.mxu1 %v6320_v8  ;;  %3586 = vmatpush.bf16.msra.mxu3 %v6346_v29 }
 0x401   :  { %3632 = vmatpush.bf16.msrb.mxu0 %v6357_v25 }
 0x402   :  { %3504 = vmatmul.bf16.gmra.mxu0 %v2502_v42  ;;  %v6355_v42 = vld [vmem:[%s10207_s12 + $0x148] sm:$0xff] }
 0x404   :  { %3385 = vmatpush.bf16.msrb.mxu1 %v6319_v56  ;;  %v10588_v56 = vld [vmem:[#allocation93_spill] sm:$0xff] }
 0x405   :  { %3633 = vmatpush.bf16.msrb.mxu0 %v6356_v58 }
 0x408   :  { %3386 = vmatpush.bf16.msrb.mxu1 %v6318_v59 }
 0x409   :  { %3634 = vmatpush.bf16.msrb.mxu0 %v6355_v42  ;;  %v10589_v42 = vpack.c.b16 %v10587_v49, %v10588_v56 }
 0x40c   :  { %3387 = vmatpush.bf16.msrb.mxu1 %v6317_v9 }
 0x40d   :  { %3635 = vmatpush.bf16.msrb.mxu0 %v6354_v53 }
 0x40f   :  { %3460 = vmatmul.bf16.gmra.mxu3 %v2455_v60  ;;  %v10574_v60 = vpack.c.b16 %v10572_v18, %v10573_v35  ;;  %v10593_v35 = vld [vmem:[#allocation109_spill] sm:$0xff] }
 0x412   :  { %3509 = vmatmul.bf16.gmra.mxu0 %v10566_v23  ;;  %v6316_v23 = vld [vmem:[%s10207_s12 + $0x10] sm:$0xff] }
 0x413   :  { %3388 = vmatpush.bf16.msrb.mxu1 %v6316_v23 }
 0x417   :  { %3389 = vmatpush.bf16.msrb.mxu1 %v6315_v22 }
 0x41b   :  { %3390 = vmatpush.bf16.msrb.mxu1 %v6314_v36  ;;  %v10601_v36 = vld [vmem:[#allocation86_spill] sm:$0xff] }
 0x41f   :  { %3465 = vmatmul.bf16.gmra.mxu3 %v10567_v44  ;;  %v10579_v44 = vld [vmem:[#allocation69_spill] sm:$0xff] }
 0x420   :  { %v10580_v34 = vpack.c.b16 %v10578_v12, %v10579_v44  ;;  %v10602_v12 = vld [vmem:[#allocation29_spill] sm:$0xff] }
 0x421   :  { %v1392_v44 = vmul.f32 %v10602_v12, %v10601_v36 }
 0x422   :  { %3514 = vmatmul.bf16.gmra.mxu0 %v10568_v63  ;;  %v6471_v63 = vld [vmem:[%s10210_s15] ss:$0 sm:$0xff] }
 0x42f   :  { %3470 = vmatmul.bf16.gmra.mxu3 %v10571_v4  ;;  %v10591_v4 = vld [vmem:[#allocation99_spill] sm:$0xff] }
 0x430   :  { %v10592_v53 = vpack.c.b16 %v10590_v41, %v10591_v4  ;;  %v10610_v41 = vld [vmem:[#allocation17_spill] sm:$0xff] }
 0x432   :  { %3519 = vmatmul.bf16.gmra.mxu0 %v10574_v60  ;;  %v10594_v60 = vld [vmem:[#allocation108_spill] sm:$0xff] }
 0x433   :  { %v10595_v9 = vpack.c.b16 %v10593_v35, %v10594_v60  ;;  %v10611_v35 = vld [vmem:[#allocation101_spill] sm:$0xff]  ;;  %v10612_v60 = vld [vmem:[#allocation34_spill] sm:$0xff] }
 0x43f   :  { %3475 = vmatmul.bf16.gmra.mxu3 %v10577_v38  ;;  %v10598_v38 = vpack.c.b16 %v10596_v61, %v10597_v1 }
 0x442   :  { %3524 = vmatmul.bf16.gmra.mxu0 %v2506_v3  ;;  %v10585_v3 = vld [vmem:[#allocation82_spill] sm:$0xff] }
 0x443   :  { %v10586_v58 = vpack.c.b16 %v10584_v30, %v10585_v3  ;;  %v10607_v30 = vld [vmem:[#allocation118_spill] sm:$0xff] }
 0x44f   :  { %3587 = vmatmul.bf16.vlgmr.msra.gmra.mxu3 %v10580_v34  ;;  %v8960_v8 = vpop.f32.mrf.mxu0 }
 0x452   :  { %3636 = vmatmul.bf16.vlgmr.msrb.gmra.mxu0 %v10583_v48  ;;  %v8958_v54 = vpop.f32.mrf.mxu3  ;;  %v10605_v48 = vpack.c.b16 %v10603_v26, %v10604_v17  ;;  %v10616_v26 = vld [vmem:[#allocation130_spill] sm:$0xff]  ;;  %v10617_v17 = vld [vmem:[#allocation129_spill] sm:$0xff] }
 0x457   :  { %v8971_v59 = vpop.f32.mrf.mxu0 }
 0x45a   :  { %v1223_v25 = vpop.f32.mrf.mxu1  ;;  %v8969_v29 = vpop.f32.mrf.mxu3 }
 0x45b   :  { %v1224_v24 = vadd.f32 %v6471_v63, %v1223_v25  ;;  %v1408_v63 = vpack.c.bf16 %v1392_v44, %v1392_v44  ;;  %v6377_v44 = vld [vmem:[%s10207_s12 + $0x1f8] sm:$0xff] }
 0x45c   :  { %3726 = vmatpush.bf16.msrb.mxu3 %v6377_v44  ;;  %v6374_v44 = vld [vmem:[%s10207_s12 + $0x1e0] sm:$0xff] }
 0x45d   :  { %v1226_v43 = vmax.f32 %v1224_v24, 0.0 }
 0x45f   :  { %5534 = vmatmul.msk.f32.vlgmr.msra.gmra.mxu1 %vm126_vm4, %v1226_v43  ;;  %3592 = vmatmul.bf16.gmra.mxu3 %v10586_v58  ;;  %v8981_v18 = vpop.f32.mrf.mxu0  ;;  %v10606_v43 = vld [vmem:[#allocation119_spill] sm:$0xff]  ;;  %v2391_v58 = vunpack.c.l.b16 %v1408_v63 }
 0x460   :  { %v10608_v3 = vpack.c.b16 %v10606_v43, %v10607_v30  ;;  %v6385_v30 = vld [vmem:[%s10207_s12 + $0x238] sm:$0xff] }
 0x461   :  { %3775 = vmatpush.bf16.msra.mxu0 %v6385_v30  ;;  %v6382_v30 = vld [vmem:[%s10207_s12 + $0x220] sm:$0xff] }
 0x462   :  { %3641 = vmatmul.bf16.gmra.mxu0 %v10589_v42  ;;  %v8976_v21 = vpop.f32.mrf.mxu3  ;;  %v10609_v42 = vld [vmem:[#allocation107_spill] sm:$0xff] }
 0x463   :  { %v1395_v4 = vmul.f32 %v10610_v41, %v10609_v42  ;;  %v10620_v41 = vld [vmem:[#allocation20_spill] sm:$0xff] }
 0x465   :  { %v1411_v61 = vpack.c.bf16 %v1395_v4, %v1395_v4 }
 0x467   :  { %3391 = vmatmul.bf16.vlgmr.msrb.gmra.mxu1 %v2403_v7  ;;  %v1393_v7 = vmul.f32 %v10600_v6, %v10599_v19  ;;  %v8993_v22 = vpop.f32.mrf.mxu0  ;;  %v10614_v6 = vld [vmem:[#allocation122_spill] sm:$0xff] }
 0x469   :  { %v1409_v34 = vpack.c.bf16 %v1393_v7, %v1393_v7 }
 0x46a   :  { %v8986_v23 = vpop.f32.mrf.mxu3 }
 0x46b   :  { %v2392_v24 = vunpack.c.l.b16 %v1409_v34  ;;  %v2394_v34 = vunpack.c.l.b16 %v1411_v61  ;;  %v10621_v61 = vld [vmem:[#allocation115_spill] sm:$0xff] }
 0x46d   :  { %v2405_v56 = vpack.c.b16 %v2392_v24, %v2391_v58 }
 0x46f   :  { %3597 = vmatmul.bf16.gmra.mxu3 %v10592_v53  ;;  %v9005_v49 = vpop.f32.mrf.mxu0 }
 0x472   :  { %3646 = vmatmul.bf16.gmra.mxu0 %v10595_v9  ;;  %v9000_v25 = vpop.f32.mrf.mxu3  ;;  %v1394_v9 = vmul.f32 %v10612_v60, %v10611_v35  ;;  %v6384_v60 = vld [vmem:[%s10207_s12 + $0x230] sm:$0xff] }
 0x473   :  { %3776 = vmatpush.bf16.msra.mxu0 %v6384_v60  ;;  %v10627_v60 = vld [vmem:[#allocation73_spill] sm:$0xff] }
 0x474   :  { %v1410_v12 = vpack.c.bf16 %v1394_v9, %v1394_v9  ;;  %v6375_v9 = vld [vmem:[%s10207_s12 + $0x1e8] sm:$0xff] }
 0x476   :  { %v2393_v63 = vunpack.c.l.b16 %v1410_v12  ;;  %v6383_v12 = vld [vmem:[%s10207_s12 + $0x228] sm:$0xff] }
 0x477   :  { %3396 = vmatmul.bf16.gmra.mxu1 %v10598_v38  ;;  %v9013_v1 = vpop.f32.mrf.mxu0  ;;  %v10613_v38 = vld [vmem:[#allocation123_spill] sm:$0xff]  ;;  %3777 = vmatpush.bf16.msra.mxu0 %v6383_v12 }
 0x478   :  { %v10615_v7 = vpack.c.b16 %v10613_v38, %v10614_v6  ;;  %v2406_v43 = vpack.c.b16 %v2394_v34, %v2393_v63  ;;  %v10622_v38 = vld [vmem:[#allocation38_spill] sm:$0xff] }
 0x479   :  { %v1396_v6 = vmul.f32 %v10622_v38, %v10621_v61  ;;  %v6372_v12 = vld [vmem:[%s10207_s12 + $0x1d0] sm:$0xff] }
 0x47a   :  { %v9009_v53 = vpop.f32.mrf.mxu3 }
 0x47b   :  { %v1412_v63 = vpack.c.bf16 %v1396_v6, %v1396_v6  ;;  %3778 = vmatpush.bf16.msra.mxu0 %v6382_v30  ;;  %v6345_v6 = vld [vmem:[%s10207_s12 + $0xf8] sm:$0xff]  ;;  %v6380_v30 = vld [vmem:[%s10207_s12 + $0x210] sm:$0xff] }
 0x47c   :  { %3530 = vmatpush.bf16.msra.mxu1 %v6345_v6  ;;  %v6343_v6 = vld [vmem:[%s10207_s12 + $0xe8] sm:$0xff] }
 0x47d   :  { %v2395_v38 = vunpack.c.l.b16 %v1412_v63 }
 0x47f   :  { %3602 = vmatmul.bf16.gmra.mxu3 %v10605_v48  ;;  %v10618_v48 = vpack.c.b16 %v10616_v26, %v10617_v17  ;;  %v9032_v58 = vpop.f32.mrf.mxu0  ;;  %v10623_v26 = vld [vmem:[#allocation132_spill] sm:$0xff]  ;;  %v10624_v17 = vld [vmem:[#allocation131_spill] sm:$0xff] }
 0x482   :  { %3651 = vmatmul.bf16.gmra.mxu0 %v10608_v3  ;;  %v9024_v24 = vpop.f32.mrf.mxu3  ;;  %v6376_v3 = vld [vmem:[%s10207_s12 + $0x1f0] sm:$0xff] }
 0x483   :  { %3727 = vmatpush.bf16.msrb.mxu3 %v6376_v3  ;;  %v6373_v3 = vld [vmem:[%s10207_s12 + $0x1d8] sm:$0xff] }
 0x487   :  { %3401 = vmatmul.bf16.gmra.mxu1 %v2405_v56  ;;  %v10619_v56 = vld [vmem:[#allocation117_spill] sm:$0xff]  ;;  %3728 = vmatpush.bf16.msrb.mxu3 %v6375_v9 }
 0x488   :  { %v1397_v4 = vmul.f32 %v10620_v41, %v10619_v56  ;;  %v9061_v41 = vpop.f32.mrf.mxu0 }
 0x48a   :  { %v9050_v34 = vpop.f32.mrf.mxu3 }
 0x48b   :  { %3729 = vmatpush.bf16.msrb.mxu3 %v6374_v44 }
 0x48f   :  { %3607 = vmatmul.bf16.gmra.mxu3 %v10615_v7  ;;  %v1413_v7 = vpack.c.bf16 %v1397_v4, %v1397_v4  ;;  %v10626_v4 = vld [vmem:[#allocation71_spill] sm:$0xff] }
 0x490   :  { %v10628_v9 = vpack.c.b16 %v10626_v4, %v10627_v60  ;;  %3730 = vmatpush.bf16.msrb.mxu3 %v6373_v3  ;;  %v6371_v3 = vld [vmem:[%s10207_s12 + $0x1c8] sm:$0xff]  ;;  %v10632_v4 = vld [vmem:[#allocation124_spill] sm:$0xff]  ;;  %v10633_v60 = vld [vmem:[#allocation39_spill] sm:$0xff] }
 0x492   :  { %3656 = vmatmul.bf16.gmra.mxu0 %v10618_v48  ;;  %v10625_v48 = vpack.c.b16 %v10623_v26, %v10624_v17  ;;  %v9075_v44 = vpop.f32.mrf.mxu3  ;;  %v10630_v17 = vld [vmem:[#allocation128_spill] sm:$0xff] }
 0x493   :  { %10629 = vst [vmem:[#allocation56_spill] sm:$0xff] %v9075_v44 }
 0x494   :  { %3731 = vmatpush.bf16.msrb.mxu3 %v6372_v12  ;;  %v6370_v12 = vld [vmem:[%s10207_s12 + $0x1c0] sm:$0xff] }
 0x497   :  { %3406 = vmatmul.bf16.gmra.mxu1 %v2406_v43  ;;  %v2396_v43 = vunpack.c.l.b16 %v1413_v7  ;;  %v6381_v7 = vld [vmem:[%s10207_s12 + $0x218] sm:$0xff] }
 0x498   :  { %3779 = vmatpush.bf16.msra.mxu0 %v6381_v7  ;;  %v6379_v7 = vld [vmem:[%s10207_s12 + $0x208] sm:$0xff]  ;;  %3732 = vmatpush.bf16.msrb.mxu3 %v6371_v3  ;;  %v6378_v3 = vld [vmem:[%s10207_s12 + $0x200] sm:$0xff] }
 0x499   :  { %v2407_v26 = vpack.c.b16 %v2396_v43, %v2395_v38  ;;  %v6344_v43 = vld [vmem:[%s10207_s12 + $0xf0] sm:$0xff]  ;;  %v9090_v38 = vpop.f32.mrf.mxu0 }
 0x49a   :  { %10634 = vst [vmem:[#allocation8_spill] sm:$0xff] %v9090_v38  ;;  %3531 = vmatpush.bf16.msra.mxu1 %v6344_v43  ;;  %v9113_v40 = vpop.f32.mrf.mxu3 }
 0x49b   :  { %10641 = vst [vmem:[#allocation35_spill] sm:$0xff] %v9113_v40 }
 0x49c   :  { %3780 = vmatpush.bf16.msra.mxu0 %v6380_v30  ;;  %v6342_v30 = vld [vmem:[%s10207_s12 + $0xe0] sm:$0xff]  ;;  %3733 = vmatpush.bf16.msrb.mxu3 %v6370_v12 }
 0x49e   :  { %3532 = vmatpush.bf16.msra.mxu1 %v6343_v6  ;;  %v6341_v6 = vld [vmem:[%s10207_s12 + $0xd8] sm:$0xff] }
 0x49f   :  { %3612 = vmatmul.bf16.gmra.mxu3 %v10625_v48  ;;  %v10631_v48 = vld [vmem:[#allocation22_spill] sm:$0xff] }
 0x4a0   :  { %v1399_v63 = vmul.f32 %v10631_v48, %v10630_v17  ;;  %v10635_v48 = vld [vmem:[#allocation135_spill] sm:$0xff]  ;;  %3781 = vmatpush.bf16.msra.mxu0 %v6379_v7 }
 0x4a1   :  { %v10643_v7 = vld [vmem:[#allocation23_spill] sm:$0xff] }
 0x4a2   :  { %3661 = vmatmul.bf16.gmra.mxu0 %v10628_v9  ;;  %v1398_v9 = vmul.f32 %v10633_v60, %v10632_v4  ;;  %v10636_v60 = vld [vmem:[#allocation25_spill] sm:$0xff]  ;;  %3533 = vmatpush.bf16.msra.mxu1 %v6342_v30  ;;  %v9124_v12 = vpop.f32.mrf.mxu3  ;;  %v10648_v30 = vpack.c.b16 %v8734_v27, %v8679_v55 }
 0x4a3   :  { %v10637_v37 = vpack.c.b16 %v10635_v48, %v10636_v60  ;;  %v10644_v48 = vld [vmem:[#allocation26_spill] sm:$0xff]  ;;  %10647 = vst [vmem:[#allocation6_spill] sm:$0xff] %v9124_v12  ;;  %v6338_v55 = vld [vmem:[%s10207_s12 + $0xc0] sm:$0xff] }
 0x4a4   :  { %3782 = vmatpush.bf16.msra.mxu0 %v6378_v3  ;;  %v1401_v60 = vmul.f32 %v10644_v48, %v10643_v7  ;;  %v10650_v48 = vpack.c.b16 %v8743_v32, %v8756_v33 }
 0x4a6   :  { %3534 = vmatpush.bf16.msra.mxu1 %v6341_v6  ;;  %v6339_v6 = vld [vmem:[%s10207_s12 + $0xc8] sm:$0xff] }
 0x4a7   :  { %3411 = vmatmul.bf16.gmra.mxu1 %v2407_v26  ;;  %v1415_v26 = vpack.c.bf16 %v1399_v63, %v1399_v63  ;;  %v1414_v63 = vpack.c.bf16 %v1398_v9, %v1398_v9 }
 0x4a9   :  { %v2398_v43 = vunpack.c.l.b16 %v1415_v26  ;;  %v9115_v26 = vpop.f32.mrf.mxu0 }
 0x4aa   :  { %10642 = vst [vmem:[#allocation47_spill] sm:$0xff] %v9115_v26  ;;  %v9143_v27 = vpop.f32.mrf.mxu3  ;;  %v10656_v26 = vld [vmem:[#allocation46_spill] sm:$0xff] }
 0x4ab   :  { %10651 = vst [vmem:[#allocation10_spill] sm:$0xff] %v9143_v27  ;;  %v1402_v32 = vmul.f32 %v10656_v26, %v10655_v16  ;;  %v10661_v27 = vld [vmem:[#allocation89_spill] sm:$0xff] }
 0x4af   :  { %3617 = vmatmul.bf16.gmra.mxu3 %v10637_v37  ;;  %v2397_v37 = vunpack.c.l.b16 %v1414_v63  ;;  %v1417_v63 = vpack.c.bf16 %v1401_v60, %v1401_v60 }
 0x4b1   :  { %v2408_v9 = vpack.c.b16 %v2398_v43, %v2397_v37  ;;  %v6340_v43 = vld [vmem:[%s10207_s12 + $0xd0] sm:$0xff]  ;;  %v9132_v37 = vpop.f32.mrf.mxu0 }
 0x4b2   :  { %3666 = vmatmul.bf16.gmra.mxu0 %v10640_v13  ;;  %v10646_v13 = vld [vmem:[#allocation43_spill] sm:$0xff]  ;;  %3535 = vmatpush.bf16.msra.mxu1 %v6340_v43  ;;  %10649 = vst [vmem:[#allocation57_spill] sm:$0xff] %v9132_v37 }
 0x4b3   :  { %v1400_v47 = vmul.f32 %v10646_v13, %v10645_v57 }
 0x4b5   :  { %v1416_v3 = vpack.c.bf16 %v1400_v47, %v1400_v47  ;;  %v10652_v47 = vld [vmem:[#allocation28_spill] sm:$0xff] }
 0x4b6   :  { %3536 = vmatpush.bf16.msra.mxu1 %v6339_v6  ;;  %v10658_v6 = vld [vmem:[#allocation87_spill] sm:$0xff] }
 0x4b7   :  { %3416 = vmatmul.bf16.gmra.mxu1 %v2408_v9  ;;  %v2400_v9 = vunpack.c.l.b16 %v1417_v63  ;;  %v2399_v60 = vunpack.c.l.b16 %v1416_v3  ;;  %v10653_v63 = vld [vmem:[#allocation33_spill] sm:$0xff]  ;;  %v10657_v3 = vld [vmem:[#allocation84_spill] sm:$0xff] }
 0x4b8   :  { %v1403_v43 = vmul.f32 %v10653_v63, %v10652_v47 }
 0x4b9   :  { %v2409_v13 = vpack.c.b16 %v2400_v9, %v2399_v60  ;;  %v10659_v9 = vpack.c.b16 %v10657_v3, %v10658_v6  ;;  %v9154_v60 = vpop.f32.mrf.mxu3  ;;  %v10668_v3 = vld [vmem:[#allocation95_spill] sm:$0xff] }
 0x4ba   :  { %3537 = vmatpush.bf16.msra.mxu1 %v6338_v55  ;;  %v1419_v33 = vpack.c.bf16 %v1403_v43, %v1403_v43  ;;  %10660 = vst [vmem:[#allocation11_spill] sm:$0xff] %v9154_v60 }
 0x4bc   :  { %v2402_v40 = vunpack.c.l.b16 %v1419_v33  ;;  %v10671_v33 = vld [vmem:[#allocation106_spill] sm:$0xff] }
 0x4bf   :  { %3622 = vmatmul.bf16.gmra.mxu3 %v10648_v30  ;;  %v9147_v30 = vpop.f32.mrf.mxu0 }
 0x4c0   :  { %10654 = vst [vmem:[#allocation77_spill] sm:$0xff] %v9147_v30 }
 0x4c1   :  { %v9161_v62 = vpop.f32.mrf.mxu3 }
 0x4c2   :  { %3671 = vmatmul.bf16.gmra.mxu0 %v10650_v48  ;;  %v1418_v48 = vpack.c.bf16 %v1402_v32, %v1402_v32  ;;  %10665 = vst [vmem:[#allocation31_spill] sm:$0xff] %v9161_v62  ;;  %v10669_v32 = vld [vmem:[#allocation98_spill] sm:$0xff] }
 0x4c3   :  { %v10670_v6 = vpack.c.b16 %v10668_v3, %v10669_v32  ;;  %v10679_v3 = vld [vmem:[#allocation37_spill] sm:$0xff] }
 0x4c4   :  { %v2401_v52 = vunpack.c.l.b16 %v1418_v48 }
 0x4c6   :  { %v2410_v30 = vpack.c.b16 %v2402_v40, %v2401_v52  ;;  %v10675_v52 = vpack.c.b16 %v8574_v20, %v8716_v31 }
 0x4c7   :  { %3421 = vmatmul.bf16.gmra.mxu1 %v2409_v13  ;;  %v10662_v13 = vld [vmem:[#allocation88_spill] sm:$0xff]  ;;  %v9159_v63 = vpop.f32.mrf.mxu0 }
 0x4c8   :  { %v10663_v55 = vpack.c.b16 %v10661_v27, %v10662_v13  ;;  %10664 = vst [vmem:[#allocation97_spill] sm:$0xff] %v9159_v63 }
 0x4c9   :  { %v9175_v48 = vpop.f32.mrf.mxu3 }
 0x4ca   :  { %10674 = vst [vmem:[#allocation102_spill] sm:$0xff] %v9175_v48 }
 0x4cf   :  { %3734 = vmatmul.bf16.vlgmr.msrb.gmra.mxu3 %v10659_v9  ;;  %v9165_v43 = vpop.f32.mrf.mxu0  ;;  %v10672_v9 = vld [vmem:[#allocation105_spill] sm:$0xff] }
 0x4d0   :  { %10667 = vst [vmem:[#allocation12_spill] sm:$0xff] %v9165_v43  ;;  %v10673_v60 = vpack.c.b16 %v10671_v33, %v10672_v9  ;;  %v10681_v9 = vld [vmem:[#allocation111_spill] sm:$0xff]  ;;  %v10682_v43 = vld [vmem:[#allocation110_spill] sm:$0xff] }
 0x4d1   :  { %v10683_v62 = vpack.c.b16 %v10681_v9, %v10682_v43 }
 0x4d2   :  { %3783 = vmatmul.bf16.vlgmr.msra.gmra.mxu0 %v10663_v55  ;;  %v10678_v55 = vld [vmem:[#allocation74_spill] sm:$0xff] }
 0x4d3   :  { %v1809_v32 = vmul.f32 %v10679_v3, %v10678_v55  ;;  %v10689_v3 = vld [vmem:[#allocation40_spill] sm:$0xff] }
 0x4d5   :  { %v1825_v63 = vpack.c.bf16 %v1809_v32, %v1809_v32 }
 0x4d7   :  { %3426 = vmatmul.bf16.gmra.mxu1 %v2410_v30  ;;  %v9180_v40 = vpop.f32.mrf.mxu0  ;;  %v10677_v30 = vld [vmem:[#allocation52_spill] sm:$0xff] }
 0x4d8   :  { %10676 = vst [vmem:[#allocation14_spill] sm:$0xff] %v9180_v40  ;;  %v1810_v13 = vmul.f32 %v10677_v30, %v10601_v36  ;;  %v2533_v30 = vunpack.c.l.b16 %v1825_v63 }
 0x4da   :  { %v1826_v33 = vpack.c.bf16 %v1810_v13, %v1810_v13 }
 0x4dc   :  { %v9163_v26 = vpop.f32.mrf.mxu1  ;;  %v2534_v20 = vunpack.c.l.b16 %v1826_v33 }
 0x4dd   :  { %10666 = vst [vmem:[#allocation90_spill] sm:$0xff] %v9163_v26  ;;  %v10686_v26 = vld [vmem:[#allocation120_spill] sm:$0xff] }
 0x4de   :  { %v2548_v55 = vpack.c.b16 %v2534_v20, %v2533_v30  ;;  %v10695_v30 = vld [vmem:[#allocation134_spill] sm:$0xff] }
 0x4df   :  { %3739 = vmatmul.bf16.gmra.mxu3 %v10670_v6  ;;  %v9193_v31 = vpop.f32.mrf.mxu0 }
 0x4e0   :  { %10684 = vst [vmem:[#allocation15_spill] sm:$0xff] %v9193_v31 }
 0x4e2   :  { %3788 = vmatmul.bf16.gmra.mxu0 %v10673_v60  ;;  %v9188_v60 = vpop.f32.mrf.mxu3 }
 0x4e3   :  { %10680 = vst [vmem:[#allocation92_spill] sm:$0xff] %v9188_v60  ;;  %v1812_v60 = vmul.f32 %v10689_v3, %v10611_v35 }
 0x4e4   :  { %v9173_v27 = vpop.f32.mrf.mxu1 }
 0x4e5   :  { %v1828_v9 = vpack.c.bf16 %v1812_v60, %v1812_v60  ;;  %v10700_v60 = vld [vmem:[#allocation41_spill] sm:$0xff] }
 0x4e6   :  { %v1814_v12 = vmul.f32 %v10700_v60, %v10621_v61 }
 0x4e7   :  { %3538 = vmatmul.bf16.vlgmr.msra.gmra.mxu1 %v10675_v52  ;;  %v10685_v52 = vld [vmem:[#allocation121_spill] sm:$0xff]  ;;  %v9206_v32 = vpop.f32.mrf.mxu0  ;;  %v2536_v20 = vunpack.c.l.b16 %v1828_v9 }
 0x4e8   :  { %v10687_v40 = vpack.c.b16 %v10685_v52, %v10686_v26  ;;  %10691 = vst [vmem:[#allocation36_spill] sm:$0xff] %v9206_v32  ;;  %v10692_v26 = vld [vmem:[#allocation126_spill] sm:$0xff] }
 0x4ea   :  { %v9200_v13 = vpop.f32.mrf.mxu3 }
 0x4eb   :  { %10688 = vst [vmem:[#allocation114_spill] sm:$0xff] %v9200_v13 }
 0x4ec   :  { %v9186_v6 = vpop.f32.mrf.mxu1 }
 0x4ef   :  { %3744 = vmatmul.bf16.gmra.mxu3 %v10683_v62  ;;  %v10690_v62 = vld [vmem:[#allocation55_spill] sm:$0xff]  ;;  %v9220_v32 = vpop.f32.mrf.mxu0 }
 0x4f0   :  { %v1811_v43 = vmul.f32 %v10690_v62, %v10599_v19  ;;  %10699 = vst [vmem:[#allocation16_spill] sm:$0xff] %v9220_v32  ;;  %v10707_v32 = vld [vmem:[#allocation30_spill] sm:$0xff] }
 0x4f2   :  { %3793 = vmatmul.bf16.gmra.mxu0 %v10687_v40  ;;  %v10693_v40 = vld [vmem:[#allocation125_spill] sm:$0xff]  ;;  %v1827_v52 = vpack.c.bf16 %v1811_v43, %v1811_v43  ;;  %v9216_v13 = vpop.f32.mrf.mxu3 }
 0x4f3   :  { %v10694_v63 = vpack.c.b16 %v10692_v26, %v10693_v40  ;;  %10698 = vst [vmem:[#allocation104_spill] sm:$0xff] %v9216_v13  ;;  %v10701_v26 = vld [vmem:[#allocation42_spill] sm:$0xff] }
 0x4f4   :  { %v9198_v48 = vpop.f32.mrf.mxu1  ;;  %v2535_v3 = vunpack.c.l.b16 %v1827_v52  ;;  %v1813_v43 = vmul.f32 %v10701_v26, %v10609_v42 }
 0x4f6   :  { %v2549_v62 = vpack.c.b16 %v2536_v20, %v2535_v3 }
 0x4f7   :  { %3543 = vmatmul.bf16.gmra.mxu1 %v2548_v55  ;;  %v10696_v55 = vld [vmem:[#allocation24_spill] sm:$0xff]  ;;  %v9233_v20 = vpop.f32.mrf.mxu0 }
 0x4f8   :  { %v10697_v31 = vpack.c.b16 %v10695_v30, %v10696_v55  ;;  %v10704_v30 = vld [vmem:[#allocation48_spill] sm:$0xff]  ;;  %v1829_v55 = vpack.c.bf16 %v1813_v43, %v1813_v43 }
 0x4f9   :  { %v10712_v43 = vld [vmem:[#allocation44_spill] sm:$0xff] }
 0x4fa   :  { %v9228_v40 = vpop.f32.mrf.mxu3  ;;  %v2537_v60 = vunpack.c.l.b16 %v1829_v55 }
 0x4fb   :  { %10702 = vst [vmem:[#allocation18_spill] sm:$0xff] %v9228_v40 }
 0x4fc   :  { %v9208_v33 = vpop.f32.mrf.mxu1 }
 0x4ff   :  { %3749 = vmatmul.bf16.gmra.mxu3 %v10694_v63  ;;  %v10703_v63 = vld [vmem:[#allocation68_spill] sm:$0xff] }
 0x500   :  { %v10705_v52 = vpack.c.b16 %v10703_v63, %v10704_v30  ;;  %v9244_v63 = vpop.f32.mrf.mxu0  ;;  %v1815_v30 = vmul.f32 %v10712_v43, %v10619_v56 }
 0x501   :  { %10711 = vst [vmem:[#allocation9_spill] sm:$0xff] %v9244_v63 }
 0x502   :  { %3798 = vmatmul.bf16.gmra.mxu0 %v10697_v31  ;;  %v1830_v31 = vpack.c.bf16 %v1814_v12, %v1814_v12  ;;  %v9240_v44 = vpop.f32.mrf.mxu3  ;;  %v10710_v12 = vld [vmem:[#allocation58_spill] sm:$0xff] }
 0x503   :  { %10709 = vst [vmem:[#allocation19_spill] sm:$0xff] %v9240_v44  ;;  %v1816_v40 = vmul.f32 %v10710_v12, %v10632_v4 }
 0x504   :  { %v9218_v37 = vpop.f32.mrf.mxu1  ;;  %v2538_v3 = vunpack.c.l.b16 %v1830_v31 }
 0x506   :  { %v2550_v26 = vpack.c.b16 %v2538_v3, %v2537_v60 }
 0x507   :  { %3548 = vmatmul.bf16.gmra.mxu1 %v2549_v62  ;;  %v10706_v62 = vld [vmem:[#allocation136_spill] sm:$0xff] }
 0x508   :  { %v10708_v13 = vpack.c.b16 %v10706_v62, %v10707_v32  ;;  %v10713_v32 = vld [vmem:[#allocation139_spill] sm:$0xff]  ;;  %v1831_v62 = vpack.c.bf16 %v1815_v30, %v1815_v30  ;;  %v9258_v63 = vpop.f32.mrf.mxu0  ;;  %v10717_v30 = vld [vmem:[#allocation49_spill] sm:$0xff] }
 0x50a   :  { %v9253_v3 = vpop.f32.mrf.mxu3  ;;  %v2539_v12 = vunpack.c.l.b16 %v1831_v62 }
 0x50c   :  { %v9226_v9 = vpop.f32.mrf.mxu1 }
 0x50f   :  { %3754 = vmatmul.bf16.gmra.mxu3 %v10705_v52  ;;  %v1832_v52 = vpack.c.bf16 %v1816_v40, %v1816_v40  ;;  %v6369_v40 = vld [vmem:[%s10207_s12 + $0x1b8] sm:$0xff] }
 0x510   :  { %3677 = vmatpush.bf16.msrb.mxu1 %v6369_v40  ;;  %v9273_v62 = vpop.f32.mrf.mxu0  ;;  %v6367_v40 = vld [vmem:[%s10207_s12 + $0x1a8] sm:$0xff] }
 0x511   :  { %v2540_v60 = vunpack.c.l.b16 %v1832_v52 }
 0x512   :  { %3803 = vmatmul.bf16.gmra.mxu0 %v10708_v13  ;;  %v10714_v13 = vld [vmem:[#allocation62_spill] sm:$0xff]  ;;  %v9267_v52 = vpop.f32.mrf.mxu3 }
 0x513   :  { %v10715_v55 = vpack.c.b16 %v10713_v32, %v10714_v13  ;;  %v2551_v43 = vpack.c.b16 %v2540_v60, %v2539_v12  ;;  %v1818_v32 = vmul.f32 %v10717_v30, %v10645_v57  ;;  %v10720_v60 = vpack.c.b16 %v8784_v50, %v8782_v2  ;;  %v6368_v12 = vld [vmem:[%s10207_s12 + $0x1b0] sm:$0xff] }
 0x514   :  { %v9238_v38 = vpop.f32.mrf.mxu1  ;;  %3678 = vmatpush.bf16.msrb.mxu1 %v6368_v12  ;;  %v10721_v30 = vpack.c.b16 %v8828_v51, %v8826_v10  ;;  %v6365_v10 = vld [vmem:[%s10207_s12 + $0x198] sm:$0xff] }
 0x515   :  { %v10723_v51 = vld [vmem:[#allocation51_spill] sm:$0xff] }
 0x517   :  { %3553 = vmatmul.bf16.gmra.mxu1 %v2550_v26  ;;  %v10716_v26 = vpack.c.b16 %v8775_v39, %v8773_v11  ;;  %v10718_v11 = vld [vmem:[#allocation59_spill] sm:$0xff] }
 0x518   :  { %v1817_v39 = vmul.f32 %v10718_v11, %v10630_v17  ;;  %3679 = vmatpush.bf16.msrb.mxu1 %v6367_v40 }
 0x51a   :  { %v9289_v2 = vpop.f32.mrf.mxu3 }
 0x51c   :  { %v9248_v31 = vpop.f32.mrf.mxu1 }
 0x51f   :  { %3759 = vmatmul.bf16.gmra.mxu3 %v10715_v55  ;;  %v1834_v55 = vpack.c.bf16 %v1818_v32, %v1818_v32 }
 0x522   :  { %3808 = vmatmul.bf16.gmra.mxu0 %v10716_v26  ;;  %v1833_v26 = vpack.c.bf16 %v1817_v39, %v1817_v39  ;;  %v6366_v39 = vld [vmem:[%s10207_s12 + $0x1a0] sm:$0xff] }
 0x523   :  { %3680 = vmatpush.bf16.msrb.mxu1 %v6366_v39  ;;  %v6364_v39 = vld [vmem:[%s10207_s12 + $0x190] sm:$0xff] }
 0x524   :  { %v9260_v44 = vpop.f32.mrf.mxu1  ;;  %v2541_v32 = vunpack.c.l.b16 %v1833_v26  ;;  %v1819_v26 = vmul.f32 %v10723_v51, %v10643_v7  ;;  %v6363_v51 = vld [vmem:[%s10207_s12 + $0x188] sm:$0xff] }
 0x527   :  { %3558 = vmatmul.bf16.gmra.mxu1 %v2551_v43  ;;  %v2542_v43 = vunpack.c.l.b16 %v1834_v55  ;;  %v9294_v55 = vpop.f32.mrf.mxu0 }
 0x528   :  { %3681 = vmatpush.bf16.msrb.mxu1 %v6365_v10 }
 0x529   :  { %v2552_v50 = vpack.c.b16 %v2542_v43, %v2541_v32  ;;  %v10725_v32 = vpack.c.b16 %v8818_v45, %v8820_v0 }
 0x52c   :  { %v9271_v13 = vpop.f32.mrf.mxu1  ;;  %3682 = vmatpush.bf16.msrb.mxu1 %v6364_v39  ;;  %v10729_v39 = vld [vmem:[#allocation53_spill] sm:$0xff] }
 0x52d   :  { %10719 = vst [vmem:[#allocation72_spill] sm:$0xff] %v9271_v13 }
 0x52f   :  { %3764 = vmatmul.bf16.gmra.mxu3 %v10720_v60  ;;  %v10722_v60 = vld [vmem:[#allocation50_spill] sm:$0xff] }
 0x530   :  { %v1820_v12 = vmul.f32 %v10722_v60, %v10655_v16  ;;  %3683 = vmatpush.bf16.msrb.mxu1 %v6363_v51 }
 0x532   :  { %3813 = vmatmul.bf16.gmra.mxu0 %v10721_v30  ;;  %v1836_v40 = vpack.c.bf16 %v1820_v12, %v1820_v12  ;;  %v9305_v30 = vpop.f32.mrf.mxu3  ;;  %v10727_v12 = vpack.c.b16 %v8408_v46, %v8714_v5 }
 0x534   :  { %v9287_v11 = vpop.f32.mrf.mxu1  ;;  %v2544_v60 = vunpack.c.l.b16 %v1836_v40  ;;  %v10728_v40 = vld [vmem:[#allocation63_spill] sm:$0xff] }
 0x537   :  { %3563 = vmatmul.bf16.gmra.mxu1 %v2552_v50  ;;  %v1835_v50 = vpack.c.bf16 %v1819_v26, %v1819_v26  ;;  %v6362_v26 = vld [vmem:[%s10207_s12 + $0x180] sm:$0xff] }
 0x538   :  { %3684 = vmatpush.bf16.msrb.mxu1 %v6362_v26 }
 0x539   :  { %v2543_v10 = vunpack.c.l.b16 %v1835_v50 }
 0x53b   :  { %v2553_v0 = vpack.c.b16 %v2544_v60, %v2543_v10  ;;  %v9337_v10 = vld [vmem:[%s10208_s13] ss:$0 sm:$0xff] }
 0x53c   :  { %v9303_v43 = vpop.f32.mrf.mxu1 }
 0x53d   :  { %10724 = vst [vmem:[#allocation138_spill] sm:$0xff] %v9303_v43  ;;  %v9316_v43 = vpop.f32.mrf.mxu0 }
 0x53e   :  { %10726 = vst [vmem:[#allocation137_spill] sm:$0xff] %v9316_v43  ;;  %v1821_v43 = vmul.f32 %v10729_v39, %v10652_v47 }
 0x53f   :  { %3769 = vmatmul.bf16.gmra.mxu3 %v10725_v32  ;;  %v1822_v32 = vmul.f32 %v10728_v40, %v8696_v15  ;;  %v3393_v15 = vadd.f32 %v9337_v10, %v9173_v27  ;;  %v10731_v27 = vld [vmem:[#allocation66_spill] sm:$0xff] }
 0x540   :  { %v1837_v5 = vpack.c.bf16 %v1821_v43, %v1821_v43  ;;  %v3395_v43 = vadd.f32 %v9337_v10, %v9186_v6  ;;  %v10732_v6 = vld [vmem:[#allocation60_spill] sm:$0xff] }
 0x541   :  { %v1838_v46 = vpack.c.bf16 %v1822_v32, %v1822_v32  ;;  %v3442_v26 = vadd.f32 %v8958_v54, %v3393_v15  ;;  %v3398_v54 = vadd.f32 %v9337_v10, %v9198_v48 }
 0x542   :  { %3818 = vmatmul.bf16.gmra.mxu0 %v10727_v12  ;;  %v2545_v12 = vunpack.c.l.b16 %v1837_v5  ;;  %v10730_v5 = vpack.c.b16 %v8780_v14, %v8798_v28  ;;  %v3400_v28 = vadd.f32 %v9337_v10, %v9208_v33  ;;  %v3403_v33 = vadd.f32 %v9337_v10, %v9218_v37 }
 0x543   :  { %v2546_v50 = vunpack.c.l.b16 %v1838_v46  ;;  %v3491_v40 = vadd.f32 %v8960_v8, %v3442_v26  ;;  %v3444_v46 = vadd.f32 %v8969_v29, %v3395_v43  ;;  %v2083_v8 = vmul.f32 %v10732_v6, %v10601_v36 }
 0x544   :  { %v9321_v45 = vpop.f32.mrf.mxu1  ;;  %v3447_v29 = vadd.f32 %v8976_v21, %v3398_v54  ;;  %v3449_v36 = vadd.f32 %v8986_v23, %v3400_v28 }
 0x545   :  { %v2554_v51 = vpack.c.b16 %v2546_v50, %v2545_v12  ;;  %v2084_v50 = vmul.f32 %v10731_v27, %v10599_v19  ;;  %v3493_v12 = vadd.f32 %v8971_v59, %v3444_v46  ;;  %v2099_v43 = vpack.c.bf16 %v2083_v8, %v2083_v8  ;;  %v9369_v46 = vpop.f32.mrf.mxu3  ;;  %v9373_v27 = vpop.f32.mrf.mxu0 }
 0x546   :  { %v3496_v19 = vadd.f32 %v8981_v18, %v3447_v29  ;;  %v3498_v18 = vadd.f32 %v8993_v22, %v3449_v36  ;;  %v3452_v8 = vadd.f32 %v9000_v25, %v3403_v33  ;;  %v10735_v25 = vld [vmem:[#allocation96_spill] sm:$0xff] }
 0x547   :  { %3568 = vmatmul.bf16.gmra.mxu1 %v2553_v0  ;;  %v2100_v26 = vpack.c.bf16 %v2084_v50, %v2084_v50  ;;  %v10734_v50 = vld [vmem:[#allocation64_spill] sm:$0xff] }
 0x548   :  { %v2085_v54 = vmul.f32 %v10734_v50, %v10611_v35  ;;  %v3501_v37 = vadd.f32 %v9005_v49, %v3452_v8  ;;  %v10736_v49 = vld [vmem:[#allocation65_spill] sm:$0xff] }
 0x549   :  { %v2678_v14 = vunpack.c.l.b16 %v2100_v26 }
 0x54c   :  { %v9330_v13 = vpop.f32.mrf.mxu1 }
 0x54d   :  { %v9383_v29 = vpop.f32.mrf.mxu3  ;;  %v9388_v22 = vpop.f32.mrf.mxu0 }
 0x554   :  { %v9332_v60 = vpop.f32.mrf.mxu1 }
 0x555   :  { %v9400_v36 = vpop.f32.mrf.mxu3 }
 0x557   :  { %3573 = vmatmul.bf16.gmra.mxu1 %v2554_v51 }
 0x55c   :  { %v9341_v0 = vpop.f32.mrf.mxu1 }
 0x55d   :  { %v9412_v8 = vpop.f32.mrf.mxu3 }
 0x564   :  { %v3539_v32 = vpop.f32.mrf.mxu1 }
 0x565   :  { %v9347_v39 = vadd.f32 %v3539_v32, %v3491_v40  ;;  %v2677_v40 = vunpack.c.l.b16 %v2099_v43 }
 0x567   :  { %3685 = vmatmul.bf16.vlgmr.msrb.gmra.mxu1 %v10730_v5  ;;  %v2692_v59 = vpack.c.b16 %v2678_v14, %v2677_v40  ;;  %v10733_v5 = vld [vmem:[#allocation76_spill] sm:$0xff]  ;;  %v2088_v40 = vmul.f32 %v10735_v25, %v10619_v56 }
 0x568   :  { %v2086_v21 = vmul.f32 %v10733_v5, %v10609_v42  ;;  %v3405_v42 = vadd.f32 %v9337_v10, %v9226_v9  ;;  %v10739_v25 = vld [vmem:[#allocation56_spill] sm:$0xff] }
 0x569   :  { %v2104_v33 = vpack.c.bf16 %v2088_v40, %v2088_v40 }
 0x56a   :  { %v2102_v23 = vpack.c.bf16 %v2086_v21, %v2086_v21 }
 0x56b   :  { %v2682_v56 = vunpack.c.l.b16 %v2104_v33 }
 0x56c   :  { %v3541_v51 = vpop.f32.mrf.mxu1  ;;  %v2680_v26 = vunpack.c.l.b16 %v2102_v23 }
 0x56d   :  { %v9360_v15 = vadd.f32 %v3541_v51, %v3493_v12  ;;  %v2101_v51 = vpack.c.bf16 %v2085_v54, %v2085_v54 }
 0x56f   :  { %v2679_v43 = vunpack.c.l.b16 %v2101_v51 }
 0x571   :  { %v2693_v28 = vpack.c.b16 %v2680_v26, %v2679_v43 }
 0x574   :  { %v3544_v48 = vpop.f32.mrf.mxu1 }
 0x575   :  { %v9366_v32 = vadd.f32 %v3544_v48, %v3496_v19  ;;  %v3454_v19 = vadd.f32 %v9009_v53, %v3405_v42  ;;  %v3408_v48 = vadd.f32 %v9337_v10, %v9238_v38  ;;  %v3410_v38 = vadd.f32 %v9337_v10, %v9248_v31 }
 0x576   :  { %v3413_v31 = vadd.f32 %v9337_v10, %v9260_v44 }
 0x577   :  { %3690 = vmatmul.bf16.gmra.mxu1 %v2692_v59  ;;  %v3503_v9 = vadd.f32 %v9013_v1, %v3454_v19  ;;  %v2087_v59 = vmul.f32 %v10736_v49, %v10621_v61  ;;  %v3457_v53 = vadd.f32 %v9024_v24, %v3408_v48  ;;  %v3459_v51 = vadd.f32 %v9050_v34, %v3410_v38  ;;  %v10737_v24 = vld [vmem:[#allocation116_spill] sm:$0xff]  ;;  %v9427_v48 = vpop.f32.mrf.mxu3  ;;  %v10742_v38 = vld [vmem:[#allocation85_spill] sm:$0xff] }
 0x578   :  { %v2090_v42 = vmul.f32 %v10737_v24, %v10630_v17  ;;  %v3462_v34 = vadd.f32 %v10739_v25, %v3413_v31  ;;  %v10740_v17 = vld [vmem:[#allocation8_spill] sm:$0xff] }
 0x579   :  { %v2103_v50 = vpack.c.bf16 %v2087_v59, %v2087_v59  ;;  %v3506_v1 = vadd.f32 %v9032_v58, %v3457_v53  ;;  %v3508_v58 = vadd.f32 %v9061_v41, %v3459_v51  ;;  %v10743_v51 = vld [vmem:[#allocation6_spill] sm:$0xff] }
 0x57a   :  { %v2106_v19 = vpack.c.bf16 %v2090_v42, %v2090_v42  ;;  %v3511_v59 = vadd.f32 %v10740_v17, %v3462_v34 }
 0x57b   :  { %v2681_v54 = vunpack.c.l.b16 %v2103_v50 }
 0x57c   :  { %v3546_v12 = vpop.f32.mrf.mxu1 }
 0x57d   :  { %v9380_v6 = vadd.f32 %v3546_v12, %v3498_v18  ;;  %v9404_v18 = vpop.f32.mrf.mxu0  ;;  %v2694_v23 = vpack.c.b16 %v2682_v56, %v2681_v54  ;;  %v3418_v56 = vadd.f32 %v9337_v10, %v9287_v11 }
 0x57f   :  { %v9436_v50 = vpop.f32.mrf.mxu3  ;;  %v3467_v24 = vadd.f32 %v10743_v51, %v3418_v56  ;;  %v10751_v51 = vld [vmem:[#allocation102_spill] sm:$0xff] }
 0x584   :  { %v3549_v14 = vpop.f32.mrf.mxu1 }
 0x585   :  { %v9390_v35 = vadd.f32 %v3549_v14, %v3501_v37  ;;  %v9415_v26 = vpop.f32.mrf.mxu0  ;;  %v10738_v37 = vld [vmem:[#allocation67_spill] sm:$0xff] }
 0x586   :  { %v2089_v43 = vmul.f32 %v10738_v37, %v10632_v4  ;;  %v10741_v4 = vld [vmem:[#allocation127_spill] sm:$0xff] }
 0x587   :  { %3695 = vmatmul.bf16.gmra.mxu1 %v2693_v28  ;;  %v2092_v53 = vmul.f32 %v10741_v4, %v10643_v7 }
 0x588   :  { %v2105_v40 = vpack.c.bf16 %v2089_v43, %v2089_v43  ;;  %v9448_v43 = vpop.f32.mrf.mxu3 }
 0x589   :  { %10745 = vst [vmem:[#allocation54_spill] sm:$0xff] %v9448_v43 }
 0x58a   :  { %v2683_v44 = vunpack.c.l.b16 %v2105_v40  ;;  %v10748_v40 = vld [vmem:[#allocation103_spill] sm:$0xff] }
 0x58c   :  { %v3551_v5 = vpop.f32.mrf.mxu1 }
 0x58d   :  { %v9402_v21 = vadd.f32 %v3551_v5, %v3503_v9  ;;  %v2684_v9 = vunpack.c.l.b16 %v2106_v19  ;;  %v9429_v49 = vpop.f32.mrf.mxu0 }
 0x58f   :  { %v2695_v33 = vpack.c.b16 %v2684_v9, %v2683_v44  ;;  %v2093_v9 = vmul.f32 %v10748_v40, %v10655_v16 }
 0x590   :  { %v9460_v44 = vpop.f32.mrf.mxu3 }
 0x591   :  { %10749 = vst [vmem:[#allocation70_spill] sm:$0xff] %v9460_v44 }
 0x594   :  { %v3554_v12 = vpop.f32.mrf.mxu1 }
 0x595   :  { %v9410_v61 = vadd.f32 %v3554_v12, %v3506_v1  ;;  %v2091_v1 = vmul.f32 %v10742_v38, %v10645_v57  ;;  %v9442_v54 = vpop.f32.mrf.mxu0  ;;  %v10747_v57 = vld [vmem:[#allocation61_spill] sm:$0xff] }
 0x596   :  { %v2094_v34 = vmul.f32 %v10747_v57, %v10652_v47  ;;  %v3428_v47 = vadd.f32 %v9337_v10, %v9332_v60  ;;  %v10754_v57 = vld [vmem:[#allocation7_spill] sm:$0xff]  ;;  %v6472_v60 = vld [vmem:[%s10212_s17] ss:$0 sm:$0xff] }
 0x597   :  { %3700 = vmatmul.bf16.gmra.mxu1 %v2694_v23  ;;  %v2108_v23 = vpack.c.bf16 %v2092_v53, %v2092_v53  ;;  %v2107_v42 = vpack.c.bf16 %v2091_v1, %v2091_v1 }
 0x598   :  { %v3735_v1 = vpop.f32.mrf.mxu3 }
 0x599   :  { %v2686_v31 = vunpack.c.l.b16 %v2108_v23  ;;  %v2685_v7 = vunpack.c.l.b16 %v2107_v42 }
 0x59b   :  { %v2696_v11 = vpack.c.b16 %v2686_v31, %v2685_v7  ;;  %v10752_v31 = vld [vmem:[#allocation14_spill] sm:$0xff] }
 0x59c   :  { %v3556_v14 = vpop.f32.mrf.mxu1 }
 0x59d   :  { %v9424_v28 = vadd.f32 %v3556_v14, %v3508_v58  ;;  %v10744_v58 = vld [vmem:[#allocation57_spill] sm:$0xff]  ;;  %v9452_v25 = vpop.f32.mrf.mxu0 }
 0x59e   :  { %v3516_v37 = vadd.f32 %v10744_v58, %v3467_v24  ;;  %10746 = vst [vmem:[#allocation32_spill] sm:$0xff] %v9452_v25  ;;  %v3477_v24 = vadd.f32 %v10751_v51, %v3428_v47  ;;  %v10759_v47 = vld [vmem:[#allocation36_spill] sm:$0xff]  ;;  %v10763_v25 = vld [vmem:[#allocation18_spill] sm:$0xff] }
 0x5a0   :  { %v3737_v42 = vpop.f32.mrf.mxu3  ;;  %v3526_v58 = vadd.f32 %v10752_v31, %v3477_v24 }
 0x5a4   :  { %v3559_v5 = vpop.f32.mrf.mxu1 }
 0x5a5   :  { %v9432_v41 = vadd.f32 %v3559_v5, %v3511_v59  ;;  %v2110_v59 = vpack.c.bf16 %v2094_v34, %v2094_v34  ;;  %v2109_v5 = vpack.c.bf16 %v2093_v9, %v2093_v9 }
 0x5a7   :  { %3705 = vmatmul.bf16.gmra.mxu1 %v2695_v33  ;;  %v9462_v33 = vpop.f32.mrf.mxu0  ;;  %v2688_v4 = vunpack.c.l.b16 %v2110_v59  ;;  %v2687_v53 = vunpack.c.l.b16 %v2109_v5  ;;  %v10757_v5 = vld [vmem:[#allocation114_spill] sm:$0xff] }
 0x5a8   :  { %10750 = vst [vmem:[#allocation69_spill] sm:$0xff] %v9462_v33  ;;  %v3740_v40 = vpop.f32.mrf.mxu3  ;;  %v10761_v33 = vmov 0.0  }
 0x5a9   :  { %v2697_v38 = vpack.c.b16 %v2688_v4, %v2687_v53  ;;  %v3589_v4 = vadd.f32 %v10757_v5, %v9347_v39  ;;  %v10758_v53 = vld [vmem:[#allocation90_spill] sm:$0xff] }
 0x5ab   :  { %v3638_v51 = vadd.f32 %v10759_v47, %v3589_v4 }
 0x5ac   :  { %v9444_v12 = vpop.f32.mrf.mxu1 }
 0x5af   :  { %v3784_v23 = vpop.f32.mrf.mxu0 }
 0x5b4   :  { %v3564_v14 = vpop.f32.mrf.mxu1 }
 0x5b5   :  { %v9450_v19 = vadd.f32 %v3564_v14, %v3516_v37 }
 0x5b7   :  { %3710 = vmatmul.bf16.gmra.mxu1 %v2696_v11  ;;  %v3786_v37 = vpop.f32.mrf.mxu0  ;;  %v10753_v11 = vld [vmem:[#allocation21_spill] sm:$0xff] }
 0x5b8   :  { %v10755_v34 = vpack.c.b16 %v10753_v11, %v10754_v57  ;;  %v10760_v11 = vld [vmem:[#allocation104_spill] sm:$0xff] }
 0x5b9   :  { %v3591_v57 = vadd.f32 %v10760_v11, %v9360_v15  ;;  %v3594_v15 = vadd.f32 %v10763_v25, %v9366_v32  ;;  %v10765_v25 = vld [vmem:[#allocation9_spill] sm:$0xff] }
 0x5bc   :  { %v9458_v17 = vpop.f32.mrf.mxu1 }
 0x5bf   :  { %v3789_v59 = vpop.f32.mrf.mxu0 }
 0x5c4   :  { %v9464_v56 = vpop.f32.mrf.mxu1 }
 0x5c7   :  { %3715 = vmatmul.bf16.gmra.mxu1 %v2697_v38  ;;  %v1254_v38 = vadd.f32 %v6472_v60, %v10758_v53  ;;  %v3791_v39 = vpop.f32.mrf.mxu0  ;;  %v10762_v53 = vld [vmem:[#allocation16_spill] sm:$0xff] }
 0x5c9   :  { %vm1256_vm10 = vcmp.gt.f32.partialorder %v1254_v38, 0.0  ;;  %v3640_v38 = vadd.f32 %v10762_v53, %v3591_v57  ;;  %v10764_v57 = vld [vmem:[#allocation19_spill] sm:$0xff] }
 0x5ca   :  { %v9492_v44 = vsel %vm1256_vm10, 1.0, %v10761_v33  ;;  %v3596_v53 = vadd.f32 %v10764_v57, %v9380_v6 }
 0x5cb   :  { %v9495_v5 = vperm.slane %v9492_v44, 0 }
 0x5cc   :  { %v9468_v16 = vpop.f32.mrf.mxu1 }
 0x5cf   :  { %v3794_v11 = vpop.f32.mrf.mxu0 }
 0x5d4   :  { %v3574_v7 = vpop.f32.mrf.mxu1 }
 0x5d5   :  { %v9472_v14 = vadd.f32 %v3574_v7, %v3526_v58  ;;  %v6395_v58 = vld [vmem:[%s10213_s18 + $0x38] sm:$0xff]  ;;  %v3742_v7 = vpop.f32.mrf.mxu3 }
 0x5d6   :  { %5036 = vmatpush.bf16.msrb.mxu2 %v6395_v58 }
 0x5d7   :  { %3720 = vmatmul.bf16.gmra.mxu1 %v10755_v34 }
 0x5dc   :  { %v9477_v9 = vpop.f32.mrf.mxu1 }
 0x5dd   :  { %10756 = vst [vmem:[#allocation79_spill] sm:$0xff] %v9477_v9 }
 0x5e4   :  { %v3686_v24 = vpop.f32.mrf.mxu1 }
 0x5e5   :  { %v3687_v31 = vadd.f32 %v3686_v24, %v3638_v51 }
 0x5e7   :  { %v3736_v34 = vadd.f32 %v3735_v1, %v3687_v31  ;;  %v3745_v31 = vpop.f32.mrf.mxu3 }
 0x5e9   :  { %v3785_v60 = vadd.f32 %v3784_v23, %v3736_v34  ;;  %v3643_v23 = vadd.f32 %v9233_v20, %v3594_v15 }
 0x5eb   :  { %v3824_v4 = vmax.f32 %v3785_v60, 0.0 }
 0x5ec   :  { %v3688_v47 = vpop.f32.mrf.mxu1 }
 0x5ed   :  { %v3846_v51 = vmul.f32 %v9495_v5, %v3824_v4  ;;  %v3689_v24 = vadd.f32 %v3688_v47, %v3640_v38 }
 0x5ef   :  { %v3738_v1 = vadd.f32 %v3737_v42, %v3689_v24  ;;  %v3747_v47 = vpop.f32.mrf.mxu3  ;;  %v3645_v42 = vadd.f32 %v10765_v25, %v3596_v53 }
 0x5f1   :  { %v3787_v58 = vadd.f32 %v3786_v37, %v3738_v1  ;;  %v3796_v37 = vpop.f32.mrf.mxu0 }
 0x5f3   :  { %v3825_v33 = vmax.f32 %v3787_v58, 0.0 }
 0x5f4   :  { %v3691_v34 = vpop.f32.mrf.mxu1 }
 0x5f5   :  { %v3847_v9 = vmul.f32 %v9495_v5, %v3825_v33  ;;  %v3692_v60 = vadd.f32 %v3691_v34, %v3643_v23  ;;  %v3599_v33 = vadd.f32 %v9253_v3, %v9390_v35 }
 0x5f7   :  { %v9505_v43 = vmax.f32 %v3846_v51, %v3847_v9  ;;  %v3741_v4 = vadd.f32 %v3740_v40, %v3692_v60  ;;  %v3648_v9 = vadd.f32 %v9258_v63, %v3599_v33  ;;  %v3750_v40 = vpop.f32.mrf.mxu3  ;;  %v3601_v60 = vadd.f32 %v9267_v52, %v9402_v21 }
 0x5f9   :  { %v3790_v38 = vadd.f32 %v3789_v59, %v3741_v4  ;;  %v3799_v34 = vpop.f32.mrf.mxu0  ;;  %v3650_v3 = vadd.f32 %v9273_v62, %v3601_v60 }
 0x5fb   :  { %v3826_v32 = vmax.f32 %v3790_v38, 0.0  ;;  %v3604_v38 = vadd.f32 %v9289_v2, %v9410_v61 }
 0x5fc   :  { %v3693_v24 = vpop.f32.mrf.mxu1 }
 0x5fd   :  { %v9509_v1 = vmul.f32 %v9495_v5, %v3826_v32  ;;  %v3694_v20 = vadd.f32 %v3693_v24, %v3645_v42  ;;  %v3653_v52 = vadd.f32 %v9294_v55, %v3604_v38  ;;  %v10768_v55 = vld [vmem:[#allocation35_spill] sm:$0xff] }
 0x5ff   :  { %v3743_v15 = vadd.f32 %v3742_v7, %v3694_v20 }
 0x601   :  { %v3792_v58 = vadd.f32 %v3791_v39, %v3743_v15  ;;  %v3752_v39 = vpop.f32.mrf.mxu3  ;;  %v3801_v25 = vpop.f32.mrf.mxu0  ;;  %v10766_v15 = vld [vmem:[#allocation72_spill] sm:$0xff] }
 0x603   :  { %v3827_v6 = vmax.f32 %v3792_v58, 0.0  ;;  %v3415_v58 = vadd.f32 %v9337_v10, %v10766_v15 }
 0x604   :  { %v3696_v59 = vpop.f32.mrf.mxu1 }
 0x605   :  { %v9515_v51 = vmul.f32 %v9495_v5, %v3827_v6  ;;  %v3697_v23 = vadd.f32 %v3696_v59, %v3648_v9  ;;  %v3464_v59 = vadd.f32 %v10768_v55, %v3415_v58 }
 0x607   :  { %v3746_v57 = vadd.f32 %v3745_v31, %v3697_v23 }
 0x609   :  { %v3795_v53 = vadd.f32 %v3794_v11, %v3746_v57  ;;  %v3606_v11 = vadd.f32 %v9305_v30, %v9424_v28  ;;  %v3755_v33 = vpop.f32.mrf.mxu3  ;;  %v3804_v61 = vpop.f32.mrf.mxu0  ;;  %v3609_v30 = vadd.f32 %v9369_v46, %v9432_v41  ;;  %v6394_v46 = vld [vmem:[%s10213_s18 + $0x30] sm:$0xff]  ;;  %v3841_v41 = vrot.slane %v9492_v44, 1 }
 0x60a   :  { %5037 = vmatpush.bf16.msrb.mxu2 %v6394_v46 }
 0x60b   :  { %v3828_v4 = vmax.f32 %v3795_v53, 0.0 }
 0x60c   :  { %v3698_v35 = vpop.f32.mrf.mxu1 }
 0x60d   :  { %v9521_v7 = vmul.f32 %v9495_v5, %v3828_v4  ;;  %v3699_v63 = vadd.f32 %v3698_v35, %v3650_v3  ;;  %v3658_v35 = vadd.f32 %v9373_v27, %v3609_v30 }
 0x60f   :  { %v3748_v32 = vadd.f32 %v3747_v47, %v3699_v63 }
 0x611   :  { %v3797_v42 = vadd.f32 %v3796_v37, %v3748_v32  ;;  %v10767_v37 = vld [vmem:[#allocation137_spill] sm:$0xff]  ;;  %v3757_v4 = vpop.f32.mrf.mxu3  ;;  %v3806_v63 = vpop.f32.mrf.mxu0 }
 0x612   :  { %v3655_v6 = vadd.f32 %v10767_v37, %v3606_v11 }
 0x613   :  { %v3829_v24 = vmax.f32 %v3797_v42, 0.0 }
 0x614   :  { %v3701_v21 = vpop.f32.mrf.mxu1 }
 0x615   :  { %v9527_v31 = vmul.f32 %v9495_v5, %v3829_v24  ;;  %v3702_v62 = vadd.f32 %v3701_v21, %v3653_v52  ;;  %v9553_v52 = vperm.slane %v3841_v41, 0 }
 0x617   :  { %v3751_v20 = vadd.f32 %v3750_v40, %v3702_v62  ;;  %v10769_v40 = vld [vmem:[#allocation47_spill] sm:$0xff] }
 0x618   :  { %v3513_v57 = vadd.f32 %v10769_v40, %v3464_v59 }
 0x619   :  { %v3800_v2 = vadd.f32 %v3799_v34, %v3751_v20  ;;  %v3760_v62 = vpop.f32.mrf.mxu3  ;;  %v10771_v20 = vld [vmem:[#allocation10_spill] sm:$0xff] }
 0x61a   :  { %v3562_v34 = vadd.f32 %v9444_v12, %v3513_v57  ;;  %v10770_v12 = vld [vmem:[#allocation138_spill] sm:$0xff] }
 0x61b   :  { %v3830_v47 = vmax.f32 %v3800_v2, 0.0  ;;  %v3420_v24 = vadd.f32 %v9337_v10, %v10770_v12  ;;  %v3809_v2 = vpop.f32.mrf.mxu0  ;;  %v10776_v12 = vld [vmem:[#allocation12_spill] sm:$0xff] }
 0x61c   :  { %v3703_v9 = vpop.f32.mrf.mxu1 }
 0x61d   :  { %v9536_v23 = vmul.f32 %v9495_v5, %v3830_v47  ;;  %v3704_v60 = vadd.f32 %v3703_v9, %v3655_v6  ;;  %v3469_v15 = vadd.f32 %v10771_v20, %v3420_v24  ;;  %v10772_v47 = vld [vmem:[#allocation77_spill] sm:$0xff] }
 0x61f   :  { %v3753_v28 = vadd.f32 %v3752_v39, %v3704_v60  ;;  %v3611_v39 = vadd.f32 %v9383_v29, %v3562_v34  ;;  %v3614_v29 = vadd.f32 %v9400_v36, %v9450_v19  ;;  %v3518_v37 = vadd.f32 %v10772_v47, %v3469_v15  ;;  %v10773_v60 = vld [vmem:[#allocation11_spill] sm:$0xff]  ;;  %v10777_v47 = vld [vmem:[#allocation92_spill] sm:$0xff] }
 0x621   :  { %v3802_v53 = vadd.f32 %v3801_v25, %v3753_v28  ;;  %v3663_v55 = vadd.f32 %v9404_v18, %v3614_v29  ;;  %v3762_v57 = vpop.f32.mrf.mxu3 }
 0x623   :  { %v3831_v3 = vmax.f32 %v3802_v53, 0.0  ;;  %v3811_v53 = vpop.f32.mrf.mxu0 }
 0x624   :  { %v3706_v38 = vpop.f32.mrf.mxu1 }
 0x625   :  { %v9544_v32 = vmul.f32 %v9495_v5, %v3831_v3  ;;  %v3707_v42 = vadd.f32 %v3706_v38, %v3658_v35  ;;  %v3660_v5 = vadd.f32 %v9388_v22, %v3611_v39  ;;  %v3567_v22 = vadd.f32 %v9458_v17, %v3518_v37  ;;  %v10775_v38 = vld [vmem:[#allocation31_spill] sm:$0xff] }
 0x627   :  { %v3756_v25 = vadd.f32 %v3755_v33, %v3707_v42  ;;  %v3616_v36 = vadd.f32 %v9412_v8, %v3567_v22  ;;  %v10778_v22 = vld [vmem:[#allocation54_spill] sm:$0xff] }
 0x629   :  { %v3805_v27 = vadd.f32 %v3804_v61, %v3756_v25  ;;  %v3423_v61 = vadd.f32 %v9337_v10, %v9321_v45  ;;  %v3425_v45 = vadd.f32 %v9337_v10, %v9330_v13  ;;  %v3665_v35 = vadd.f32 %v9415_v26, %v3616_v36  ;;  %v3765_v25 = vpop.f32.mrf.mxu3 }
 0x62b   :  { %v3832_v21 = vmax.f32 %v3805_v27, 0.0  ;;  %v3472_v30 = vadd.f32 %v10773_v60, %v3423_v61  ;;  %v3474_v42 = vadd.f32 %v10775_v38, %v3425_v45  ;;  %v3814_v27 = vpop.f32.mrf.mxu0  ;;  %v10779_v60 = vld [vmem:[#allocation15_spill] sm:$0xff] }
 0x62c   :  { %v3708_v11 = vpop.f32.mrf.mxu1 }
 0x62d   :  { %v3854_v58 = vmul.f32 %v9553_v52, %v3832_v21  ;;  %v3709_v44 = vadd.f32 %v3708_v11, %v3660_v5  ;;  %v3523_v13 = vadd.f32 %v10776_v12, %v3474_v42  ;;  %v10783_v42 = vld [vmem:[#allocation70_spill] sm:$0xff] }
 0x62f   :  { %v3758_v33 = vadd.f32 %v3757_v4, %v3709_v44  ;;  %v10774_v4 = vld [vmem:[#allocation97_spill] sm:$0xff]  ;;  %v3572_v21 = vadd.f32 %v9468_v16, %v3523_v13  ;;  %v3870_v13 = vrot.slane %v9505_v43, 1 }
 0x630   :  { %v3521_v34 = vadd.f32 %v10774_v4, %v3472_v30 }
 0x631   :  { %v3807_v6 = vadd.f32 %v3806_v63, %v3758_v33  ;;  %v3621_v20 = vadd.f32 %v9436_v50, %v3572_v21  ;;  %v10784_v21 = vld [vmem:[#allocation69_spill] sm:$0xff] }
 0x632   :  { %v3570_v3 = vadd.f32 %v9464_v56, %v3521_v34  ;;  %v10782_v34 = vld [vmem:[#allocation5_spill] sm:$0xff] }
 0x633   :  { %v3833_v9 = vmax.f32 %v3807_v6, 0.0  ;;  %v3670_v33 = vadd.f32 %v9442_v54, %v3621_v20  ;;  %v3816_v61 = vpop.f32.mrf.mxu0  ;;  %vm4042_vm12 = vcmp.lt.s32.totalorder %v10782_v34, 5  ;;  %vm4125_vm13 = vcmp.lt.s32.totalorder %v10782_v34, 3 }
 0x634   :  { %v3711_v59 = vpop.f32.mrf.mxu1  ;;  %v3619_v8 = vadd.f32 %v9427_v48, %v3570_v3  ;;  %v3430_v48 = vadd.f32 %v9337_v10, %v9341_v0  ;;  %vm4083_vm15 = vcmp.lt.s32.totalorder %v10782_v34, 4 }
 0x635   :  { %v3855_v28 = vmul.f32 %v9553_v52, %v3833_v9  ;;  %v3712_v40 = vadd.f32 %v3711_v59, %v3663_v55  ;;  %v3624_v9 = vadd.f32 %v10778_v22, %v9472_v14  ;;  %v3864_v14 = vmax.f32 %v9521_v7, %v9527_v31 }
 0x636   :  { %v3668_v5 = vadd.f32 %v9429_v49, %v3619_v8  ;;  %v3479_v37 = vadd.f32 %v10777_v47, %v3430_v48 }
 0x637   :  { %v3761_v19 = vadd.f32 %v3760_v62, %v3712_v40  ;;  %v3866_v55 = vmax.f32 %v3854_v58, %v3855_v28  ;;  %v3865_v58 = vmax.f32 %v9536_v23, %v9544_v32 }
 0x638   :  { %v3528_v10 = vadd.f32 %v10779_v60, %v3479_v37 }
 0x639   :  { %v3810_v17 = vadd.f32 %v3809_v2, %v3761_v19  ;;  %v3767_v2 = vpop.f32.mrf.mxu3  ;;  %v3874_v30 = vrot.slane %v3866_v55, 1  ;;  %v10781_v19 = vld [vmem:[#allocation32_spill] sm:$0xff]  ;;  %v3873_v38 = vrot.slane %v3865_v58, 1 }
 0x63b   :  { %v3834_v18 = vmax.f32 %v3810_v17, 0.0  ;;  %v3881_v7 = vsel %vm871_vm6, %v3873_v38, %v3874_v30 }
 0x63c   :  { %v3713_v63 = vpop.f32.mrf.mxu1  ;;  %v3889_v12 = vmax.f32 %v3865_v58, %v3881_v7  ;;  %v3975_v58 = vld [vmem:[%s10215_s20 + $0x70] sm:$0xff]  ;;  %v6415_v7 = vld [vmem:[%s10213_s18 + $0xd8] sm:$0xff] }
 0x63d   :  { %v3856_v46 = vmul.f32 %v9553_v52, %v3834_v18  ;;  %v3714_v41 = vadd.f32 %v3713_v63, %v3665_v35  ;;  %v3819_v35 = vpop.f32.mrf.mxu0  ;;  %v3872_v63 = vrot.slane %v3864_v14, 1 }
 0x63f   :  { %v3763_v39 = vadd.f32 %v3762_v57, %v3714_v41  ;;  %v10780_v57 = vld [vmem:[#allocation79_spill] sm:$0xff]  ;;  %v3882_v31 = vsel %vm871_vm6, %v3872_v63, %v3873_v38  ;;  %v6416_v38 = vld [vmem:[%s10213_s18 + $0xe0] sm:$0xff] }
 0x640   :  { %v3577_v54 = vadd.f32 %v10780_v57, %v3528_v10  ;;  %v6392_v10 = vld [vmem:[%s10213_s18 + $0x20] sm:$0xff]  ;;  %v6391_v57 = vld [vmem:[%s10213_s18 + $0x18] sm:$0xff] }
 0x641   :  { %v3812_v24 = vadd.f32 %v3811_v53, %v3763_v39  ;;  %v3673_v53 = vadd.f32 %v10781_v19, %v3624_v9  ;;  %v3770_v45 = vpop.f32.mrf.mxu3  ;;  %v3863_v39 = vmax.f32 %v9509_v1, %v9515_v51  ;;  %v9645_v19 = vpop.permute.xlu1 %4063 }
 0x643   :  { %v3835_v56 = vmax.f32 %v3812_v24, 0.0  ;;  %v3871_v24 = vrot.slane %v3863_v39, 1 }
 0x644   :  { %v3716_v26 = vpop.f32.mrf.mxu1 }
 0x645   :  { %v3857_v62 = vmul.f32 %v9553_v52, %v3835_v56  ;;  %v3717_v11 = vadd.f32 %v3716_v26, %v3668_v5  ;;  %v3821_v47 = vpop.f32.mrf.mxu0 }
 0x647   :  { %v3766_v15 = vadd.f32 %v3765_v25, %v3717_v11  ;;  %v3867_v59 = vmax.f32 %v3856_v46, %v3857_v62  ;;  %v3626_v46 = vadd.f32 %v10783_v42, %v3577_v54  ;;  %v3888_v25 = vmax.f32 %v3864_v14, %v3882_v31  ;;  %v6411_v54 = vld [vmem:[%s10213_s18 + $0xb8] sm:$0xff]  ;;  %v3970_v31 = vld [vmem:[%s10215_s20 + $0x48] sm:$0xff] }
 0x648   :  { %v3883_v62 = vsel %vm871_vm6, %v3871_v24, %v3872_v63  ;;  %v3884_v11 = vsel %vm871_vm6, %v3870_v13, %v3871_v24  ;;  %5074 = vmatpush.bf16.msra.mxu3 %v6411_v54  ;;  %v6408_v63 = vld [vmem:[%s10213_s18 + $0xa0] sm:$0xff]  ;;  %v3972_v42 = vld [vmem:[%s10215_s20 + $0x58] sm:$0xff] }
 0x649   :  { %v3815_v44 = vadd.f32 %v3814_v27, %v3766_v15  ;;  %v3875_v40 = vrot.slane %v3867_v59, 1  ;;  %v3675_v56 = vadd.f32 %v10784_v21, %v3626_v46  ;;  %v3899_v1 = vpack.c.bf16 %v3889_v12, %v3888_v25  ;;  %v9684_v46 = vpop.permute.xlu1 %4142  ;;  %v6390_v25 = vld [vmem:[%s10213_s18 + $0x10] sm:$0xff]  ;;  %v3968_v24 = vld [vmem:[%s10215_s20 + $0x38] sm:$0xff] }
 0x64a   :  { %v3886_v48 = vmax.f32 %v9505_v43, %v3884_v11  ;;  %v6406_v12 = vld [vmem:[%s10213_s18 + $0x90] sm:$0xff] }
 0x64b   :  { %v3836_v29 = vmax.f32 %v3815_v44, 0.0  ;;  %v3880_v17 = vsel %vm871_vm6, %v3874_v30, %v3875_v40  ;;  %v3887_v44 = vmax.f32 %v3863_v39, %v3883_v62  ;;  %v9632_v30 = vpop.permute.xlu0 %4058  ;;  %v6407_v39 = vld [vmem:[%s10213_s18 + $0x98] sm:$0xff]  ;;  %v3967_v21 = vld [vmem:[%s10215_s20 + $0x30] sm:$0xff] }
 0x64c   :  { %v3718_v16 = vpop.f32.mrf.mxu1  ;;  %v3890_v18 = vmax.f32 %v3866_v55, %v3880_v17  ;;  %v3976_v17 = vld [vmem:[%s10215_s20 + $0x78] sm:$0xff] }
 0x64d   :  { %v3858_v49 = vmul.f32 %v9553_v52, %v3836_v29  ;;  %v3719_v6 = vadd.f32 %v3718_v16, %v3670_v33  ;;  %v6393_v16 = vld [vmem:[%s10213_s18 + $0x28] sm:$0xff] }
 0x64e   :  { %5038 = vmatpush.bf16.msrb.mxu2 %v6393_v16  ;;  %v6451_v16 = vld [vmem:[%s10213_s18 + $0x1f8] sm:$0xff] }
 0x64f   :  { %v3768_v50 = vadd.f32 %v3767_v2, %v3719_v6  ;;  %v3772_v2 = vpop.f32.mrf.mxu3 }
 0x651   :  { %v3817_v0 = vadd.f32 %v3816_v61, %v3768_v50  ;;  %v3898_v61 = vpack.c.bf16 %v3887_v44, %v3886_v48  ;;  %v6404_v48 = vld [vmem:[%s10213_s18 + $0x80] sm:$0xff] }
 0x652   :  { %5039 = vmatpush.bf16.msrb.mxu2 %v6392_v10  ;;  %v6412_v44 = vld [vmem:[%s10213_s18 + $0xc0] sm:$0xff]  ;;  %v6425_v10 = vld [vmem:[%s10213_s18 + $0x128] sm:$0xff] }
 0x653   :  { %v3837_v36 = vmax.f32 %v3817_v0, 0.0  ;;  %v6387_v0 = vld [vmem:[%s10785_s2 + $0x8] sm:$0xff] }
 0x654   :  { %v3721_v4 = vpop.f32.mrf.mxu1 }
 0x655   :  { %v3859_v28 = vmul.f32 %v9553_v52, %v3837_v36  ;;  %v3722_v3 = vadd.f32 %v3721_v4, %v3673_v53  ;;  %v6419_v36 = vld [vmem:[%s10213_s18 + $0xf8] sm:$0xff]  ;;  %v9647_v53 = vpop.permute.xlu0 %4137  ;;  %v6418_v4 = vld [vmem:[%s10213_s18 + $0xf0] sm:$0xff] }
 0x656   :  { %5040 = vmatpush.bf16.msrb.mxu2 %v6391_v57  ;;  %5093 = vmatpush.bf16.msrb.mxu0 %v6419_v36 }
 0x657   :  { %v3868_v41 = vmax.f32 %v3858_v49, %v3859_v28  ;;  %v3771_v8 = vadd.f32 %v3770_v45, %v3722_v3  ;;  %v6410_v45 = vld [vmem:[%s10213_s18 + $0xb0] sm:$0xff]  ;;  %v6409_v28 = vld [vmem:[%s10213_s18 + $0xa8] sm:$0xff] }
 0x658   :  { %5075 = vmatpush.bf16.msra.mxu3 %v6410_v45  ;;  %v6417_v3 = vld [vmem:[%s10213_s18 + $0xe8] sm:$0xff] }
 0x659   :  { %v3876_v23 = vrot.slane %v3868_v41, 1  ;;  %v3820_v32 = vadd.f32 %v3819_v35, %v3771_v8  ;;  %v3973_v35 = vld [vmem:[%s10215_s20 + $0x60] sm:$0xff] }
 0x65a   :  { %5094 = vmatpush.bf16.msrb.mxu0 %v6418_v4  ;;  %5041 = vmatpush.bf16.msrb.mxu2 %v6390_v25  ;;  %v6424_v4 = vld [vmem:[%s10213_s18 + $0x120] sm:$0xff] }
 0x65b   :  { %v3838_v27 = vmax.f32 %v3820_v32, 0.0  ;;  %v3879_v5 = vsel %vm871_vm6, %v3875_v40, %v3876_v23  ;;  %v9634_v40 = vpop.permute.xlu2 %4053  ;;  %v3969_v32 = vld [vmem:[%s10215_s20 + $0x40] sm:$0xff] }
 0x65c   :  { %v3723_v51 = vpop.f32.mrf.mxu1  ;;  %v3891_v26 = vmax.f32 %v3867_v59, %v3879_v5  ;;  %5076 = vmatpush.bf16.msra.mxu3 %v6409_v28  ;;  %v6405_v5 = vld [vmem:[%s10213_s18 + $0x88] sm:$0xff] }
 0x65d   :  { %v3860_v20 = vmul.f32 %v9553_v52, %v3838_v27  ;;  %v3724_v15 = vadd.f32 %v3723_v51, %v3675_v56  ;;  %v9689_v8 = vpop.permute.xlu0 %4100  ;;  %v9717_v27 = vpop.permute.xlu1 %4178  ;;  %v6389_v56 = vld [vmem:[%s10213_s18 + $0x8] sm:$0xff] }
 0x65e   :  { %v3900_v29 = vpack.c.bf16 %v3891_v26, %v3890_v18  ;;  %v3974_v18 = vld [vmem:[%s10215_s20 + $0x68] sm:$0xff]  ;;  %5095 = vmatpush.bf16.msrb.mxu0 %v6417_v3  ;;  %5042 = vmatpush.bf16.msrb.mxu2 %v6389_v56 }
 0x65f   :  { %v3773_v33 = vadd.f32 %v3772_v2, %v3724_v15  ;;  %v3966_v26 = vld [vmem:[%s10215_s20 + $0x28] sm:$0xff]  ;;  %v6388_v15 = vld [vmem:[%s10213_s18] sm:$0xff]  ;;  %v3964_v2 = vld [vmem:[%s10215_s20 + $0x18] sm:$0xff] }
 0x660   :  { %5077 = vmatpush.bf16.msra.mxu3 %v6408_v63 }
 0x661   :  { %v3822_v37 = vadd.f32 %v3821_v47, %v3773_v33  ;;  %v6427_v33 = vld [vmem:[%s10213_s18 + $0x138] sm:$0xff] }
 0x662   :  { %5096 = vmatpush.bf16.msrb.mxu0 %v6416_v38  ;;  %5043 = vmatpush.bf16.msrb.mxu2 %v6388_v15  ;;  %v6448_v38 = vld [vmem:[%s10213_s18 + $0x1e0] sm:$0xff] }
 0x663   :  { %v3839_v49 = vmax.f32 %v3822_v37, 0.0  ;;  %v9658_v14 = vpop.permute.xlu2 %4068  ;;  %v3962_v37 = vld [vmem:[%s10215_s20 + $0x8] sm:$0xff] }
 0x664   :  { %5078 = vmatpush.bf16.msra.mxu3 %v6407_v39 }
 0x665   :  { %v3861_v6 = vmul.f32 %v9553_v52, %v3839_v49  ;;  %v6386_v52 = vld [vmem:[%s10785_s2] sm:$0xff]  ;;  %v9731_v51 = vpop.permute.xlu0 %4147  ;;  %v9767_v47 = vpop.permute.xlu1 %4152  ;;  %v6426_v49 = vld [vmem:[%s10213_s18 + $0x130] sm:$0xff]  ;;  %s6513_s2 = smov [#allocation2]  }
 0x666   :  { %5097 = vmatpush.bf16.msrb.mxu0 %v6415_v7  ;;  %5112 = vmatpush.bf16.msra.mxu2 %v6427_v33 }
 0x667   :  { %v3869_v22 = vmax.f32 %v3860_v20, %v3861_v6  ;;  %v3965_v20 = vld [vmem:[%s10215_s20 + $0x20] sm:$0xff]  ;;  %v6442_v6 = vld [vmem:[%s10213_s18 + $0x1b0] sm:$0xff] }
 0x668   :  { %5079 = vmatpush.bf16.msra.mxu3 %v6406_v12  ;;  %v6423_v12 = vld [vmem:[%s10213_s18 + $0x118] sm:$0xff] }
 0x669   :  { %v3877_v9 = vrot.slane %v3869_v22, 1 }
 0x66a   :  { %5113 = vmatpush.bf16.msra.mxu2 %v6426_v49 }
 0x66b   :  { %v3878_v43 = vsel %vm871_vm6, %v3876_v23, %v3877_v9  ;;  %v3885_v50 = vsel %vm871_vm6, %v3877_v9, %v3870_v13  ;;  %v9700_v23 = vpop.permute.xlu2 %4095  ;;  %v6414_v13 = vld [vmem:[%s10213_s18 + $0xd0] sm:$0xff]  ;;  %v3961_v9 = vld [vmem:[%s10215_s20] sm:$0xff] }
 0x66c   :  { %v3892_v55 = vmax.f32 %v3868_v41, %v3878_v43  ;;  %v3893_v59 = vmax.f32 %v3869_v22, %v3885_v50  ;;  %v3971_v41 = vld [vmem:[%s10215_s20 + $0x50] sm:$0xff]  ;;  %5098 = vmatpush.bf16.msrb.mxu0 %v6414_v13  ;;  %5080 = vmatpush.bf16.msra.mxu3 %v6405_v5  ;;  %v6439_v13 = vld [vmem:[%s10213_s18 + $0x198] sm:$0xff] }
 0x66d   :  { %v6450_v43 = vld [vmem:[%s10213_s18 + $0x1f0] sm:$0xff]  ;;  %v9786_v50 = vpop.permute.xlu0 %4110  ;;  %v9816_v3 = vpop.permute.xlu1 %4188 }
 0x66e   :  { %v3901_v60 = vpack.c.bf16 %v3893_v59, %v3892_v55  ;;  %5114 = vmatpush.bf16.msra.mxu2 %v6425_v10 }
 0x670   :  { %3923 = vmatpush.bf16.msra.mxu1 %v3901_v60  ;;  %5081 = vmatpush.bf16.msra.mxu3 %v6404_v48  ;;  %v6512_v60 = vmov 16.0   ;;  %v6438_v48 = vld [vmem:[%s10213_s18 + $0x190] sm:$0xff] }
 0x671   :  { %6480 = vrcp.f32 %v6512_v60 }
 0x672   :  { %5115 = vmatpush.bf16.msra.mxu2 %v6424_v4 }
 0x673   :  { %v9736_v62 = vpop.permute.xlu2 %4183 }
 0x674   :  { %3924 = vmatpush.bf16.msra.mxu1 %v3900_v29  ;;  %v3963_v29 = vld [vmem:[%s10215_s20 + $0x10] sm:$0xff]  ;;  %s5287_s20 = sshll.u32 %s6513_s2, 4  ;;  %s5288_s20 = int_to_ptr.vmem [resolvable:$true] %s5287_s20 }
 0x676   :  { %5116 = vmatpush.bf16.msra.mxu2 %v6423_v12  ;;  %v6420_v12 = vld [vmem:[%s10213_s18 + $0x100] sm:$0xff] }
 0x677   :  { %v9814_v28 = vpop.eup %6480 }
 0x678   :  { %3925 = vmatpush.bf16.msra.mxu1 %v3899_v1  ;;  %v6413_v1 = vld [vmem:[%s10213_s18 + $0xc8] sm:$0xff]  ;;  %v3953_v25 = vmul.f32 16.0, %v9814_v28  ;;  %vm3957_vm14 = vweird.f32 %v9814_v28 }
 0x679   :  { %5099 = vmatpush.bf16.msrb.mxu0 %v6413_v1 }
 0x67a   :  { %v3954_v15 = vsub.f32 1.0, %v3953_v25 }
 0x67b   :  { %v9788_v55 = vpop.permute.xlu2 %4105 }
 0x67c   :  { %3926 = vmatpush.bf16.msra.mxu1 %v3898_v61  ;;  %v6443_v61 = vld [vmem:[%s10213_s18 + $0x1b8] sm:$0xff] }
 0x67d   :  { %5100 = vmatpush.bf16.msrb.mxu0 %v6412_v44  ;;  %5150 = vmatpush.bf16.msrb.mxu3 %v6443_v61 }
 0x67f   :  { %5944 = vmatmul.msk.bf16.vlgmr.msra.gmra.mxu1 %vm3912_vm11, %v6386_v52  ;;  %v6441_v52 = vld [vmem:[%s10213_s18 + $0x1a8] sm:$0xff] }
 0x680   :  { %3985 = vmatpush.msrb.mxu1 %v3976_v17  ;;  %v6440_v17 = vld [vmem:[%s10213_s18 + $0x1a0] sm:$0xff] }
 0x681   :  { %5169 = vmatpush.bf16.msra.mxu0 %v6451_v16  ;;  %5151 = vmatpush.bf16.msrb.mxu3 %v6442_v6 }
 0x682   :  { %3986 = vmatpush.msrb.mxu1 %v3975_v58 }
 0x684   :  { %3987 = vmatpush.msrb.mxu1 %v3974_v18 }
 0x685   :  { %5170 = vmatpush.bf16.msra.mxu0 %v6450_v43  ;;  %5152 = vmatpush.bf16.msrb.mxu3 %v6441_v52 }
 0x686   :  { %3988 = vmatpush.msrb.mxu1 %v3973_v35 }
 0x688   :  { %3989 = vmatpush.msrb.mxu1 %v3972_v42 }
 0x689   :  { %5153 = vmatpush.bf16.msrb.mxu3 %v6440_v17  ;;  %v6445_v17 = vld [vmem:[%s10213_s18 + $0x1c8] sm:$0xff] }
 0x68a   :  { %3990 = vmatpush.msrb.mxu1 %v3971_v41 }
 0x68c   :  { %3991 = vmatpush.msrb.mxu1 %v3970_v31  ;;  %v9840_v31 = vpop.permute.xlu0 %4256 }
 0x68d   :  { %5154 = vmatpush.bf16.msrb.mxu3 %v6439_v13 }
 0x68e   :  { %3992 = vmatpush.msrb.mxu1 %v3969_v32  ;;  %v9842_v32 = vpop.permute.xlu2 %4193 }
 0x68f   :  { %5945 = vmatmul.msk.bf16.gmra.mxu1 %vm3912_vm11, %v6387_v0  ;;  %v6449_v0 = vld [vmem:[%s10213_s18 + $0x1e8] sm:$0xff] }
 0x690   :  { %3993 = vmatpush.msrb.mxu1 %v3968_v24  ;;  %5171 = vmatpush.bf16.msra.mxu0 %v6449_v0  ;;  %v6447_v24 = vld [vmem:[%s10213_s18 + $0x1d8] sm:$0xff]  ;;  %v3955_v0 = vmul.f32 %v9814_v28, %v3954_v15  ;;  %v6436_v15 = vld [vmem:[%s10213_s18 + $0x180] sm:$0xff] }
 0x691   :  { %5155 = vmatpush.bf16.msrb.mxu3 %v6438_v48 }
 0x692   :  { %3994 = vmatpush.msrb.mxu1 %v3967_v21 }
 0x694   :  { %3995 = vmatpush.msrb.mxu1 %v3966_v26  ;;  %5172 = vmatpush.bf16.msra.mxu0 %v6448_v38  ;;  %v6422_v26 = vld [vmem:[%s10213_s18 + $0x110] sm:$0xff] }
 0x695   :  { %5117 = vmatpush.bf16.msra.mxu2 %v6422_v26 }
 0x696   :  { %3996 = vmatpush.msrb.mxu1 %v3965_v20 }
 0x698   :  { %3997 = vmatpush.msrb.mxu1 %v3964_v2  ;;  %5173 = vmatpush.bf16.msra.mxu0 %v6447_v24  ;;  %v6446_v2 = vld [vmem:[%s10213_s18 + $0x1d0] sm:$0xff] }
 0x69a   :  { %3998 = vmatpush.msrb.mxu1 %v3963_v29 }
 0x69c   :  { %3999 = vmatpush.msrb.mxu1 %v3962_v37  ;;  %v9875_v37 = vpop.permute.xlu1 %4261  ;;  %5174 = vmatpush.bf16.msra.mxu0 %v6446_v2 }
 0x69e   :  { %4000 = vmatpush.msrb.mxu1 %v3961_v9 }
 0x6a0   :  { %5175 = vmatpush.bf16.msra.mxu0 %v6445_v17 }
 0x6fc   :  { %v9738_v11 = vpop.f32.mrf.mxu1 }
 0x6fd   :  { %v4038_v18 = vrot.slane %v9738_v11, 3  ;;  %v4121_v35 = vrot.slane %v9738_v11, 5  ;;  %v4163_v63 = vrot.slane %v9738_v11, 7 }
 0x704   :  { %v9778_v22 = vpop.f32.mrf.mxu1 }
 0x705   :  { %v3938_v59 = vadd.f32 %v9778_v22, %v9738_v11  ;;  %v4039_v54 = vrot.slane %v9778_v22, 3  ;;  %v4122_v36 = vrot.slane %v9778_v22, 5  ;;  %v4164_v45 = vrot.slane %v9778_v22, 7 }
 0x707   :  { %v3939_v57 = vrot.slane %v3938_v59, 4  ;;  %v9828_v41 = vsel %vm4042_vm12, %v4038_v18, %v4039_v54  ;;  %v9834_v39 = vsel %vm4125_vm13, %v4121_v35, %v4122_v36  ;;  %v4169_v7 = vsel %vm1275_vm7, %v4163_v63, %v4164_v45 }
 0x708   :  { %v4072_v21 = vmul.f32 %v9632_v30, %v9828_v41  ;;  %v4156_v56 = vmul.f32 %v9684_v46, %v9834_v39  ;;  %v4197_v5 = vmul.f32 %v9736_v62, %v4169_v7 }
 0x709   :  { %v3940_v42 = vadd.f32 %v3939_v57, %v3938_v59  ;;  %v6421_v59 = vld [vmem:[%s10213_s18 + $0x108] sm:$0xff] }
 0x70a   :  { %v4076_v29 = vpack.c.bf16 %v4072_v21, %v4072_v21  ;;  %v4160_v33 = vpack.c.bf16 %v4156_v56, %v4156_v56  ;;  %v4201_v61 = vpack.c.bf16 %v4197_v5, %v4197_v5  ;;  %v6437_v57 = vld [vmem:[%s10213_s18 + $0x188] sm:$0xff]  ;;  %5118 = vmatpush.bf16.msra.mxu2 %v6421_v59  ;;  %v3956_v56 = vadd.f32 %v9814_v28, %v3955_v0 }
 0x70b   :  { %v3941_v1 = vrot.slane %v3940_v42, 2  ;;  %5156 = vmatpush.bf16.msrb.mxu3 %v6437_v57 }
 0x70c   :  { %v9810_v58 = vpop.f32.mrf.mxu1  ;;  %v4377_v38 = vunpack.c.l.b16 %v4160_v33  ;;  %v6444_v33 = vld [vmem:[%s10213_s18 + $0x1c0] sm:$0xff] }
 0x70d   :  { %v3942_v16 = vadd.f32 %v3941_v1, %v3940_v42  ;;  %v4389_v42 = vunpack.c.l.b16 %v4201_v61  ;;  %v4040_v1 = vrot.slane %v9810_v58, 3  ;;  %v4123_v26 = vrot.slane %v9810_v58, 5  ;;  %5176 = vmatpush.bf16.msra.mxu0 %v6444_v33 }
 0x70e   :  { %5119 = vmatpush.bf16.msra.mxu2 %v6420_v12  ;;  %v4079_v33 = vrot.slane %v9738_v11, 4 }
 0x70f   :  { %v3943_v7 = vrot.slane %v3942_v16, 1  ;;  %5157 = vmatpush.bf16.msrb.mxu3 %v6436_v15 }
 0x711   :  { %v3944_v61 = vadd.f32 %v3943_v7, %v3942_v16 }
 0x714   :  { %v9862_v20 = vpop.f32.mrf.mxu1 }
 0x715   :  { %v3945_v30 = vadd.f32 %v9862_v20, %v9810_v58  ;;  %v4041_v46 = vrot.slane %v9862_v20, 3  ;;  %v4124_v62 = vrot.slane %v9862_v20, 5  ;;  %v4166_v44 = vrot.slane %v9862_v20, 7 }
 0x717   :  { %v3946_v49 = vrot.slane %v3945_v30, 4  ;;  %v9879_v6 = vsel %vm4042_vm12, %v4041_v46, %v4038_v18  ;;  %v9883_v9 = vsel %vm4125_vm13, %v4124_v62, %v4121_v35  ;;  %v4170_v43 = vsel %vm1275_vm7, %v4166_v44, %v4163_v63  ;;  %v9902_v18 = vpop.permute.xlu0 %4228 }
 0x718   :  { %v4071_v60 = vmul.f32 %v9634_v40, %v9879_v6  ;;  %v4155_v10 = vmul.f32 %v9647_v53, %v9883_v9  ;;  %v4196_v52 = vmul.f32 %v9717_v27, %v4170_v43  ;;  %v9904_v40 = vpop.permute.xlu2 %4223  ;;  %v4353_v35 = vunpack.c.l.b16 %v4076_v29 }
 0x719   :  { %v3947_v4 = vadd.f32 %v3946_v49, %v3945_v30  ;;  %v4165_v29 = vrot.slane %v9810_v58, 7  ;;  %v9922_v43 = vsel %vm4042_vm12, %v4040_v1, %v4041_v46  ;;  %v9926_v59 = vsel %vm4125_vm13, %v4123_v26, %v4124_v62 }
 0x71a   :  { %v4075_v53 = vpack.c.bf16 %v4071_v60, %v4071_v60  ;;  %v4159_v27 = vpack.c.bf16 %v4155_v10, %v4155_v10  ;;  %v4200_v63 = vpack.c.bf16 %v4196_v52, %v4196_v52  ;;  %v9931_v60 = vsel %vm3957_vm14, %v9814_v28, %v3956_v56  ;;  %v9935_v10 = vpop.permute.xlu1 %4322  ;;  %v6459_v28 = vld [vmem:[%s10213_s18 + $0x238] sm:$0xff] }
 0x71b   :  { %v3948_v25 = vrot.slane %v3947_v4, 2  ;;  %v4167_v16 = vsel %vm1275_vm7, %v4165_v29, %v4166_v44  ;;  %v4044_v62 = vsel %vm4042_vm12, %v4039_v54, %v4040_v1  ;;  %v9945_v52 = vsel %vm4125_vm13, %v4122_v36, %v4123_v26 }
 0x71c   :  { %v4352_v13 = vunpack.c.l.b16 %v4075_v53  ;;  %v4376_v24 = vunpack.c.l.b16 %v4159_v27  ;;  %v4388_v21 = vunpack.c.l.b16 %v4200_v63  ;;  %v4074_v44 = vmul.f32 %v9658_v14, %v9922_v43  ;;  %v6458_v14 = vld [vmem:[%s10213_s18 + $0x230] sm:$0xff] }
 0x71d   :  { %v3949_v5 = vadd.f32 %v3948_v25, %v3947_v4  ;;  %v4158_v0 = vmul.f32 %v9767_v47, %v9926_v59  ;;  %v4168_v54 = vsel %vm1275_vm7, %v4164_v45, %v4165_v29  ;;  %v3959_v36 = vmul.f32 %v9931_v60, %v3944_v61 }
 0x71e   :  { %v4356_v48 = vpack.c.b16 %v4353_v35, %v4352_v13  ;;  %v4380_v30 = vpack.c.b16 %v4377_v38, %v4376_v24  ;;  %v4392_v2 = vpack.c.b16 %v4389_v42, %v4388_v21  ;;  %v4199_v4 = vmul.f32 %v9842_v32, %v4167_v16  ;;  %v6457_v42 = vld [vmem:[%s10213_s18 + $0x228] sm:$0xff] }
 0x71f   :  { %v3950_v49 = vrot.slane %v3949_v5, 1  ;;  %v4290_v17 = vpop.permute.xlu0 %4289  ;;  %v4073_v47 = vmul.f32 %v9645_v19, %v4044_v62  ;;  %v4157_v45 = vmul.f32 %v9731_v51, %v9945_v52  ;;  %v4198_v27 = vmul.f32 %v9816_v3, %v4168_v54  ;;  %v6456_v3 = vld [vmem:[%s10213_s18 + $0x220] sm:$0xff] }
 0x720   :  { %5044 = vmatmul.bf16.vlgmr.msrb.gmra.mxu2 %v4356_v48  ;;  %5082 = vmatmul.bf16.vlgmr.msra.gmra.mxu3 %v4380_v30  ;;  %v9964_v53 = vpop.permute.xlu2 %4327  ;;  %v4078_v63 = vpack.c.bf16 %v4074_v44, %v4074_v44  ;;  %v4162_v32 = vpack.c.bf16 %v4158_v0, %v4158_v0  ;;  %v4203_v38 = vpack.c.bf16 %v4199_v4, %v4199_v4  ;;  %v4081_v21 = vrot.slane %v9810_v58, 4  ;;  %v6454_v44 = vld [vmem:[%s10213_s18 + $0x210] sm:$0xff]  ;;  %v6453_v4 = vld [vmem:[%s10213_s18 + $0x208] sm:$0xff] }
 0x721   :  { %5101 = vmatmul.bf16.vlgmr.msrb.gmra.mxu0 %v4392_v2  ;;  %v3951_v46 = vadd.f32 %v3950_v49, %v3949_v5  ;;  %5188 = vmatpush.bf16.msrb.mxu2 %v6459_v28  ;;  %v4077_v7 = vpack.c.bf16 %v4073_v47, %v4073_v47  ;;  %v4161_v25 = vpack.c.bf16 %v4157_v45, %v4157_v45  ;;  %v4080_v48 = vrot.slane %v9778_v22, 4  ;;  %v6455_v49 = vld [vmem:[%s10213_s18 + $0x218] sm:$0xff] }
 0x722   :  { %v4202_v12 = vpack.c.bf16 %v4198_v27, %v4198_v27  ;;  %v4355_v19 = vunpack.c.l.b16 %v4078_v63  ;;  %v4379_v13 = vunpack.c.l.b16 %v4162_v32  ;;  %v4295_v24 = vpop.permute.xlu1 %4294  ;;  %v4391_v51 = vunpack.c.l.b16 %v4203_v38  ;;  %v6452_v32 = vld [vmem:[%s10213_s18 + $0x200] sm:$0xff] }
 0x723   :  { %v3960_v57 = vmul.f32 %v9931_v60, %v3951_v46  ;;  %v4354_v56 = vunpack.c.l.b16 %v4077_v7  ;;  %v4378_v5 = vunpack.c.l.b16 %v4161_v25  ;;  %v9983_v61 = vsel %vm4083_vm15, %v4080_v48, %v4081_v21 }
 0x724   :  { %v4390_v1 = vunpack.c.l.b16 %v4202_v12  ;;  %v4275_v16 = vmul.f32 %v9875_v37, %v4044_v62  ;;  %v9991_v46 = vsel %vm4083_vm15, %v4079_v33, %v4080_v48  ;;  %v4308_v28 = vmul.f32 %v4295_v24, %v9983_v61 }
 0x725   :  { %v3983_v35 = vsel %vm1203_vm9, %v3960_v57, %v3959_v36  ;;  %5189 = vmatpush.bf16.msrb.mxu2 %v6458_v14  ;;  %v4357_v30 = vpack.c.b16 %v4355_v19, %v4354_v56  ;;  %v4381_v2 = vpack.c.b16 %v4379_v13, %v4378_v5  ;;  %v4274_v0 = vmul.f32 %v9840_v31, %v9828_v41 }
 0x726   :  { %4001 = vmatmul.f32.vlgmr.msrb.gmra.mxu1 %v3983_v35  ;;  %v4393_v29 = vpack.c.b16 %v4391_v51, %v4390_v1  ;;  %v4307_v36 = vmul.f32 %v4290_v17, %v9991_v46  ;;  %v4279_v57 = vpack.c.bf16 %v4275_v16, %v4275_v16  ;;  %v4205_v37 = vpack.c.bf16 %v9778_v22, %v9778_v22 }
 0x727   :  { %v4272_v26 = vpop.permute.xlu0 %4271  ;;  %v4312_v62 = vpack.c.bf16 %v4308_v28, %v4308_v28  ;;  %v4278_v45 = vpack.c.bf16 %v4274_v0, %v4274_v0  ;;  %v4204_v41 = vpack.c.bf16 %v9738_v11, %v9738_v11  ;;  %v4082_v63 = vrot.slane %v9862_v20, 4 }
 0x728   :  { %v4267_v15 = vpop.permute.xlu2 %4266  ;;  %v4311_v31 = vpack.c.bf16 %v4307_v36, %v4307_v36  ;;  %v4425_v35 = vunpack.c.l.b16 %v4279_v57  ;;  %v4401_v17 = vunpack.c.l.b16 %v4205_v37 }
 0x729   :  { %5190 = vmatpush.bf16.msrb.mxu2 %v6457_v42  ;;  %v4437_v27 = vunpack.c.l.b16 %v4312_v62  ;;  %v4424_v38 = vunpack.c.l.b16 %v4278_v45  ;;  %v4400_v42 = vunpack.c.l.b16 %v4204_v41  ;;  %v10017_v24 = vsel %vm4083_vm15, %v4081_v21, %v4082_v63  ;;  %v4007_v41 = vld [vmem:[%s10217_s22 + $0x8] sm:$0xff] }
 0x72a   :  { %v9999_v54 = vpop.permute.xlu1 %4233  ;;  %v4436_v7 = vunpack.c.l.b16 %v4311_v31  ;;  %v4087_v51 = vsel %vm4083_vm15, %v4082_v63, %v4079_v33  ;;  %v4276_v48 = vmul.f32 %v4267_v15, %v9922_v43  ;;  %v4006_v31 = vld [vmem:[%s10217_s22] sm:$0xff]  ;;  %4029 = vmatpush.msra.mxu1 %v4007_v41  ;;  %v4340_v63 = vmul.f32 %v9935_v10, %v9834_v39  ;;  %v6429_v41 = vld [vmem:[%s10213_s18 + $0x148] sm:$0xff] }
 0x72b   :  { %v4404_v25 = vpack.c.b16 %v4401_v17, %v4400_v42  ;;  %v4428_v12 = vpack.c.b16 %v4425_v35, %v4424_v38  ;;  %v6403_v35 = vld [vmem:[%s10213_s18 + $0x78] sm:$0xff]  ;;  %v4341_v17 = vmul.f32 %v9964_v53, %v9945_v52  ;;  %v4208_v38 = vrot.slane %v9738_v11, 1  ;;  %v6400_v53 = vld [vmem:[%s10213_s18 + $0x60] sm:$0xff] }
 0x72c   :  { %v4440_v13 = vpack.c.b16 %v4437_v27, %v4436_v7  ;;  %v4209_v27 = vrot.slane %v9778_v22, 1  ;;  %4030 = vmatpush.msra.mxu1 %v4006_v31  ;;  %v6401_v22 = vld [vmem:[%s10213_s18 + $0x68] sm:$0xff]  ;;  %v4210_v39 = vrot.slane %v9810_v58, 1  ;;  %v6428_v31 = vld [vmem:[%s10213_s18 + $0x140] sm:$0xff] }
 0x72d   :  { %5191 = vmatpush.bf16.msrb.mxu2 %v6456_v3  ;;  %v4345_v42 = vpack.c.bf16 %v4341_v17, %v4341_v17 }
 0x72e   :  { %5055 = vmatpush.bf16.msrb.mxu1 %v6403_v35  ;;  %v4214_v7 = vsel %vm871_vm6, %v4208_v38, %v4209_v27 }
 0x72f   :  { %v4333_v14 = vpop.permute.xlu0 %4332  ;;  %v4449_v52 = vunpack.c.l.b16 %v4345_v42  ;;  %v4241_v11 = vmul.f32 %v9904_v40, %v4214_v7 }
 0x730   :  { %5049 = vmatmul.bf16.gmra.mxu2 %v4357_v30  ;;  %5087 = vmatmul.bf16.gmra.mxu3 %v4381_v2  ;;  %v10007_v47 = vpop.permute.xlu2 %4238  ;;  %v4342_v3 = vmul.f32 %v4333_v14, %v9926_v59  ;;  %v4277_v30 = vmul.f32 %v4272_v26, %v9879_v6  ;;  %v4207_v59 = vpack.c.bf16 %v9862_v20, %v9862_v20 }
 0x731   :  { %5106 = vmatmul.bf16.gmra.mxu0 %v4393_v29  ;;  %5192 = vmatpush.bf16.msrb.mxu2 %v6455_v49  ;;  %v4206_v6 = vpack.c.bf16 %v9810_v58, %v9810_v58 }
 0x732   :  { %v4338_v19 = vpop.permute.xlu1 %4337  ;;  %v4346_v2 = vpack.c.bf16 %v4342_v3, %v4342_v3  ;;  %v4281_v33 = vpack.c.bf16 %v4277_v30, %v4277_v30  ;;  %v4403_v26 = vunpack.c.l.b16 %v4207_v59  ;;  %v4245_v3 = vpack.c.bf16 %v4241_v11, %v4241_v11 }
 0x733   :  { %v4343_v56 = vmul.f32 %v4338_v19, %v9883_v9  ;;  %v4280_v9 = vpack.c.bf16 %v4276_v48, %v4276_v48  ;;  %v4402_v62 = vunpack.c.l.b16 %v4206_v6  ;;  %v4213_v19 = vsel %vm871_vm6, %v4209_v27, %v4210_v39 }
 0x734   :  { %v10026_v16 = vunpack.c.l.b16 %v4346_v2  ;;  %v4427_v36 = vunpack.c.l.b16 %v4281_v33  ;;  %v4412_v48 = vunpack.c.l.b16 %v4245_v3  ;;  %v4211_v30 = vrot.slane %v9862_v20, 1 }
 0x735   :  { %5193 = vmatpush.bf16.msrb.mxu2 %v6454_v44  ;;  %v4347_v21 = vpack.c.bf16 %v4343_v56, %v4343_v56  ;;  %v4426_v0 = vunpack.c.l.b16 %v4280_v9  ;;  %v4113_v56 = vmul.f32 %v9700_v23, %v4087_v51 }
 0x736   :  { %v4215_v23 = vsel %vm871_vm6, %v4211_v30, %v4208_v38 }
 0x737   :  { %v4305_v5 = vpop.permute.xlu0 %4304  ;;  %v10028_v28 = vunpack.c.l.b16 %v4347_v21  ;;  %v4429_v14 = vpack.c.b16 %v4427_v36, %v4426_v0  ;;  %v4117_v2 = vpack.c.bf16 %v4113_v56, %v4113_v56  ;;  %v6435_v36 = vld [vmem:[%s10213_s18 + $0x178] sm:$0xff] }
 0x738   :  { %v4300_v1 = vpop.permute.xlu2 %4299  ;;  %v4310_v49 = vmul.f32 %v4305_v5, %v4087_v51  ;;  %v4114_v5 = vmul.f32 %v9689_v8, %v9991_v46  ;;  %v4116_v51 = vmul.f32 %v9786_v50, %v10017_v24  ;;  %v6399_v50 = vld [vmem:[%s10213_s18 + $0x58] sm:$0xff] }
 0x739   :  { %5194 = vmatpush.bf16.msrb.mxu2 %v6453_v4  ;;  %v4309_v29 = vmul.f32 %v4300_v1, %v10017_v24  ;;  %v4453_v44 = vpack.c.b16 %v10028_v28, %v10026_v16  ;;  %v4405_v4 = vpack.c.b16 %v4403_v26, %v4402_v62  ;;  %v4115_v1 = vmul.f32 %v9788_v55, %v9983_v61  ;;  %v6396_v24 = vld [vmem:[%s10213_s18 + $0x40] sm:$0xff]  ;;  %v6433_v62 = vld [vmem:[%s10213_s18 + $0x168] sm:$0xff] }
 0x73a   :  { %v4314_v15 = vpack.c.bf16 %v4310_v49, %v4310_v49  ;;  %v4244_v55 = vmul.f32 %v10007_v47, %v4215_v23  ;;  %v4364_v61 = vunpack.c.l.b16 %v4117_v2  ;;  %v4120_v49 = vpack.c.bf16 %v4116_v51, %v4116_v51  ;;  %v6397_v47 = vld [vmem:[%s10213_s18 + $0x48] sm:$0xff]  ;;  %v6474_v16 = vld [vmem:[%s10216_s21] ss:$0 sm:$0xff] }
 0x73b   :  { %v4313_v43 = vpack.c.bf16 %v4309_v29, %v4309_v29  ;;  %v4118_v29 = vpack.c.bf16 %v4114_v5, %v4114_v5  ;;  %v4119_v8 = vpack.c.bf16 %v4115_v1, %v4115_v1  ;;  %v6476_v2 = vld [vmem:[%s10218_s23] ss:$0 sm:$0xff] }
 0x73c   :  { %v4439_v37 = vunpack.c.l.b16 %v4314_v15  ;;  %v4248_v59 = vpack.c.bf16 %v4244_v55, %v4244_v55 }
 0x73d   :  { %5195 = vmatpush.bf16.msrb.mxu2 %v6452_v32  ;;  %v4438_v57 = vunpack.c.l.b16 %v4313_v43  ;;  %v6402_v32 = vld [vmem:[%s10213_s18 + $0x70] sm:$0xff]  ;;  %v4365_v9 = vunpack.c.l.b16 %v4118_v29  ;;  %v4366_v33 = vunpack.c.l.b16 %v4119_v8  ;;  %v4367_v43 = vunpack.c.l.b16 %v4120_v49 }
 0x73e   :  { %5056 = vmatpush.bf16.msrb.mxu1 %v6402_v32  ;;  %v4415_v6 = vunpack.c.l.b16 %v4248_v59 }
 0x73f   :  { %v4441_v45 = vpack.c.b16 %v4439_v37, %v4438_v57  ;;  %v4368_v26 = vpack.c.b16 %v4365_v9, %v4364_v61  ;;  %v4369_v34 = vpack.c.b16 %v4367_v43, %v4366_v33  ;;  %v6434_v37 = vld [vmem:[%s10213_s18 + $0x170] sm:$0xff] }
 0x740   :  { %5120 = vmatmul.bf16.vlgmr.msra.gmra.mxu2 %v4404_v25  ;;  %5158 = vmatmul.bf16.vlgmr.msrb.gmra.mxu3 %v4428_v12  ;;  %v4344_v25 = vpack.c.bf16 %v4340_v63, %v4340_v63 }
 0x741   :  { %5177 = vmatmul.bf16.vlgmr.msra.gmra.mxu0 %v4440_v13  ;;  %v4242_v13 = vmul.f32 %v9902_v18, %v4213_v19  ;;  %v4212_v18 = vsel %vm871_vm6, %v4210_v39, %v4211_v30  ;;  %v6475_v19 = vld [vmem:[%s10214_s19] ss:$0 sm:$0xff] }
 0x742   :  { %v4448_v10 = vunpack.c.l.b16 %v4344_v25  ;;  %5057 = vmatpush.bf16.msrb.mxu1 %v6401_v22  ;;  %v4243_v46 = vmul.f32 %v9999_v54, %v4212_v18  ;;  %v6398_v54 = vld [vmem:[%s10213_s18 + $0x50] sm:$0xff]  ;;  %v5252_v18 = vld [vmem:[%s10219_s24 + $0x78] sm:$0xff] }
 0x743   :  { %v4246_v58 = vpack.c.bf16 %v4242_v13, %v4242_v13 }
 0x744   :  { %v4452_v12 = vpack.c.b16 %v4449_v52, %v4448_v10  ;;  %v4247_v20 = vpack.c.bf16 %v4243_v46, %v4243_v46 }
 0x745   :  { %v4413_v40 = vunpack.c.l.b16 %v4246_v58 }
 0x746   :  { %5058 = vmatpush.bf16.msrb.mxu1 %v6400_v53  ;;  %v4414_v15 = vunpack.c.l.b16 %v4247_v20 }
 0x747   :  { %v4416_v21 = vpack.c.b16 %v4413_v40, %v4412_v48 }
 0x748   :  { %v4417_v0 = vpack.c.b16 %v4415_v6, %v4414_v15 }
 0x74a   :  { %5059 = vmatpush.bf16.msrb.mxu1 %v6399_v50 }
 0x74e   :  { %5060 = vmatpush.bf16.msrb.mxu1 %v6398_v54 }
 0x750   :  { %5125 = vmatmul.bf16.gmra.mxu2 %v4405_v4  ;;  %5163 = vmatmul.bf16.gmra.mxu3 %v4429_v14  ;;  %v6432_v4 = vld [vmem:[%s10213_s18 + $0x160] sm:$0xff]  ;;  %v6431_v14 = vld [vmem:[%s10213_s18 + $0x158] sm:$0xff] }
 0x751   :  { %5182 = vmatmul.bf16.gmra.mxu0 %v4441_v45  ;;  %v6430_v45 = vld [vmem:[%s10213_s18 + $0x150] sm:$0xff] }
 0x752   :  { %5061 = vmatpush.bf16.msrb.mxu1 %v6397_v47 }
 0x756   :  { %5062 = vmatpush.bf16.msrb.mxu1 %v6396_v24 }
 0x760   :  { %5196 = vmatmul.bf16.vlgmr.msrb.gmra.mxu2 %v4452_v12 }
 0x770   :  { %5201 = vmatmul.bf16.gmra.mxu2 %v4453_v44 }
 0x79e   :  { %v5102_v38 = vpop.f32.mrf.mxu0 }
 0x7a3   :  { %v4002_v28 = vpop.f32.mrf.mxu1  ;;  %v5045_v35 = vpop.f32.mrf.mxu2 }
 0x7a4   :  { %v4003_v44 = vadd.f32 %v6474_v16, %v4002_v28  ;;  %v5083_v32 = vpop.f32.mrf.mxu3  ;;  %v5046_v3 = vadd.f32 %v6475_v19, %v5045_v35  ;;  %v5249_v35 = vld [vmem:[%s10219_s24 + $0x60] sm:$0xff] }
 0x7a6   :  { %v4005_v57 = vmax.f32 %v4003_v44, 0.0  ;;  %v5104_v22 = vpop.f32.mrf.mxu0 }
 0x7a8   :  { %5946 = vmatmul.msk.f32.vlgmr.msra.gmra.mxu1 %vm126_vm4, %v4005_v57 }
 0x7a9   :  { %5131 = vmatpush.bf16.msra.mxu1 %v6435_v36 }
 0x7ab   :  { %v5047_v17 = vpop.f32.mrf.mxu2 }
 0x7ac   :  { %v5085_v25 = vpop.f32.mrf.mxu3  ;;  %v5048_v30 = vadd.f32 %v6475_v19, %v5047_v17 }
 0x7ad   :  { %5132 = vmatpush.bf16.msra.mxu1 %v6434_v37 }
 0x7ae   :  { %v5107_v11 = vpop.f32.mrf.mxu0 }
 0x7b0   :  { %5063 = vmatmul.bf16.vlgmr.msrb.gmra.mxu1 %v4368_v26  ;;  %v10786_v26 = vmov 0.0  }
 0x7b1   :  { %5133 = vmatpush.bf16.msra.mxu1 %v6433_v62 }
 0x7b3   :  { %v5050_v27 = vpop.f32.mrf.mxu2 }
 0x7b4   :  { %v5088_v10 = vpop.f32.mrf.mxu3  ;;  %v5051_v20 = vadd.f32 %v6475_v19, %v5050_v27 }
 0x7b5   :  { %5134 = vmatpush.bf16.msra.mxu1 %v6432_v4 }
 0x7b6   :  { %v5109_v5 = vpop.f32.mrf.mxu0 }
 0x7b9   :  { %5135 = vmatpush.bf16.msra.mxu1 %v6431_v14 }
 0x7bb   :  { %v5052_v63 = vpop.f32.mrf.mxu2 }
 0x7bc   :  { %v5090_v56 = vpop.f32.mrf.mxu3  ;;  %v5053_v16 = vadd.f32 %v6475_v19, %v5052_v63 }
 0x7bd   :  { %5136 = vmatpush.bf16.msra.mxu1 %v6430_v45  ;;  %v5251_v45 = vld [vmem:[%s10219_s24 + $0x70] sm:$0xff] }
 0x7be   :  { %v5178_v51 = vpop.f32.mrf.mxu0 }
 0x7c0   :  { %5068 = vmatmul.bf16.gmra.mxu1 %v4369_v34 }
 0x7c1   :  { %5137 = vmatpush.bf16.msra.mxu1 %v6429_v41  ;;  %v5250_v41 = vld [vmem:[%s10219_s24 + $0x68] sm:$0xff] }
 0x7c3   :  { %v5121_v42 = vpop.f32.mrf.mxu2 }
 0x7c4   :  { %v5159_v23 = vpop.f32.mrf.mxu3 }
 0x7c5   :  { %5138 = vmatpush.bf16.msra.mxu1 %v6428_v31 }
 0x7c6   :  { %v5180_v47 = vpop.f32.mrf.mxu0 }
 0x7c9   :  { %5261 = vmatpush.msrb.mxu1 %v5252_v18 }
 0x7cb   :  { %v5123_v39 = vpop.f32.mrf.mxu2  ;;  %5262 = vmatpush.msrb.mxu1 %v5251_v45 }
 0x7cc   :  { %v5161_v6 = vpop.f32.mrf.mxu3 }
 0x7cd   :  { %5263 = vmatpush.msrb.mxu1 %v5250_v41 }
 0x7cf   :  { %5264 = vmatpush.msrb.mxu1 %v5249_v35 }
 0x7d0   :  { %5139 = vmatmul.bf16.vlgmr.msra.gmra.mxu1 %v4416_v21 }
 0x7d3   :  { %v5126_v12 = vpop.f32.mrf.mxu2 }
 0x7db   :  { %v10127_v1 = vpop.f32.mrf.mxu2 }
 0x7e0   :  { %5144 = vmatmul.bf16.gmra.mxu1 %v4417_v0 }
 0x7e3   :  { %v5197_v61 = vpop.f32.mrf.mxu2 }
 0x7eb   :  { %v5199_v57 = vpop.f32.mrf.mxu2 }
 0x825   :  { %v4032_v7 = vpop.f32.mrf.mxu1 }
 0x826   :  { %v4033_v8 = vadd.f32 %v6476_v2, %v4032_v7 }
 0x828   :  { %vm4035_vm0 = vcmp.gt.f32.partialorder %v4033_v8, 0.0  ;;  %v5241_v8 = vld [vmem:[%s10219_s24 + $0x20] sm:$0xff] }
 0x829   :  { %v10136_v34 = vsel %vm4035_vm0, 1.0, %v10786_v26  ;;  %v5238_v26 = vld [vmem:[%s10219_s24 + $0x8] sm:$0xff] }
 0x82a   :  { %v5213_v28 = vperm.slane %v10136_v34, 0 }
 0x82d   :  { %v5064_v52 = vpop.f32.mrf.mxu1 }
 0x82e   :  { %v5065_v58 = vadd.f32 %v5064_v52, %v5046_v3  ;;  %v5183_v52 = vpop.f32.mrf.mxu0 }
 0x830   :  { %v5084_v48 = vadd.f32 %v5083_v32, %v5065_v58  ;;  %v5248_v32 = vld [vmem:[%s10219_s24 + $0x58] sm:$0xff] }
 0x831   :  { %5265 = vmatpush.msrb.mxu1 %v5248_v32  ;;  %v5244_v58 = vld [vmem:[%s10219_s24 + $0x38] sm:$0xff] }
 0x832   :  { %v5103_v29 = vadd.f32 %v5102_v38, %v5084_v48  ;;  %v5164_v38 = vpop.f32.mrf.mxu3 }
 0x834   :  { %v5122_v55 = vadd.f32 %v5121_v42, %v5103_v29 }
 0x835   :  { %v5066_v53 = vpop.f32.mrf.mxu1 }
 0x836   :  { %v5067_v21 = vadd.f32 %v5066_v53, %v5048_v30  ;;  %v5185_v18 = vpop.f32.mrf.mxu0 }
 0x838   :  { %v5086_v46 = vadd.f32 %v5085_v25, %v5067_v21 }
 0x83a   :  { %v5105_v43 = vadd.f32 %v5104_v22, %v5086_v46  ;;  %v5247_v22 = vld [vmem:[%s10219_s24 + $0x50] sm:$0xff]  ;;  %v5166_v30 = vpop.f32.mrf.mxu3 }
 0x83b   :  { %5266 = vmatpush.msrb.mxu1 %v5247_v22 }
 0x83c   :  { %v5124_v54 = vadd.f32 %v5123_v39, %v5105_v43 }
 0x83d   :  { %v5069_v13 = vpop.f32.mrf.mxu1 }
 0x83e   :  { %v5070_v9 = vadd.f32 %v5069_v13, %v5051_v20  ;;  %v5245_v13 = vld [vmem:[%s10219_s24 + $0x40] sm:$0xff]  ;;  %v5240_v20 = vld [vmem:[%s10219_s24 + $0x18] sm:$0xff] }
 0x840   :  { %v5089_v0 = vadd.f32 %v5088_v10, %v5070_v9 }
 0x842   :  { %v5108_v14 = vadd.f32 %v5107_v11, %v5089_v0  ;;  %v5246_v11 = vld [vmem:[%s10219_s24 + $0x48] sm:$0xff]  ;;  %v5237_v0 = vld [vmem:[%s10219_s24] sm:$0xff] }
 0x843   :  { %5267 = vmatpush.msrb.mxu1 %v5246_v11 }
 0x844   :  { %v5127_v63 = vadd.f32 %v5126_v12, %v5108_v14  ;;  %v5202_v12 = vpop.f32.mrf.mxu2  ;;  %v6477_v14 = vld [vmem:[%s10220_s25] ss:$0 sm:$0xff] }
 0x845   :  { %v5071_v40 = vpop.f32.mrf.mxu1  ;;  %5268 = vmatpush.msrb.mxu1 %v5245_v13 }
 0x846   :  { %v5072_v37 = vadd.f32 %v5071_v40, %v5053_v16  ;;  %v5243_v40 = vld [vmem:[%s10219_s24 + $0x30] sm:$0xff] }
 0x847   :  { %5269 = vmatpush.msrb.mxu1 %v5244_v58 }
 0x848   :  { %v5091_v17 = vadd.f32 %v5090_v56, %v5072_v37 }
 0x849   :  { %5270 = vmatpush.msrb.mxu1 %v5243_v40 }
 0x84a   :  { %v5110_v53 = vadd.f32 %v5109_v5, %v5091_v17 }
 0x84c   :  { %v5129_v56 = vadd.f32 %v10127_v1, %v5110_v53  ;;  %v5242_v1 = vld [vmem:[%s10219_s24 + $0x28] sm:$0xff]  ;;  %v5204_v46 = vpop.f32.mrf.mxu2 }
 0x84d   :  { %v5140_v49 = vpop.f32.mrf.mxu1  ;;  %5271 = vmatpush.msrb.mxu1 %v5242_v1 }
 0x84e   :  { %v5141_v59 = vadd.f32 %v5140_v49, %v5122_v55 }
 0x84f   :  { %5272 = vmatpush.msrb.mxu1 %v5241_v8 }
 0x850   :  { %v5160_v33 = vadd.f32 %v5159_v23, %v5141_v59  ;;  %v5212_v23 = vrot.slane %v10136_v34, 1 }
 0x851   :  { %5273 = vmatpush.msrb.mxu1 %v5240_v20 }
 0x852   :  { %v5179_v15 = vadd.f32 %v5178_v51, %v5160_v33  ;;  %v5214_v59 = vperm.slane %v5212_v23, 0  ;;  %v5239_v33 = vld [vmem:[%s10219_s24 + $0x10] sm:$0xff] }
 0x853   :  { %5274 = vmatpush.msrb.mxu1 %v5239_v33 }
 0x854   :  { %v5198_v50 = vadd.f32 %v5197_v61, %v5179_v15 }
 0x855   :  { %v5142_v24 = vpop.f32.mrf.mxu1  ;;  %5275 = vmatpush.msrb.mxu1 %v5238_v26 }
 0x856   :  { %v5207_v44 = vmax.f32 %v5198_v50, 0.0  ;;  %v5143_v36 = vadd.f32 %v5142_v24, %v5124_v54 }
 0x857   :  { %5276 = vmatpush.msrb.mxu1 %v5237_v0 }
 0x858   :  { %v5217_v62 = vmul.f32 %v5213_v28, %v5207_v44  ;;  %v5162_v4 = vadd.f32 %v5161_v6, %v5143_v36 }
 0x85a   :  { %v5181_v31 = vadd.f32 %v5180_v47, %v5162_v4 }
 0x85c   :  { %v5200_v27 = vadd.f32 %v5199_v57, %v5181_v31 }
 0x85d   :  { %v5145_v42 = vpop.f32.mrf.mxu1 }
 0x85e   :  { %v5208_v7 = vmax.f32 %v5200_v27, 0.0  ;;  %v5146_v25 = vadd.f32 %v5145_v42, %v5127_v63 }
 0x860   :  { %v5218_v39 = vmul.f32 %v5213_v28, %v5208_v7  ;;  %v5165_v10 = vadd.f32 %v5164_v38, %v5146_v25 }
 0x862   :  { %v5221_v19 = vadd.f32 %v5218_v39, %v5217_v62  ;;  %v5184_v3 = vadd.f32 %v5183_v52, %v5165_v10 }
 0x864   :  { %v5222_v2 = vrot.slane %v5221_v19, 4  ;;  %v5203_v21 = vadd.f32 %v5202_v12, %v5184_v3 }
 0x865   :  { %v5147_v5 = vpop.f32.mrf.mxu1 }
 0x866   :  { %v5148_v48 = vadd.f32 %v5147_v5, %v5129_v56  ;;  %v5223_v55 = vadd.f32 %v5222_v2, %v5221_v19  ;;  %v5209_v61 = vmax.f32 %v5203_v21, 0.0 }
 0x868   :  { %v5167_v29 = vadd.f32 %v5166_v30, %v5148_v48  ;;  %v5224_v43 = vrot.slane %v5223_v55, 2  ;;  %v5219_v15 = vmul.f32 %v5214_v59, %v5209_v61 }
 0x86a   :  { %v5186_v51 = vadd.f32 %v5185_v18, %v5167_v29  ;;  %v5225_v54 = vadd.f32 %v5224_v43, %v5223_v55 }
 0x86c   :  { %v5205_v49 = vadd.f32 %v5204_v46, %v5186_v51  ;;  %v5226_v16 = vrot.slane %v5225_v54, 1 }
 0x86e   :  { %v5210_v9 = vmax.f32 %v5205_v49, 0.0  ;;  %v5227_v44 = vadd.f32 %v5226_v16, %v5225_v54 }
 0x870   :  { %v5220_v6 = vmul.f32 %v5214_v59, %v5210_v9  ;;  %v5235_v37 = vmul.f32 %v5227_v44, %v9931_v60 }
 0x872   :  { %v5228_v34 = vadd.f32 %v5220_v6, %v5219_v15 }
 0x874   :  { %v5229_v50 = vrot.slane %v5228_v34, 4 }
 0x876   :  { %v5230_v47 = vadd.f32 %v5229_v50, %v5228_v34 }
 0x878   :  { %v5231_v24 = vrot.slane %v5230_v47, 2 }
 0x87a   :  { %v5232_v28 = vadd.f32 %v5231_v24, %v5230_v47 }
 0x87c   :  { %v5233_v36 = vrot.slane %v5232_v28, 1 }
 0x87e   :  { %v5234_v57 = vadd.f32 %v5233_v36, %v5232_v28 }
 0x880   :  { %v5236_v62 = vmul.f32 %v5234_v57, %v9931_v60 }
 0x882   :  { %v5259_v4 = vsel %vm1203_vm9, %v5236_v62, %v5235_v37 }
 0x883   :  { %5277 = vmatmul.f32.vlgmr.msrb.gmra.mxu1 %v5259_v4 }
 0x900   :  { %v5278_v45 = vpop.f32.mrf.mxu1 }
 0x901   :  { %v5279_v41 = vadd.f32 %v6477_v14, %v5278_v45 }
 0x903   :  { %5281 = vst [vmem:[#allocation2] sm:$0x3] %v5279_v41 }
 0x904   :  { %5292 = dma.vmem_to_hbm [thread:$0]  %s5288_s20, 32, %s5290_s28, [#allocation3]  }
 0x905   :  { %6507 = dma.done.wait [#allocation3], 32  }
 0x906   :  { %6508 = vsyncadd [#allocation3], 4294967264 }
 0x907   :  { %5297 = vsyncpa [#allocation3], 1 }

</bundles_post_ra>
